<compile_context>
chip_gen: v7x
topology: tpu7x:2x2x1
jax: 0.10.0
libtpu: 0.0.40
codegen_flags: <defaults>
</compile_context>

<pallas_src>
import functools

import jax
import jax.numpy as jnp
from jax.experimental import pallas as pl
from jax.experimental.pallas import tpu as pltpu


def _sym_index_map(size, lo, hi):
    """Edge-inclusive symmetric source index for every output position."""
    out = []
    for o in range(lo + size + hi):
        if o < lo:
            out.append(lo - 1 - o)
        elif o < lo + size:
            out.append(o - lo)
        else:
            out.append(2 * size + lo - 1 - o)
    return out


def _merge_runs(srcs):
    """Merge a static index list into (start, length) ascending-contiguous runs."""
    pieces = []
    start, length = srcs[0], 1
    for s in srcs[1:]:
        if s == start + length:
            length += 1
        else:
            pieces.append((start, length))
            start, length = s, 1
    pieces.append((start, length))
    return tuple(pieces)


# ---------------------------------------------------------------------------
# Lane-dense kernel: blocks are (TB, D, H*W) -> (TB, Do, Ho*Wo).
# ---------------------------------------------------------------------------
def _reflection_pad3d_flat_kernel(x_ref, o_ref, *, lane_pieces, d_pieces):
    x = x_ref[...]                                       # (TB, D, H*W)
    # Fused H/W reflection as a static lane gather (contiguous-run slices).
    parts = [x[:, :, s:s + l] for (s, l) in lane_pieces]
    plane = parts[0] if len(parts) == 1 else jnp.concatenate(parts, axis=-1)
    # D reflection along the sublane dim; corners already carry H/W padding.
    dparts = [plane[:, s:s + l, :] for (s, l) in d_pieces]
    full = dparts[0] if len(dparts) == 1 else jnp.concatenate(dparts, axis=1)
    o_ref[...] = full                                    # one wide store


# ---------------------------------------------------------------------------
# Fallback kernel for very large planes: blocks are (TB, D, H, W).
# ---------------------------------------------------------------------------
def _reflection_pad3d_4d_kernel(x_ref, o_ref, *, pads, dims):
    (dl, dr), (hl, hr), (wl, wr) = pads
    D, H, W = dims
    x = x_ref[...]                                       # (TB, D, H, W)
    # Interior: one large store (no full-size padded temporary).
    o_ref[:, dl:dl + D, hl:hl + H, wl:wl + W] = x
    # W border columns: thin stores sourced from x.
    for j in range(wl):
        o_ref[:, dl:dl + D, hl:hl + H, j:j + 1] = x[..., wl - 1 - j:wl - j]
    for m in range(wr):
        o_ref[:, dl:dl + D, hl:hl + H, wl + W + m:wl + W + m + 1] = (
            x[..., W - 1 - m:W - m])
    # H border rows: read back already-written (W-padded) interior rows.
    for j in range(hl):
        o_ref[:, dl:dl + D, j:j + 1, :] = (
            o_ref[:, dl:dl + D, 2 * hl - 1 - j:2 * hl - j, :])
    for m in range(hr):
        o_ref[:, dl:dl + D, hl + H + m:hl + H + m + 1, :] = (
            o_ref[:, dl:dl + D, hl + H - 1 - m:hl + H - m, :])
    # D border planes: read back already-written planes (corners free).
    for j in range(dl):
        o_ref[:, j:j + 1] = o_ref[:, 2 * dl - 1 - j:2 * dl - j]
    for m in range(dr):
        o_ref[:, dl + D + m:dl + D + m + 1] = o_ref[:, dl + D - 1 - m:dl + D - m]


def _pick_tile(nc, in_slab, out_slab):
    """Per-grid-step batch TB plus a derived vmem_limit_bytes."""
    try:
        vmem_cap = int(pltpu.get_tpu_info().vmem_capacity_bytes)
    except Exception:                                    # not on TPU / old jax
        vmem_cap = 64 << 20
    # Large double-buffered footprint with headroom:
    # v5e/v6e (128 MiB) -> 56 MiB target; v7x (64 MiB) -> ~38 MiB target.
    vmem_target = min(int(vmem_cap * 0.6), 56 << 20)
    per_tb = 2 * in_slab + 4 * out_slab                  # dbl-buffered io + temps
    cap = max(1, min(nc, vmem_target // max(per_tb, 1)))
    # Keep >= 2 grid steps only when each step still moves a multi-MiB slab
    # (keeps both v7x TensorCores busy without penalizing 1-TC v5e/v6e).
    if nc >= 2 and cap >= nc and (nc // 2) * (in_slab + out_slab) >= (2 << 20):
        cap = max(1, nc // 2)
    # Prefer an exact divisor (no ragged last block) unless it wastes > 2x.
    tb = 1
    for d in range(1, cap + 1):
        if nc % d == 0:
            tb = d
    if tb * 2 < cap:
        tb = cap
    footprint = tb * per_tb
    vmem_limit = int(min(vmem_cap,
                         max(32 << 20, footprint + footprint // 4 + (4 << 20))))
    return tb, vmem_limit


def reflection_pad3d(x, padding, *, lane_flatten=None):
    """JAX/Pallas equivalent of fusionnet's ReflectionPad3d(padding)(x), NCDHW.

    padding: int or 6-tuple (w_lo, w_hi, h_lo, h_hi, d_lo, d_hi) in F.pad
    order (last dim first).  Edge-inclusive symmetric padding.
    """
    if isinstance(padding, int):
        pad6 = (padding,) * 6
    else:
        pad6 = tuple(int(p) for p in padding)
        assert len(pad6) == 6
    wl, wr, hl, hr, dl, dr = pad6

    N, C, D, H, W = x.shape
    for lo, hi, size, name in ((dl, dr, D, "D"), (hl, hr, H, "H"), (wl, wr, W, "W")):
        assert lo >= 0 and hi >= 0, f"negative pad on {name}"
        assert lo <= size and hi <= size, (
            f"symmetric pad on {name} must be <= dim size: ({lo},{hi}) vs {size}")

    Do, Ho, Wo = D + dl + dr, H + hl + hr, W + wl + wr
    nc = N * C
    itemsize = jnp.dtype(x.dtype).itemsize
    in_slab = D * H * W * itemsize
    out_slab = Do * Ho * Wo * itemsize
    tb, vmem_limit = _pick_tile(nc, in_slab, out_slab)
    grid = (pl.cdiv(nc, tb),)

    # Static source-index maps (fused H/W gather + D plane map).
    h_map = _sym_index_map(H, hl, hr)
    w_map = _sym_index_map(W, wl, wr)
    lane_pieces = _merge_runs([h * W + w for h in h_map for w in w_map])
    d_pieces = _merge_runs(_sym_index_map(D, dl, dr))

    if lane_flatten is None:
        lane_flatten = len(lane_pieces) <= 512           # avoid huge unrolled gathers

    cost = pl.CostEstimate(flops=0, transcendentals=0,
                           bytes_accessed=nc * (in_slab + out_slab))
    cparams = pltpu.CompilerParams(dimension_semantics=("parallel",),
                                   vmem_limit_bytes=vmem_limit)

    if lane_flatten:
        kernel = functools.partial(_reflection_pad3d_flat_kernel,
                                   lane_pieces=lane_pieces, d_pieces=d_pieces)
        out = pl.pallas_call(
            kernel,
            out_shape=jax.ShapeDtypeStruct((nc, Do, Ho * Wo), x.dtype),
            grid=grid,
            # Last two block dims equal the full array dims -> no (8,128)
            # divisibility constraint; lane axis is Ho*Wo (dense stores).
            in_specs=[pl.BlockSpec((tb, D, H * W), lambda b: (b, 0, 0))],
            out_specs=pl.BlockSpec((tb, Do, Ho * Wo), lambda b: (b, 0, 0)),
            compiler_params=cparams,
            cost_estimate=cost,
        )(x.reshape(nc, D, H * W))
    else:
        kernel = functools.partial(_reflection_pad3d_4d_kernel,
                                   pads=((dl, dr), (hl, hr), (wl, wr)),
                                   dims=(D, H, W))
        out = pl.pallas_call(
            kernel,
            out_shape=jax.ShapeDtypeStruct((nc, Do, Ho, Wo), x.dtype),
            grid=grid,
            in_specs=[pl.BlockSpec((tb, D, H, W), lambda b: (b, 0, 0, 0))],
            out_specs=pl.BlockSpec((tb, Do, Ho, Wo), lambda b: (b, 0, 0, 0)),
            compiler_params=cparams,
            cost_estimate=cost,
        )(x.reshape(nc, D, H, W))
    return out.reshape(N, C, Do, Ho, Wo)


class ReflectionPad3d:
    """Thin wrapper mirroring the PyTorch module interface."""

    def __init__(self, padding):
        self.padding = (padding,) * 6 if isinstance(padding, int) else tuple(padding)

    def __call__(self, x):
        return reflection_pad3d(x, self.padding)

    def __repr__(self):
        return self.__class__.__name__ + "(" + str(self.padding) + ")"


if __name__ == "__main__":
    key = jax.random.PRNGKey(0)
    k0, k1 = jax.random.split(key)

    # Small NCDHW input consistent with a volumetric forward pass.
    x = jax.random.normal(k0, (2, 4, 8, 8, 8), dtype=jnp.float32)
    pad = 2
    module = ReflectionPad3d(pad)
    y = jax.block_until_ready(module(x))

    # Reference: jnp.pad 'symmetric' == the edge-inclusive reflection that the
    # project's ReflectionPadNd implements (for its uniform int padding).
    ref = jnp.pad(
        x, ((0, 0), (0, 0), (pad, pad), (pad, pad), (pad, pad)), mode="symmetric")
    assert y.shape == ref.shape and y.dtype == x.dtype, (y.shape, ref.shape, y.dtype)
    assert jnp.array_equal(y, ref), "mismatch vs symmetric-pad reference (flat path)"

    # Exercise the 4-D fallback path (used automatically for very large planes).
    y4 = jax.block_until_ready(reflection_pad3d(x, pad, lane_flatten=False))
    assert jnp.array_equal(y4, ref), "mismatch vs reference (4-D fallback path)"

    # Odd batch*channels, distinct D/H/W, per-axis (lo, hi) pads.
    x2 = jax.random.normal(k1, (1, 3, 6, 10, 16), dtype=jnp.float32)
    pad6 = (1, 2, 0, 3, 2, 0)   # (w_lo, w_hi, h_lo, h_hi, d_lo, d_hi)
    y2 = jax.block_until_ready(reflection_pad3d(x2, pad6))
    ref2 = jnp.pad(
        x2, ((0, 0), (0, 0), (2, 0), (0, 3), (1, 2)), mode="symmetric")
    assert y2.shape == ref2.shape and jnp.array_equal(y2, ref2), "mismatch (shape 2)"

    print("KERNEL_OK")
</pallas_src>

<mosaic_0001>
module attributes {stable_mosaic.version = 11 : i64} {
  func.func @_reflection_pad3d_flat_kernel(%arg0: i32, %arg1: memref<8x8x64xf32, #tpu.memory_space<vmem>>, %arg2: memref<8x12x144xf32, #tpu.memory_space<vmem>>) attributes {dimension_semantics = [#tpu.dimension_semantics<parallel>], iteration_bounds = array<i64: 1>, scalar_prefetch = 0 : i64, scratch_operands = 0 : i64, tpu.core_type = #tpu.core_type<tc>, window_params = [{transform_indices = @transform_0, window_bounds = array<i64: 8, 8, 64>}, {transform_indices = @transform_1, window_bounds = array<i64: 8, 12, 144>}]} {
    %c0 = arith.constant 0 : index
    %c0_0 = arith.constant 0 : index
    %c0_1 = arith.constant 0 : index
    %0 = vector.load %arg1[%c0, %c0_0, %c0_1] : memref<8x8x64xf32, #tpu.memory_space<vmem>>, vector<8x8x64xf32>
    %1 = vector.extract_strided_slice %0 {offsets = [0, 0, 9], sizes = [8, 8, 1], strides = [1, 1, 1]} : vector<8x8x64xf32> to vector<8x8x1xf32>
    %2 = vector.extract_strided_slice %0 {offsets = [0, 0, 8], sizes = [8, 8, 1], strides = [1, 1, 1]} : vector<8x8x64xf32> to vector<8x8x1xf32>
    %3 = vector.extract_strided_slice %0 {offsets = [0, 0, 8], sizes = [8, 8, 8], strides = [1, 1, 1]} : vector<8x8x64xf32> to vector<8x8x8xf32>
    %4 = vector.extract_strided_slice %0 {offsets = [0, 0, 15], sizes = [8, 8, 1], strides = [1, 1, 1]} : vector<8x8x64xf32> to vector<8x8x1xf32>
    %5 = vector.extract_strided_slice %0 {offsets = [0, 0, 14], sizes = [8, 8, 1], strides = [1, 1, 1]} : vector<8x8x64xf32> to vector<8x8x1xf32>
    %6 = vector.extract_strided_slice %0 {offsets = [0, 0, 1], sizes = [8, 8, 1], strides = [1, 1, 1]} : vector<8x8x64xf32> to vector<8x8x1xf32>
    %7 = vector.extract_strided_slice %0 {offsets = [0, 0, 0], sizes = [8, 8, 1], strides = [1, 1, 1]} : vector<8x8x64xf32> to vector<8x8x1xf32>
    %8 = vector.extract_strided_slice %0 {offsets = [0, 0, 0], sizes = [8, 8, 8], strides = [1, 1, 1]} : vector<8x8x64xf32> to vector<8x8x8xf32>
    %9 = vector.extract_strided_slice %0 {offsets = [0, 0, 7], sizes = [8, 8, 1], strides = [1, 1, 1]} : vector<8x8x64xf32> to vector<8x8x1xf32>
    %10 = vector.extract_strided_slice %0 {offsets = [0, 0, 6], sizes = [8, 8, 1], strides = [1, 1, 1]} : vector<8x8x64xf32> to vector<8x8x1xf32>
    %11 = vector.extract_strided_slice %0 {offsets = [0, 0, 1], sizes = [8, 8, 1], strides = [1, 1, 1]} : vector<8x8x64xf32> to vector<8x8x1xf32>
    %12 = vector.extract_strided_slice %0 {offsets = [0, 0, 0], sizes = [8, 8, 1], strides = [1, 1, 1]} : vector<8x8x64xf32> to vector<8x8x1xf32>
    %13 = vector.extract_strided_slice %0 {offsets = [0, 0, 0], sizes = [8, 8, 8], strides = [1, 1, 1]} : vector<8x8x64xf32> to vector<8x8x8xf32>
    %14 = vector.extract_strided_slice %0 {offsets = [0, 0, 7], sizes = [8, 8, 1], strides = [1, 1, 1]} : vector<8x8x64xf32> to vector<8x8x1xf32>
    %15 = vector.extract_strided_slice %0 {offsets = [0, 0, 6], sizes = [8, 8, 1], strides = [1, 1, 1]} : vector<8x8x64xf32> to vector<8x8x1xf32>
    %16 = vector.extract_strided_slice %0 {offsets = [0, 0, 9], sizes = [8, 8, 1], strides = [1, 1, 1]} : vector<8x8x64xf32> to vector<8x8x1xf32>
    %17 = vector.extract_strided_slice %0 {offsets = [0, 0, 8], sizes = [8, 8, 1], strides = [1, 1, 1]} : vector<8x8x64xf32> to vector<8x8x1xf32>
    %18 = vector.extract_strided_slice %0 {offsets = [0, 0, 8], sizes = [8, 8, 8], strides = [1, 1, 1]} : vector<8x8x64xf32> to vector<8x8x8xf32>
    %19 = vector.extract_strided_slice %0 {offsets = [0, 0, 15], sizes = [8, 8, 1], strides = [1, 1, 1]} : vector<8x8x64xf32> to vector<8x8x1xf32>
    %20 = vector.extract_strided_slice %0 {offsets = [0, 0, 14], sizes = [8, 8, 1], strides = [1, 1, 1]} : vector<8x8x64xf32> to vector<8x8x1xf32>
    %21 = vector.extract_strided_slice %0 {offsets = [0, 0, 17], sizes = [8, 8, 1], strides = [1, 1, 1]} : vector<8x8x64xf32> to vector<8x8x1xf32>
    %22 = vector.extract_strided_slice %0 {offsets = [0, 0, 16], sizes = [8, 8, 1], strides = [1, 1, 1]} : vector<8x8x64xf32> to vector<8x8x1xf32>
    %23 = vector.extract_strided_slice %0 {offsets = [0, 0, 16], sizes = [8, 8, 8], strides = [1, 1, 1]} : vector<8x8x64xf32> to vector<8x8x8xf32>
    %24 = vector.extract_strided_slice %0 {offsets = [0, 0, 23], sizes = [8, 8, 1], strides = [1, 1, 1]} : vector<8x8x64xf32> to vector<8x8x1xf32>
    %25 = vector.extract_strided_slice %0 {offsets = [0, 0, 22], sizes = [8, 8, 1], strides = [1, 1, 1]} : vector<8x8x64xf32> to vector<8x8x1xf32>
    %26 = vector.extract_strided_slice %0 {offsets = [0, 0, 25], sizes = [8, 8, 1], strides = [1, 1, 1]} : vector<8x8x64xf32> to vector<8x8x1xf32>
    %27 = vector.extract_strided_slice %0 {offsets = [0, 0, 24], sizes = [8, 8, 1], strides = [1, 1, 1]} : vector<8x8x64xf32> to vector<8x8x1xf32>
    %28 = vector.extract_strided_slice %0 {offsets = [0, 0, 24], sizes = [8, 8, 8], strides = [1, 1, 1]} : vector<8x8x64xf32> to vector<8x8x8xf32>
    %29 = vector.extract_strided_slice %0 {offsets = [0, 0, 31], sizes = [8, 8, 1], strides = [1, 1, 1]} : vector<8x8x64xf32> to vector<8x8x1xf32>
    %30 = vector.extract_strided_slice %0 {offsets = [0, 0, 30], sizes = [8, 8, 1], strides = [1, 1, 1]} : vector<8x8x64xf32> to vector<8x8x1xf32>
    %31 = vector.extract_strided_slice %0 {offsets = [0, 0, 33], sizes = [8, 8, 1], strides = [1, 1, 1]} : vector<8x8x64xf32> to vector<8x8x1xf32>
    %32 = vector.extract_strided_slice %0 {offsets = [0, 0, 32], sizes = [8, 8, 1], strides = [1, 1, 1]} : vector<8x8x64xf32> to vector<8x8x1xf32>
    %33 = vector.extract_strided_slice %0 {offsets = [0, 0, 32], sizes = [8, 8, 8], strides = [1, 1, 1]} : vector<8x8x64xf32> to vector<8x8x8xf32>
    %34 = vector.extract_strided_slice %0 {offsets = [0, 0, 39], sizes = [8, 8, 1], strides = [1, 1, 1]} : vector<8x8x64xf32> to vector<8x8x1xf32>
    %35 = vector.extract_strided_slice %0 {offsets = [0, 0, 38], sizes = [8, 8, 1], strides = [1, 1, 1]} : vector<8x8x64xf32> to vector<8x8x1xf32>
    %36 = vector.extract_strided_slice %0 {offsets = [0, 0, 41], sizes = [8, 8, 1], strides = [1, 1, 1]} : vector<8x8x64xf32> to vector<8x8x1xf32>
    %37 = vector.extract_strided_slice %0 {offsets = [0, 0, 40], sizes = [8, 8, 1], strides = [1, 1, 1]} : vector<8x8x64xf32> to vector<8x8x1xf32>
    %38 = vector.extract_strided_slice %0 {offsets = [0, 0, 40], sizes = [8, 8, 8], strides = [1, 1, 1]} : vector<8x8x64xf32> to vector<8x8x8xf32>
    %39 = vector.extract_strided_slice %0 {offsets = [0, 0, 47], sizes = [8, 8, 1], strides = [1, 1, 1]} : vector<8x8x64xf32> to vector<8x8x1xf32>
    %40 = vector.extract_strided_slice %0 {offsets = [0, 0, 46], sizes = [8, 8, 1], strides = [1, 1, 1]} : vector<8x8x64xf32> to vector<8x8x1xf32>
    %41 = vector.extract_strided_slice %0 {offsets = [0, 0, 49], sizes = [8, 8, 1], strides = [1, 1, 1]} : vector<8x8x64xf32> to vector<8x8x1xf32>
    %42 = vector.extract_strided_slice %0 {offsets = [0, 0, 48], sizes = [8, 8, 1], strides = [1, 1, 1]} : vector<8x8x64xf32> to vector<8x8x1xf32>
    %43 = vector.extract_strided_slice %0 {offsets = [0, 0, 48], sizes = [8, 8, 8], strides = [1, 1, 1]} : vector<8x8x64xf32> to vector<8x8x8xf32>
    %44 = vector.extract_strided_slice %0 {offsets = [0, 0, 55], sizes = [8, 8, 1], strides = [1, 1, 1]} : vector<8x8x64xf32> to vector<8x8x1xf32>
    %45 = vector.extract_strided_slice %0 {offsets = [0, 0, 54], sizes = [8, 8, 1], strides = [1, 1, 1]} : vector<8x8x64xf32> to vector<8x8x1xf32>
    %46 = vector.extract_strided_slice %0 {offsets = [0, 0, 57], sizes = [8, 8, 1], strides = [1, 1, 1]} : vector<8x8x64xf32> to vector<8x8x1xf32>
    %47 = vector.extract_strided_slice %0 {offsets = [0, 0, 56], sizes = [8, 8, 1], strides = [1, 1, 1]} : vector<8x8x64xf32> to vector<8x8x1xf32>
    %48 = vector.extract_strided_slice %0 {offsets = [0, 0, 56], sizes = [8, 8, 8], strides = [1, 1, 1]} : vector<8x8x64xf32> to vector<8x8x8xf32>
    %49 = vector.extract_strided_slice %0 {offsets = [0, 0, 63], sizes = [8, 8, 1], strides = [1, 1, 1]} : vector<8x8x64xf32> to vector<8x8x1xf32>
    %50 = vector.extract_strided_slice %0 {offsets = [0, 0, 62], sizes = [8, 8, 1], strides = [1, 1, 1]} : vector<8x8x64xf32> to vector<8x8x1xf32>
    %51 = vector.extract_strided_slice %0 {offsets = [0, 0, 57], sizes = [8, 8, 1], strides = [1, 1, 1]} : vector<8x8x64xf32> to vector<8x8x1xf32>
    %52 = vector.extract_strided_slice %0 {offsets = [0, 0, 56], sizes = [8, 8, 1], strides = [1, 1, 1]} : vector<8x8x64xf32> to vector<8x8x1xf32>
    %53 = vector.extract_strided_slice %0 {offsets = [0, 0, 56], sizes = [8, 8, 8], strides = [1, 1, 1]} : vector<8x8x64xf32> to vector<8x8x8xf32>
    %54 = vector.extract_strided_slice %0 {offsets = [0, 0, 63], sizes = [8, 8, 1], strides = [1, 1, 1]} : vector<8x8x64xf32> to vector<8x8x1xf32>
    %55 = vector.extract_strided_slice %0 {offsets = [0, 0, 62], sizes = [8, 8, 1], strides = [1, 1, 1]} : vector<8x8x64xf32> to vector<8x8x1xf32>
    %56 = vector.extract_strided_slice %0 {offsets = [0, 0, 49], sizes = [8, 8, 1], strides = [1, 1, 1]} : vector<8x8x64xf32> to vector<8x8x1xf32>
    %57 = vector.extract_strided_slice %0 {offsets = [0, 0, 48], sizes = [8, 8, 1], strides = [1, 1, 1]} : vector<8x8x64xf32> to vector<8x8x1xf32>
    %58 = vector.extract_strided_slice %0 {offsets = [0, 0, 48], sizes = [8, 8, 8], strides = [1, 1, 1]} : vector<8x8x64xf32> to vector<8x8x8xf32>
    %59 = vector.extract_strided_slice %0 {offsets = [0, 0, 55], sizes = [8, 8, 1], strides = [1, 1, 1]} : vector<8x8x64xf32> to vector<8x8x1xf32>
    %60 = vector.extract_strided_slice %0 {offsets = [0, 0, 54], sizes = [8, 8, 1], strides = [1, 1, 1]} : vector<8x8x64xf32> to vector<8x8x1xf32>
    %61 = tpu.concatenate %1, %2, %3, %4, %5, %6, %7, %8, %9, %10, %11, %12, %13, %14, %15, %16 in 2 : vector<8x8x1xf32>, vector<8x8x1xf32>, vector<8x8x8xf32>, vector<8x8x1xf32>, vector<8x8x1xf32>, vector<8x8x1xf32>, vector<8x8x1xf32>, vector<8x8x8xf32>, vector<8x8x1xf32>, vector<8x8x1xf32>, vector<8x8x1xf32>, vector<8x8x1xf32>, vector<8x8x8xf32>, vector<8x8x1xf32>, vector<8x8x1xf32>, vector<8x8x1xf32> -> vector<8x8x37xf32>
    %62 = tpu.concatenate %17, %18, %19, %20, %21, %22, %23, %24, %25, %26, %27, %28, %29, %30, %31, %32 in 2 : vector<8x8x1xf32>, vector<8x8x8xf32>, vector<8x8x1xf32>, vector<8x8x1xf32>, vector<8x8x1xf32>, vector<8x8x1xf32>, vector<8x8x8xf32>, vector<8x8x1xf32>, vector<8x8x1xf32>, vector<8x8x1xf32>, vector<8x8x1xf32>, vector<8x8x8xf32>, vector<8x8x1xf32>, vector<8x8x1xf32>, vector<8x8x1xf32>, vector<8x8x1xf32> -> vector<8x8x37xf32>
    %63 = tpu.concatenate %33, %34, %35, %36, %37, %38, %39, %40, %41, %42, %43, %44, %45, %46, %47, %48 in 2 : vector<8x8x8xf32>, vector<8x8x1xf32>, vector<8x8x1xf32>, vector<8x8x1xf32>, vector<8x8x1xf32>, vector<8x8x8xf32>, vector<8x8x1xf32>, vector<8x8x1xf32>, vector<8x8x1xf32>, vector<8x8x1xf32>, vector<8x8x8xf32>, vector<8x8x1xf32>, vector<8x8x1xf32>, vector<8x8x1xf32>, vector<8x8x1xf32>, vector<8x8x8xf32> -> vector<8x8x44xf32>
    %64 = tpu.concatenate %49, %50, %51, %52, %53, %54, %55, %56, %57, %58, %59, %60 in 2 : vector<8x8x1xf32>, vector<8x8x1xf32>, vector<8x8x1xf32>, vector<8x8x1xf32>, vector<8x8x8xf32>, vector<8x8x1xf32>, vector<8x8x1xf32>, vector<8x8x1xf32>, vector<8x8x1xf32>, vector<8x8x8xf32>, vector<8x8x1xf32>, vector<8x8x1xf32> -> vector<8x8x26xf32>
    %65 = tpu.concatenate %61, %62, %63, %64 in 2 : vector<8x8x37xf32>, vector<8x8x37xf32>, vector<8x8x44xf32>, vector<8x8x26xf32> -> vector<8x8x144xf32>
    %66 = vector.extract_strided_slice %65 {offsets = [0, 1, 0], sizes = [8, 1, 144], strides = [1, 1, 1]} : vector<8x8x144xf32> to vector<8x1x144xf32>
    %67 = vector.extract_strided_slice %65 {offsets = [0, 0, 0], sizes = [8, 1, 144], strides = [1, 1, 1]} : vector<8x8x144xf32> to vector<8x1x144xf32>
    %68 = vector.extract_strided_slice %65 {offsets = [0, 7, 0], sizes = [8, 1, 144], strides = [1, 1, 1]} : vector<8x8x144xf32> to vector<8x1x144xf32>
    %69 = vector.extract_strided_slice %65 {offsets = [0, 6, 0], sizes = [8, 1, 144], strides = [1, 1, 1]} : vector<8x8x144xf32> to vector<8x1x144xf32>
    %70 = tpu.concatenate %66, %67, %65, %68, %69 in 1 : vector<8x1x144xf32>, vector<8x1x144xf32>, vector<8x8x144xf32>, vector<8x1x144xf32>, vector<8x1x144xf32> -> vector<8x12x144xf32>
    %c0_2 = arith.constant 0 : index
    %c0_3 = arith.constant 0 : index
    %c0_4 = arith.constant 0 : index
    %71 = vector.load %arg2[%c0_2, %c0_3, %c0_4] : memref<8x12x144xf32, #tpu.memory_space<vmem>>, vector<8x12x144xf32>
    tpu.vector_store %arg2[%c0_2, %c0_3, %c0_4], %70 {strides = array<i32>} : memref<8x12x144xf32, #tpu.memory_space<vmem>>, vector<8x12x144xf32>,
    return
  }
  func.func @transform_0(%arg0: i32) -> (i32, i32, i32) {
    %c0_i32 = arith.constant 0 : i32
    %c0_i32_0 = arith.constant 0 : i32
    %c0_i32_1 = arith.constant 0 : i32
    return %arg0, %c0_i32, %c0_i32_0 : i32, i32, i32
  }
  func.func @transform_1(%arg0: i32) -> (i32, i32, i32) {
    %c0_i32 = arith.constant 0 : i32
    %c0_i32_0 = arith.constant 0 : i32
    %c0_i32_1 = arith.constant 0 : i32
    return %arg0, %c0_i32, %c0_i32_0 : i32, i32, i32
  }
}

</mosaic_0001>

<bundles_post_ra>
// kernel: tpu_custom_call.1
= control target key start
LH: loop header
LB: loop body
LE: loop exit
PB: predicated region body
PF: predicated region fallthrough
CT: control target
= control target key end

     0   :  { %6 = vsyncpa [#allocation3], 0  ;;  %s1945_s6 = smov [#allocation2]   ;;  %s4127_s0 = inlined_call_operand.hbm [shape: f32[8,8,64], index: 0, kind: input, shape index: {}]   ;;  %s4128_s1 = inlined_call_operand.vmem [shape: f32[8,12,144], index: 1, kind: output, shape index: {}]  }
   0x1   :  { %s12_s7 = sshll.u32 %s1945_s6, 4  ;;  %s1921_s10 = scalar_lea.hbm %s4127_s0, 1024  ;;  %s13_s7 = int_to_ptr.vmem [resolvable:$true] %s12_s7 }
   0x2   :  { %p1922_p0 = scmp.ne.s32.totalorder %s4127_s0, %s1921_s10  ;;  %p1925_p1 = scmp.lt.u32.totalorder %s1921_s10, %s4127_s0 }
   0x4   :  { %p1927_p2 = pnand %p1925_p1, %p1922_p0 }
   0x6   :  { %1930 = shalt.err (!%p1927_p2)
}
   0x7   :  { %s1931_s15 = scalar_lea.vmem %s13_s7, 1024  ;;  %p1936_p4 = scmp.lt.s32.totalorder %s13_s7, %s13_s7 }
   0x8   :  { %p1932_p3 = scmp.ne.s32.totalorder %s13_s7, %s1931_s15  ;;  %p1937_p5 = scmp.lt.s32.totalorder %s1931_s15, %s1931_s15 }
   0xa   :  { %p1938_p6 = por %p1937_p5, %p1936_p4 }
   0xc   :  { %p1939_p7 = pnand %p1938_p6, %p1932_p3 }
   0xe   :  { %1942 = shalt.err (!%p1939_p7)
}
   0xf   :  { %s1946_s16 = smov 128   ;;  %s1947_s17 = smov 8  }
  0x10   :  { %18 = dma.hbm_to_vmem [thread:$0]  %s4127_s0, 1024, %s13_s7, [#allocation3], %s1946_s16, %s1946_s16, %s1947_s17  }
  0x11   :  { %1943 = dma.done.wait [#allocation3], 1024  }
  0x12   :  { %1944 = vsyncadd [#allocation3], 4294966272  ;;  %v2013_v0 = vld [vmem:[#allocation2 + $0x10] sm:$0xff]  ;;  %v2015_v1 = vld [vmem:[#allocation2] sm:$0xff]  ;;  %s1948_s20 = smov 119   ;;  %s1949_s0 = smov 121  }
  0x13   :  { %42 = vrot.lane.b32.xlu1 %v2013_v0, %s1948_s20  ;;  %38 = vrot.lane.b32.xlu0 %v2015_v1, %s1948_s20  ;;  %v2019_v2 = vld [vmem:[#allocation2 + $0x18] sm:$0xff]  ;;  %v2021_v3 = vld [vmem:[#allocation2 + $0x8] sm:$0xff]  ;;  %v2027_v5 = vld [vmem:[#allocation2 + $0x20] sm:$0xff]  ;;  %s1950_s21 = smov 122   ;;  %s1951_s22 = smov 123   ;;  %vm398_vm0 = vcmask 7168  }
  0x14   :  { %v2025_v4 = vld [vmem:[#allocation2 + $0x28] sm:$0xff]  ;;  %v2031_v6 = vld [vmem:[#allocation2 + $0x38] sm:$0xff]  ;;  %v2033_v7 = vld [vmem:[#allocation2 + $0x30] sm:$0xff]  ;;  %s1952_s23 = smov 125   ;;  %s1953_s24 = smov 11   ;;  %vm685_vm1 = vcmask 72704  }
  0x15   :  { %s1954_s25 = smov 13   ;;  %s1955_s26 = smov 14   ;;  %vm416_vm2 = vcmask 80896   ;;  %vm4230_vm3 = vcmask 89088   ;;  %vm434_vm4 = vcmask 97280   ;;  %vm443_vm5 = vcmask 105472  }
  0x16   :  { %s1956_s27 = smov 15   ;;  %s1957_s28 = smov 17   ;;  %vm726_vm6 = vcmask 171008   ;;  %vm461_vm7 = vcmask 179200   ;;  %vm470_vm8 = vcmask 187392   ;;  %vm479_vm9 = vcmask 195584  }
  0x17   :  { %44 = vrot.lane.b32.xlu1 %v2019_v2, %s1948_s20  ;;  %40 = vrot.lane.b32.xlu0 %v2021_v3, %s1948_s20  ;;  %s1958_s29 = smov 23   ;;  %s1959_s30 = smov 25   ;;  %vm488_vm10 = vcmask 203776   ;;  %vm767_vm11 = vcmask 269312   ;;  %vm506_vm12 = vcmask 277504   ;;  %vm515_vm13 = vcmask 285696  }
  0x18   :  { %s1960_s2 = smov 26   ;;  %s1961_s3 = smov 27   ;;  %vm1040_vm14 = vcmask 64512   ;;  %vm4233_vm15 = vcmask 293888  }
  0x19   :  { %s1962_s4 = smov 29   ;;  %s1963_s5 = smov 120  }
  0x1a   :  { %s1964_s6 = smov 124   ;;  %s1965_s7 = smov 126  }
  0x1b   :  { %48 = vrot.lane.b32.xlu1 %v2025_v4, %s1948_s20  ;;  %46 = vrot.lane.b32.xlu0 %v2027_v5, %s1948_s20  ;;  %s1966_s8 = smov 1   ;;  %s1967_s9 = smov 2  }
  0x1c   :  { %s1968_s10 = smov 4   ;;  %s1969_s11 = smov 96  }
  0x1d   :  { %s1970_s12 = smov 97   ;;  %s1971_s13 = smov 99  }
  0x1e   :  { %s1972_s14 = smov 100   ;;  %s1973_s15 = smov 101  }
  0x1f   :  { %52 = vrot.lane.b32.xlu1 %v2031_v6, %s1948_s20  ;;  %50 = vrot.lane.b32.xlu0 %v2033_v7, %s1948_s20  ;;  %s1974_s16 = smov 103   ;;  %s1975_s17 = smov 104  }
  0x20   :  { %s1976_s18 = smov 105   ;;  %s1977_s19 = smov 107  }
  0x21   :  { %s1978_s20 = smov 108  }
  0x23   :  { %64 = vrot.lane.b32.xlu1 %v2021_v3, %s1949_s0  ;;  %62 = vrot.lane.b32.xlu0 %v2015_v1, %s1949_s0 }
  0x27   :  { %68 = vrot.lane.b32.xlu1 %v2019_v2, %s1949_s0  ;;  %66 = vrot.lane.b32.xlu0 %v2013_v0, %s1949_s0 }
  0x2b   :  { %72 = vrot.lane.b32.xlu1 %v2025_v4, %s1949_s0  ;;  %70 = vrot.lane.b32.xlu0 %v2027_v5, %s1949_s0 }
  0x2f   :  { %76 = vrot.lane.b32.xlu1 %v2031_v6, %s1949_s0  ;;  %74 = vrot.lane.b32.xlu0 %v2033_v7, %s1949_s0  ;;  %s1979_s0 = smov 65  }
  0x33   :  { %88 = vrot.lane.b32.xlu1 %v2021_v3, %s1950_s21  ;;  %86 = vrot.lane.b32.xlu0 %v2015_v1, %s1950_s21 }
  0x37   :  { %92 = vrot.lane.b32.xlu1 %v2019_v2, %s1950_s21  ;;  %90 = vrot.lane.b32.xlu0 %v2013_v0, %s1950_s21 }
  0x3b   :  { %96 = vrot.lane.b32.xlu1 %v2025_v4, %s1950_s21  ;;  %94 = vrot.lane.b32.xlu0 %v2027_v5, %s1950_s21 }
  0x3f   :  { %100 = vrot.lane.b32.xlu1 %v2031_v6, %s1950_s21  ;;  %98 = vrot.lane.b32.xlu0 %v2033_v7, %s1950_s21  ;;  %s1980_s21 = smov 67  }
  0x43   :  { %112 = vrot.lane.b32.xlu1 %v2021_v3, %s1951_s22  ;;  %110 = vrot.lane.b32.xlu0 %v2015_v1, %s1951_s22 }
  0x47   :  { %116 = vrot.lane.b32.xlu1 %v2019_v2, %s1951_s22  ;;  %114 = vrot.lane.b32.xlu0 %v2013_v0, %s1951_s22 }
  0x4b   :  { %120 = vrot.lane.b32.xlu1 %v2025_v4, %s1951_s22  ;;  %118 = vrot.lane.b32.xlu0 %v2027_v5, %s1951_s22 }
  0x4f   :  { %124 = vrot.lane.b32.xlu1 %v2031_v6, %s1951_s22  ;;  %122 = vrot.lane.b32.xlu0 %v2033_v7, %s1951_s22  ;;  %s1981_s22 = smov 73  }
  0x53   :  { %136 = vrot.lane.b32.xlu1 %v2021_v3, %s1952_s23  ;;  %134 = vrot.lane.b32.xlu0 %v2015_v1, %s1952_s23 }
  0x57   :  { %140 = vrot.lane.b32.xlu1 %v2019_v2, %s1952_s23  ;;  %138 = vrot.lane.b32.xlu0 %v2013_v0, %s1952_s23 }
  0x5b   :  { %144 = vrot.lane.b32.xlu1 %v2025_v4, %s1952_s23  ;;  %142 = vrot.lane.b32.xlu0 %v2027_v5, %s1952_s23 }
  0x5f   :  { %148 = vrot.lane.b32.xlu1 %v2031_v6, %s1952_s23  ;;  %146 = vrot.lane.b32.xlu0 %v2033_v7, %s1952_s23  ;;  %s1982_s23 = smov 75  }
  0x63   :  { %160 = vrot.lane.b32.xlu1 %v2021_v3, %s1953_s24  ;;  %158 = vrot.lane.b32.xlu0 %v2015_v1, %s1953_s24 }
  0x67   :  { %164 = vrot.lane.b32.xlu1 %v2019_v2, %s1953_s24  ;;  %162 = vrot.lane.b32.xlu0 %v2013_v0, %s1953_s24 }
  0x6b   :  { %168 = vrot.lane.b32.xlu1 %v2025_v4, %s1953_s24  ;;  %166 = vrot.lane.b32.xlu0 %v2027_v5, %s1953_s24 }
  0x6f   :  { %172 = vrot.lane.b32.xlu1 %v2031_v6, %s1953_s24  ;;  %170 = vrot.lane.b32.xlu0 %v2033_v7, %s1953_s24  ;;  %s1983_s24 = smov 76  }
  0x73   :  { %184 = vrot.lane.b32.xlu1 %v2021_v3, %s1954_s25  ;;  %182 = vrot.lane.b32.xlu0 %v2015_v1, %s1954_s25 }
  0x77   :  { %188 = vrot.lane.b32.xlu1 %v2019_v2, %s1954_s25  ;;  %186 = vrot.lane.b32.xlu0 %v2013_v0, %s1954_s25 }
  0x7b   :  { %192 = vrot.lane.b32.xlu1 %v2025_v4, %s1954_s25  ;;  %190 = vrot.lane.b32.xlu0 %v2027_v5, %s1954_s25 }
  0x7f   :  { %196 = vrot.lane.b32.xlu1 %v2031_v6, %s1954_s25  ;;  %194 = vrot.lane.b32.xlu0 %v2033_v7, %s1954_s25  ;;  %s1984_s25 = smov 77  }
  0x83   :  { %208 = vrot.lane.b32.xlu1 %v2021_v3, %s1955_s26  ;;  %206 = vrot.lane.b32.xlu0 %v2015_v1, %s1955_s26 }
  0x85   :  { %v2087_v8 = vpop.permute.xlu1 %42  ;;  %v2089_v9 = vpop.permute.xlu0 %38 }
  0x86   :  { %4234 = vst [vmem:[#allocation5_spill] sm:$0xff] %v2087_v8  ;;  %4235 = vst [vmem:[#allocation6_spill] sm:$0xff] %v2089_v9 }
  0x87   :  { %212 = vrot.lane.b32.xlu1 %v2019_v2, %s1955_s26  ;;  %210 = vrot.lane.b32.xlu0 %v2013_v0, %s1955_s26 }
  0x89   :  { %v2093_v10 = vpop.permute.xlu1 %44  ;;  %v2095_v11 = vpop.permute.xlu0 %40 }
  0x8a   :  { %4236 = vst [vmem:[#allocation7_spill] sm:$0xff] %v2093_v10  ;;  %4237 = vst [vmem:[#allocation8_spill] sm:$0xff] %v2095_v11 }
  0x8b   :  { %216 = vrot.lane.b32.xlu1 %v2025_v4, %s1955_s26  ;;  %214 = vrot.lane.b32.xlu0 %v2027_v5, %s1955_s26 }
  0x8d   :  { %v2099_v12 = vpop.permute.xlu1 %48  ;;  %v2101_v13 = vpop.permute.xlu0 %46 }
  0x8e   :  { %4238 = vst [vmem:[#allocation9_spill] sm:$0xff] %v2099_v12  ;;  %4239 = vst [vmem:[#allocation10_spill] sm:$0xff] %v2101_v13 }
  0x8f   :  { %220 = vrot.lane.b32.xlu1 %v2031_v6, %s1955_s26  ;;  %218 = vrot.lane.b32.xlu0 %v2033_v7, %s1955_s26  ;;  %s1985_s26 = smov 79  }
  0x91   :  { %v2105_v14 = vpop.permute.xlu1 %52  ;;  %v2107_v15 = vpop.permute.xlu0 %50 }
  0x92   :  { %4240 = vst [vmem:[#allocation11_spill] sm:$0xff] %v2105_v14  ;;  %4241 = vst [vmem:[#allocation12_spill] sm:$0xff] %v2107_v15 }
  0x93   :  { %232 = vrot.lane.b32.xlu1 %v2021_v3, %s1956_s27  ;;  %230 = vrot.lane.b32.xlu0 %v2015_v1, %s1956_s27 }
  0x95   :  { %v2111_v16 = vpop.permute.xlu1 %64  ;;  %v2113_v17 = vpop.permute.xlu0 %62 }
  0x96   :  { %4242 = vst [vmem:[#allocation13_spill] sm:$0xff] %v2111_v16  ;;  %4243 = vst [vmem:[#allocation14_spill] sm:$0xff] %v2113_v17 }
  0x97   :  { %236 = vrot.lane.b32.xlu1 %v2019_v2, %s1956_s27  ;;  %234 = vrot.lane.b32.xlu0 %v2013_v0, %s1956_s27 }
  0x99   :  { %v2117_v18 = vpop.permute.xlu1 %68  ;;  %v2119_v19 = vpop.permute.xlu0 %66 }
  0x9a   :  { %4244 = vst [vmem:[#allocation15_spill] sm:$0xff] %v2117_v18  ;;  %4245 = vst [vmem:[#allocation16_spill] sm:$0xff] %v2119_v19 }
  0x9b   :  { %240 = vrot.lane.b32.xlu1 %v2025_v4, %s1956_s27  ;;  %238 = vrot.lane.b32.xlu0 %v2027_v5, %s1956_s27 }
  0x9d   :  { %v2123_v20 = vpop.permute.xlu1 %72  ;;  %v2125_v21 = vpop.permute.xlu0 %70 }
  0x9e   :  { %4246 = vst [vmem:[#allocation17_spill] sm:$0xff] %v2123_v20  ;;  %4247 = vst [vmem:[#allocation18_spill] sm:$0xff] %v2125_v21 }
  0x9f   :  { %244 = vrot.lane.b32.xlu1 %v2031_v6, %s1956_s27  ;;  %242 = vrot.lane.b32.xlu0 %v2033_v7, %s1956_s27  ;;  %s1986_s27 = smov 93  }
  0xa1   :  { %v2129_v22 = vpop.permute.xlu1 %76  ;;  %v2131_v23 = vpop.permute.xlu0 %74 }
  0xa2   :  { %4248 = vst [vmem:[#allocation19_spill] sm:$0xff] %v2129_v22  ;;  %4249 = vst [vmem:[#allocation20_spill] sm:$0xff] %v2131_v23 }
  0xa3   :  { %256 = vrot.lane.b32.xlu1 %v2021_v3, %s1957_s28  ;;  %254 = vrot.lane.b32.xlu0 %v2015_v1, %s1957_s28 }
  0xa5   :  { %v2135_v24 = vpop.permute.xlu1 %88  ;;  %v2137_v25 = vpop.permute.xlu0 %86 }
  0xa6   :  { %4250 = vst [vmem:[#allocation21_spill] sm:$0xff] %v2135_v24  ;;  %4251 = vst [vmem:[#allocation22_spill] sm:$0xff] %v2137_v25 }
  0xa7   :  { %260 = vrot.lane.b32.xlu1 %v2019_v2, %s1957_s28  ;;  %258 = vrot.lane.b32.xlu0 %v2013_v0, %s1957_s28 }
  0xa9   :  { %v2141_v26 = vpop.permute.xlu1 %92  ;;  %v2143_v27 = vpop.permute.xlu0 %90 }
  0xaa   :  { %4252 = vst [vmem:[#allocation23_spill] sm:$0xff] %v2141_v26  ;;  %4253 = vst [vmem:[#allocation24_spill] sm:$0xff] %v2143_v27 }
  0xab   :  { %264 = vrot.lane.b32.xlu1 %v2025_v4, %s1957_s28  ;;  %262 = vrot.lane.b32.xlu0 %v2027_v5, %s1957_s28 }
  0xad   :  { %v2147_v28 = vpop.permute.xlu1 %96  ;;  %v2149_v29 = vpop.permute.xlu0 %94 }
  0xae   :  { %4254 = vst [vmem:[#allocation25_spill] sm:$0xff] %v2147_v28  ;;  %4255 = vst [vmem:[#allocation26_spill] sm:$0xff] %v2149_v29 }
  0xaf   :  { %268 = vrot.lane.b32.xlu1 %v2031_v6, %s1957_s28  ;;  %266 = vrot.lane.b32.xlu0 %v2033_v7, %s1957_s28  ;;  %s1987_s28 = smov 95  }
  0xb1   :  { %v2153_v30 = vpop.permute.xlu1 %100  ;;  %v2155_v31 = vpop.permute.xlu0 %98 }
  0xb2   :  { %4256 = vst [vmem:[#allocation27_spill] sm:$0xff] %v2153_v30  ;;  %4257 = vst [vmem:[#allocation28_spill] sm:$0xff] %v2155_v31 }
  0xb3   :  { %280 = vrot.lane.b32.xlu1 %v2021_v3, %s1958_s29  ;;  %278 = vrot.lane.b32.xlu0 %v2015_v1, %s1958_s29 }
  0xb5   :  { %v2159_v32 = vpop.permute.xlu1 %112  ;;  %v2161_v33 = vpop.permute.xlu0 %110 }
  0xb6   :  { %4258 = vst [vmem:[#allocation29_spill] sm:$0xff] %v2159_v32  ;;  %4259 = vst [vmem:[#allocation30_spill] sm:$0xff] %v2161_v33 }
  0xb7   :  { %284 = vrot.lane.b32.xlu1 %v2019_v2, %s1958_s29  ;;  %282 = vrot.lane.b32.xlu0 %v2013_v0, %s1958_s29 }
  0xb9   :  { %v2165_v34 = vpop.permute.xlu1 %116  ;;  %v2167_v35 = vpop.permute.xlu0 %114 }
  0xba   :  { %4260 = vst [vmem:[#allocation31_spill] sm:$0xff] %v2165_v34  ;;  %4261 = vst [vmem:[#allocation32_spill] sm:$0xff] %v2167_v35 }
  0xbb   :  { %288 = vrot.lane.b32.xlu1 %v2025_v4, %s1958_s29  ;;  %286 = vrot.lane.b32.xlu0 %v2027_v5, %s1958_s29 }
  0xbd   :  { %v2171_v36 = vpop.permute.xlu1 %120  ;;  %v2173_v37 = vpop.permute.xlu0 %118 }
  0xbe   :  { %4262 = vst [vmem:[#allocation33_spill] sm:$0xff] %v2171_v36  ;;  %4263 = vst [vmem:[#allocation34_spill] sm:$0xff] %v2173_v37 }
  0xbf   :  { %292 = vrot.lane.b32.xlu1 %v2031_v6, %s1958_s29  ;;  %290 = vrot.lane.b32.xlu0 %v2033_v7, %s1958_s29  ;;  %s1988_s29 = smov 37  }
  0xc1   :  { %v2177_v38 = vpop.permute.xlu1 %124  ;;  %v2179_v39 = vpop.permute.xlu0 %122 }
  0xc2   :  { %4264 = vst [vmem:[#allocation35_spill] sm:$0xff] %v2177_v38  ;;  %4265 = vst [vmem:[#allocation36_spill] sm:$0xff] %v2179_v39 }
  0xc3   :  { %304 = vrot.lane.b32.xlu1 %v2021_v3, %s1959_s30  ;;  %302 = vrot.lane.b32.xlu0 %v2015_v1, %s1959_s30 }
  0xc5   :  { %v2183_v40 = vpop.permute.xlu1 %136  ;;  %v2185_v41 = vpop.permute.xlu0 %134 }
  0xc6   :  { %4266 = vst [vmem:[#allocation37_spill] sm:$0xff] %v2183_v40  ;;  %4267 = vst [vmem:[#allocation38_spill] sm:$0xff] %v2185_v41 }
  0xc7   :  { %308 = vrot.lane.b32.xlu1 %v2019_v2, %s1959_s30  ;;  %306 = vrot.lane.b32.xlu0 %v2013_v0, %s1959_s30 }
  0xc9   :  { %v2189_v42 = vpop.permute.xlu1 %140  ;;  %v2191_v43 = vpop.permute.xlu0 %138 }
  0xca   :  { %4268 = vst [vmem:[#allocation39_spill] sm:$0xff] %v2189_v42  ;;  %4269 = vst [vmem:[#allocation40_spill] sm:$0xff] %v2191_v43 }
  0xcb   :  { %312 = vrot.lane.b32.xlu1 %v2025_v4, %s1959_s30  ;;  %310 = vrot.lane.b32.xlu0 %v2027_v5, %s1959_s30 }
  0xcd   :  { %v2195_v44 = vpop.permute.xlu1 %144  ;;  %v2197_v45 = vpop.permute.xlu0 %142 }
  0xce   :  { %4270 = vst [vmem:[#allocation41_spill] sm:$0xff] %v2195_v44  ;;  %4271 = vst [vmem:[#allocation42_spill] sm:$0xff] %v2197_v45 }
  0xcf   :  { %316 = vrot.lane.b32.xlu1 %v2031_v6, %s1959_s30  ;;  %314 = vrot.lane.b32.xlu0 %v2033_v7, %s1959_s30  ;;  %s1989_s30 = smov 74  }
  0xd1   :  { %v2201_v46 = vpop.permute.xlu1 %148  ;;  %v2203_v47 = vpop.permute.xlu0 %146 }
  0xd2   :  { %4272 = vst [vmem:[#allocation43_spill] sm:$0xff] %v2201_v46  ;;  %4273 = vst [vmem:[#allocation44_spill] sm:$0xff] %v2203_v47 }
  0xd3   :  { %328 = vrot.lane.b32.xlu1 %v2021_v3, %s1960_s2  ;;  %326 = vrot.lane.b32.xlu0 %v2015_v1, %s1960_s2 }
  0xd5   :  { %v2207_v48 = vpop.permute.xlu1 %160  ;;  %v2209_v49 = vpop.permute.xlu0 %158 }
  0xd6   :  { %4274 = vst [vmem:[#allocation45_spill] sm:$0xff] %v2207_v48  ;;  %4275 = vst [vmem:[#allocation46_spill] sm:$0xff] %v2209_v49 }
  0xd7   :  { %332 = vrot.lane.b32.xlu1 %v2019_v2, %s1960_s2  ;;  %330 = vrot.lane.b32.xlu0 %v2013_v0, %s1960_s2 }
  0xd9   :  { %v2213_v50 = vpop.permute.xlu1 %164  ;;  %v2215_v51 = vpop.permute.xlu0 %162 }
  0xda   :  { %4276 = vst [vmem:[#allocation47_spill] sm:$0xff] %v2213_v50  ;;  %4277 = vst [vmem:[#allocation48_spill] sm:$0xff] %v2215_v51 }
  0xdb   :  { %336 = vrot.lane.b32.xlu1 %v2025_v4, %s1960_s2  ;;  %334 = vrot.lane.b32.xlu0 %v2027_v5, %s1960_s2 }
  0xdd   :  { %v2219_v52 = vpop.permute.xlu1 %168  ;;  %v2221_v53 = vpop.permute.xlu0 %166 }
  0xde   :  { %4278 = vst [vmem:[#allocation49_spill] sm:$0xff] %v2219_v52  ;;  %4279 = vst [vmem:[#allocation50_spill] sm:$0xff] %v2221_v53 }
  0xdf   :  { %340 = vrot.lane.b32.xlu1 %v2031_v6, %s1960_s2  ;;  %338 = vrot.lane.b32.xlu0 %v2033_v7, %s1960_s2  ;;  %s1990_s2 = smov 118  }
  0xe1   :  { %v2225_v54 = vpop.permute.xlu1 %172  ;;  %v2227_v55 = vpop.permute.xlu0 %170 }
  0xe2   :  { %4280 = vst [vmem:[#allocation51_spill] sm:$0xff] %v2225_v54  ;;  %4281 = vst [vmem:[#allocation52_spill] sm:$0xff] %v2227_v55 }
  0xe3   :  { %352 = vrot.lane.b32.xlu1 %v2021_v3, %s1961_s3  ;;  %350 = vrot.lane.b32.xlu0 %v2015_v1, %s1961_s3 }
  0xe5   :  { %v2231_v56 = vpop.permute.xlu1 %184  ;;  %v2233_v57 = vpop.permute.xlu0 %182 }
  0xe6   :  { %4282 = vst [vmem:[#allocation53_spill] sm:$0xff] %v2231_v56  ;;  %4283 = vst [vmem:[#allocation54_spill] sm:$0xff] %v2233_v57 }
  0xe7   :  { %356 = vrot.lane.b32.xlu1 %v2019_v2, %s1961_s3  ;;  %354 = vrot.lane.b32.xlu0 %v2013_v0, %s1961_s3 }
  0xe9   :  { %v2237_v58 = vpop.permute.xlu1 %188  ;;  %v2239_v59 = vpop.permute.xlu0 %186 }
  0xea   :  { %4284 = vst [vmem:[#allocation55_spill] sm:$0xff] %v2237_v58  ;;  %4285 = vst [vmem:[#allocation56_spill] sm:$0xff] %v2239_v59 }
  0xeb   :  { %360 = vrot.lane.b32.xlu1 %v2025_v4, %s1961_s3  ;;  %358 = vrot.lane.b32.xlu0 %v2027_v5, %s1961_s3 }
  0xed   :  { %v2243_v60 = vpop.permute.xlu1 %192  ;;  %v2245_v61 = vpop.permute.xlu0 %190 }
  0xee   :  { %4286 = vst [vmem:[#allocation57_spill] sm:$0xff] %v2243_v60  ;;  %4287 = vst [vmem:[#allocation58_spill] sm:$0xff] %v2245_v61 }
  0xef   :  { %364 = vrot.lane.b32.xlu1 %v2031_v6, %s1961_s3  ;;  %362 = vrot.lane.b32.xlu0 %v2033_v7, %s1961_s3 }
  0xf1   :  { %v2249_v62 = vpop.permute.xlu1 %196  ;;  %v2251_v63 = vpop.permute.xlu0 %194 }
  0xf2   :  { %4288 = vst [vmem:[#allocation59_spill] sm:$0xff] %v2249_v62  ;;  %4289 = vst [vmem:[#allocation60_spill] sm:$0xff] %v2251_v63 }
  0xf3   :  { %376 = vrot.lane.b32.xlu1 %v2021_v3, %s1962_s4  ;;  %374 = vrot.lane.b32.xlu0 %v2015_v1, %s1962_s4 }
  0xf5   :  { %v2255_v59 = vpop.permute.xlu1 %208  ;;  %v2257_v58 = vpop.permute.xlu0 %206 }
  0xf6   :  { %4290 = vst [vmem:[#allocation61_spill] sm:$0xff] %v2255_v59  ;;  %4291 = vst [vmem:[#allocation62_spill] sm:$0xff] %v2257_v58 }
  0xf7   :  { %380 = vrot.lane.b32.xlu1 %v2019_v2, %s1962_s4  ;;  %378 = vrot.lane.b32.xlu0 %v2013_v0, %s1962_s4 }
  0xf9   :  { %v2261_v61 = vpop.permute.xlu1 %212  ;;  %v2263_v60 = vpop.permute.xlu0 %210 }
  0xfa   :  { %4292 = vst [vmem:[#allocation63_spill] sm:$0xff] %v2261_v61  ;;  %4293 = vst [vmem:[#allocation64_spill] sm:$0xff] %v2263_v60 }
  0xfb   :  { %384 = vrot.lane.b32.xlu1 %v2025_v4, %s1962_s4  ;;  %382 = vrot.lane.b32.xlu0 %v2027_v5, %s1962_s4 }
  0xfd   :  { %v2267_v63 = vpop.permute.xlu1 %216  ;;  %v2269_v62 = vpop.permute.xlu0 %214 }
  0xfe   :  { %4294 = vst [vmem:[#allocation65_spill] sm:$0xff] %v2267_v63  ;;  %4295 = vst [vmem:[#allocation66_spill] sm:$0xff] %v2269_v62 }
  0xff   :  { %388 = vrot.lane.b32.xlu1 %v2031_v6, %s1962_s4  ;;  %386 = vrot.lane.b32.xlu0 %v2033_v7, %s1962_s4 }
 0x101   :  { %v2273_v58 = vpop.permute.xlu1 %220  ;;  %v2275_v59 = vpop.permute.xlu0 %218 }
 0x102   :  { %4296 = vst [vmem:[#allocation67_spill] sm:$0xff] %v2273_v58  ;;  %4297 = vst [vmem:[#allocation68_spill] sm:$0xff] %v2275_v59 }
 0x103   :  { %535 = vrot.lane.b32.xlu1 %v2021_v3, %s1963_s5  ;;  %533 = vrot.lane.b32.xlu0 %v2015_v1, %s1963_s5 }
 0x105   :  { %v2279_v60 = vpop.permute.xlu1 %232  ;;  %v2281_v61 = vpop.permute.xlu0 %230 }
 0x106   :  { %4298 = vst [vmem:[#allocation69_spill] sm:$0xff] %v2279_v60  ;;  %4299 = vst [vmem:[#allocation70_spill] sm:$0xff] %v2281_v61 }
 0x107   :  { %539 = vrot.lane.b32.xlu1 %v2019_v2, %s1963_s5  ;;  %537 = vrot.lane.b32.xlu0 %v2013_v0, %s1963_s5 }
 0x109   :  { %v2285_v62 = vpop.permute.xlu1 %236  ;;  %v2287_v63 = vpop.permute.xlu0 %234 }
 0x10a   :  { %4300 = vst [vmem:[#allocation71_spill] sm:$0xff] %v2285_v62  ;;  %4301 = vst [vmem:[#allocation72_spill] sm:$0xff] %v2287_v63 }
 0x10b   :  { %543 = vrot.lane.b32.xlu1 %v2025_v4, %s1963_s5  ;;  %541 = vrot.lane.b32.xlu0 %v2027_v5, %s1963_s5 }
 0x10d   :  { %v2291_v59 = vpop.permute.xlu1 %240  ;;  %v2293_v58 = vpop.permute.xlu0 %238 }
 0x10e   :  { %4302 = vst [vmem:[#allocation73_spill] sm:$0xff] %v2291_v59  ;;  %4303 = vst [vmem:[#allocation74_spill] sm:$0xff] %v2293_v58 }
 0x10f   :  { %547 = vrot.lane.b32.xlu1 %v2031_v6, %s1963_s5  ;;  %545 = vrot.lane.b32.xlu0 %v2033_v7, %s1963_s5 }
 0x111   :  { %v2297_v61 = vpop.permute.xlu1 %244  ;;  %v2299_v60 = vpop.permute.xlu0 %242 }
 0x112   :  { %4304 = vst [vmem:[#allocation75_spill] sm:$0xff] %v2297_v61  ;;  %4305 = vst [vmem:[#allocation76_spill] sm:$0xff] %v2299_v60 }
 0x113   :  { %559 = vrot.lane.b32.xlu1 %v2021_v3, %s1964_s6  ;;  %557 = vrot.lane.b32.xlu0 %v2015_v1, %s1964_s6 }
 0x115   :  { %v2303_v63 = vpop.permute.xlu1 %256  ;;  %v2305_v62 = vpop.permute.xlu0 %254 }
 0x116   :  { %4306 = vst [vmem:[#allocation77_spill] sm:$0xff] %v2303_v63  ;;  %4307 = vst [vmem:[#allocation78_spill] sm:$0xff] %v2305_v62 }
 0x117   :  { %563 = vrot.lane.b32.xlu1 %v2019_v2, %s1964_s6  ;;  %561 = vrot.lane.b32.xlu0 %v2013_v0, %s1964_s6 }
 0x119   :  { %v2309_v58 = vpop.permute.xlu1 %260  ;;  %v2311_v59 = vpop.permute.xlu0 %258 }
 0x11a   :  { %4308 = vst [vmem:[#allocation79_spill] sm:$0xff] %v2309_v58  ;;  %4309 = vst [vmem:[#allocation80_spill] sm:$0xff] %v2311_v59 }
 0x11b   :  { %567 = vrot.lane.b32.xlu1 %v2025_v4, %s1964_s6  ;;  %565 = vrot.lane.b32.xlu0 %v2027_v5, %s1964_s6 }
 0x11d   :  { %v2315_v60 = vpop.permute.xlu1 %264  ;;  %v2317_v61 = vpop.permute.xlu0 %262 }
 0x11e   :  { %4310 = vst [vmem:[#allocation81_spill] sm:$0xff] %v2315_v60  ;;  %4311 = vst [vmem:[#allocation82_spill] sm:$0xff] %v2317_v61 }
 0x11f   :  { %571 = vrot.lane.b32.xlu1 %v2031_v6, %s1964_s6  ;;  %569 = vrot.lane.b32.xlu0 %v2033_v7, %s1964_s6 }
 0x121   :  { %v2321_v62 = vpop.permute.xlu1 %268  ;;  %v2323_v63 = vpop.permute.xlu0 %266 }
 0x122   :  { %4312 = vst [vmem:[#allocation83_spill] sm:$0xff] %v2321_v62  ;;  %4313 = vst [vmem:[#allocation84_spill] sm:$0xff] %v2323_v63 }
 0x123   :  { %583 = vrot.lane.b32.xlu1 %v2021_v3, %s1965_s7  ;;  %581 = vrot.lane.b32.xlu0 %v2015_v1, %s1965_s7 }
 0x125   :  { %v2327_v59 = vpop.permute.xlu1 %280  ;;  %v2329_v58 = vpop.permute.xlu0 %278 }
 0x126   :  { %4314 = vst [vmem:[#allocation85_spill] sm:$0xff] %v2327_v59  ;;  %4315 = vst [vmem:[#allocation86_spill] sm:$0xff] %v2329_v58 }
 0x127   :  { %587 = vrot.lane.b32.xlu1 %v2019_v2, %s1965_s7  ;;  %585 = vrot.lane.b32.xlu0 %v2013_v0, %s1965_s7 }
 0x129   :  { %v2333_v61 = vpop.permute.xlu1 %284  ;;  %v2335_v60 = vpop.permute.xlu0 %282 }
 0x12a   :  { %4316 = vst [vmem:[#allocation87_spill] sm:$0xff] %v2333_v61  ;;  %4317 = vst [vmem:[#allocation88_spill] sm:$0xff] %v2335_v60 }
 0x12b   :  { %591 = vrot.lane.b32.xlu1 %v2025_v4, %s1965_s7  ;;  %589 = vrot.lane.b32.xlu0 %v2027_v5, %s1965_s7 }
 0x12d   :  { %v2339_v63 = vpop.permute.xlu1 %288  ;;  %v2341_v62 = vpop.permute.xlu0 %286 }
 0x12e   :  { %4318 = vst [vmem:[#allocation89_spill] sm:$0xff] %v2339_v63  ;;  %4319 = vst [vmem:[#allocation90_spill] sm:$0xff] %v2341_v62 }
 0x12f   :  { %595 = vrot.lane.b32.xlu1 %v2031_v6, %s1965_s7  ;;  %593 = vrot.lane.b32.xlu0 %v2033_v7, %s1965_s7 }
 0x131   :  { %v2345_v58 = vpop.permute.xlu1 %292  ;;  %v2347_v59 = vpop.permute.xlu0 %290 }
 0x132   :  { %4320 = vst [vmem:[#allocation91_spill] sm:$0xff] %v2345_v58  ;;  %4321 = vst [vmem:[#allocation92_spill] sm:$0xff] %v2347_v59 }
 0x133   :  { %607 = vrot.lane.b32.xlu1 %v2021_v3, %s1966_s8  ;;  %605 = vrot.lane.b32.xlu0 %v2015_v1, %s1966_s8 }
 0x135   :  { %v2351_v60 = vpop.permute.xlu1 %304  ;;  %v2353_v61 = vpop.permute.xlu0 %302 }
 0x136   :  { %4322 = vst [vmem:[#allocation93_spill] sm:$0xff] %v2351_v60  ;;  %4323 = vst [vmem:[#allocation94_spill] sm:$0xff] %v2353_v61 }
 0x137   :  { %611 = vrot.lane.b32.xlu1 %v2019_v2, %s1966_s8  ;;  %609 = vrot.lane.b32.xlu0 %v2013_v0, %s1966_s8 }
 0x139   :  { %v2357_v62 = vpop.permute.xlu1 %308  ;;  %v2359_v63 = vpop.permute.xlu0 %306 }
 0x13a   :  { %4324 = vst [vmem:[#allocation95_spill] sm:$0xff] %v2357_v62  ;;  %4325 = vst [vmem:[#allocation96_spill] sm:$0xff] %v2359_v63 }
 0x13b   :  { %615 = vrot.lane.b32.xlu1 %v2025_v4, %s1966_s8  ;;  %613 = vrot.lane.b32.xlu0 %v2027_v5, %s1966_s8 }
 0x13d   :  { %v2363_v59 = vpop.permute.xlu1 %312  ;;  %v2365_v58 = vpop.permute.xlu0 %310 }
 0x13e   :  { %4326 = vst [vmem:[#allocation97_spill] sm:$0xff] %v2363_v59  ;;  %4327 = vst [vmem:[#allocation98_spill] sm:$0xff] %v2365_v58 }
 0x13f   :  { %619 = vrot.lane.b32.xlu1 %v2031_v6, %s1966_s8  ;;  %617 = vrot.lane.b32.xlu0 %v2033_v7, %s1966_s8 }
 0x141   :  { %v2369_v61 = vpop.permute.xlu1 %316  ;;  %v2371_v60 = vpop.permute.xlu0 %314 }
 0x142   :  { %4328 = vst [vmem:[#allocation99_spill] sm:$0xff] %v2369_v61  ;;  %4329 = vst [vmem:[#allocation100_spill] sm:$0xff] %v2371_v60 }
 0x143   :  { %631 = vrot.lane.b32.xlu1 %v2021_v3, %s1967_s9  ;;  %629 = vrot.lane.b32.xlu0 %v2015_v1, %s1967_s9 }
 0x145   :  { %v2375_v63 = vpop.permute.xlu1 %328  ;;  %v2377_v62 = vpop.permute.xlu0 %326 }
 0x146   :  { %4330 = vst [vmem:[#allocation101_spill] sm:$0xff] %v2375_v63  ;;  %4331 = vst [vmem:[#allocation102_spill] sm:$0xff] %v2377_v62 }
 0x147   :  { %635 = vrot.lane.b32.xlu1 %v2019_v2, %s1967_s9  ;;  %633 = vrot.lane.b32.xlu0 %v2013_v0, %s1967_s9 }
 0x149   :  { %v2381_v58 = vpop.permute.xlu1 %332  ;;  %v2383_v59 = vpop.permute.xlu0 %330 }
 0x14a   :  { %4332 = vst [vmem:[#allocation103_spill] sm:$0xff] %v2381_v58  ;;  %4333 = vst [vmem:[#allocation104_spill] sm:$0xff] %v2383_v59 }
 0x14b   :  { %639 = vrot.lane.b32.xlu1 %v2025_v4, %s1967_s9  ;;  %637 = vrot.lane.b32.xlu0 %v2027_v5, %s1967_s9 }
 0x14d   :  { %v2387_v60 = vpop.permute.xlu1 %336  ;;  %v2389_v61 = vpop.permute.xlu0 %334 }
 0x14e   :  { %4334 = vst [vmem:[#allocation105_spill] sm:$0xff] %v2387_v60  ;;  %4335 = vst [vmem:[#allocation106_spill] sm:$0xff] %v2389_v61 }
 0x14f   :  { %643 = vrot.lane.b32.xlu1 %v2031_v6, %s1967_s9  ;;  %641 = vrot.lane.b32.xlu0 %v2033_v7, %s1967_s9 }
 0x151   :  { %v2393_v62 = vpop.permute.xlu1 %340  ;;  %v2395_v63 = vpop.permute.xlu0 %338 }
 0x152   :  { %4336 = vst [vmem:[#allocation107_spill] sm:$0xff] %v2393_v62  ;;  %4337 = vst [vmem:[#allocation108_spill] sm:$0xff] %v2395_v63 }
 0x153   :  { %655 = vrot.lane.b32.xlu1 %v2021_v3, %s1968_s10  ;;  %653 = vrot.lane.b32.xlu0 %v2015_v1, %s1968_s10 }
 0x155   :  { %v2399_v59 = vpop.permute.xlu1 %352  ;;  %v2401_v58 = vpop.permute.xlu0 %350 }
 0x156   :  { %4338 = vst [vmem:[#allocation109_spill] sm:$0xff] %v2399_v59  ;;  %4339 = vst [vmem:[#allocation110_spill] sm:$0xff] %v2401_v58 }
 0x157   :  { %659 = vrot.lane.b32.xlu1 %v2019_v2, %s1968_s10  ;;  %657 = vrot.lane.b32.xlu0 %v2013_v0, %s1968_s10 }
 0x159   :  { %v2405_v61 = vpop.permute.xlu1 %356  ;;  %v2407_v60 = vpop.permute.xlu0 %354 }
 0x15a   :  { %4340 = vst [vmem:[#allocation111_spill] sm:$0xff] %v2405_v61  ;;  %4341 = vst [vmem:[#allocation112_spill] sm:$0xff] %v2407_v60 }
 0x15b   :  { %663 = vrot.lane.b32.xlu1 %v2025_v4, %s1968_s10  ;;  %661 = vrot.lane.b32.xlu0 %v2027_v5, %s1968_s10 }
 0x15d   :  { %v2411_v63 = vpop.permute.xlu1 %360  ;;  %v2413_v62 = vpop.permute.xlu0 %358 }
 0x15e   :  { %4342 = vst [vmem:[#allocation113_spill] sm:$0xff] %v2411_v63  ;;  %4343 = vst [vmem:[#allocation114_spill] sm:$0xff] %v2413_v62 }
 0x15f   :  { %667 = vrot.lane.b32.xlu1 %v2031_v6, %s1968_s10  ;;  %665 = vrot.lane.b32.xlu0 %v2033_v7, %s1968_s10 }
 0x161   :  { %v2417_v58 = vpop.permute.xlu1 %364  ;;  %v2419_v59 = vpop.permute.xlu0 %362 }
 0x162   :  { %4344 = vst [vmem:[#allocation115_spill] sm:$0xff] %v2417_v58  ;;  %4345 = vst [vmem:[#allocation116_spill] sm:$0xff] %v2419_v59 }
 0x163   :  { %802 = vrot.lane.b32.xlu1 %v2021_v3, %s1969_s11  ;;  %800 = vrot.lane.b32.xlu0 %v2015_v1, %s1969_s11 }
 0x165   :  { %v2423_v60 = vpop.permute.xlu1 %376  ;;  %v2425_v61 = vpop.permute.xlu0 %374 }
 0x166   :  { %4346 = vst [vmem:[#allocation117_spill] sm:$0xff] %v2423_v60  ;;  %4347 = vst [vmem:[#allocation118_spill] sm:$0xff] %v2425_v61 }
 0x167   :  { %806 = vrot.lane.b32.xlu1 %v2019_v2, %s1969_s11  ;;  %804 = vrot.lane.b32.xlu0 %v2013_v0, %s1969_s11 }
 0x169   :  { %v2429_v62 = vpop.permute.xlu1 %380  ;;  %v2431_v63 = vpop.permute.xlu0 %378 }
 0x16a   :  { %4348 = vst [vmem:[#allocation119_spill] sm:$0xff] %v2429_v62  ;;  %4349 = vst [vmem:[#allocation120_spill] sm:$0xff] %v2431_v63 }
 0x16b   :  { %810 = vrot.lane.b32.xlu1 %v2025_v4, %s1969_s11  ;;  %808 = vrot.lane.b32.xlu0 %v2027_v5, %s1969_s11 }
 0x16d   :  { %v2435_v59 = vpop.permute.xlu1 %384  ;;  %v2437_v58 = vpop.permute.xlu0 %382 }
 0x16e   :  { %4350 = vst [vmem:[#allocation121_spill] sm:$0xff] %v2435_v59  ;;  %4351 = vst [vmem:[#allocation122_spill] sm:$0xff] %v2437_v58 }
 0x16f   :  { %814 = vrot.lane.b32.xlu1 %v2031_v6, %s1969_s11  ;;  %812 = vrot.lane.b32.xlu0 %v2033_v7, %s1969_s11 }
 0x171   :  { %v2441_v61 = vpop.permute.xlu1 %388  ;;  %v2443_v60 = vpop.permute.xlu0 %386 }
 0x172   :  { %4352 = vst [vmem:[#allocation123_spill] sm:$0xff] %v2441_v61  ;;  %4353 = vst [vmem:[#allocation124_spill] sm:$0xff] %v2443_v60 }
 0x173   :  { %826 = vrot.lane.b32.xlu1 %v2021_v3, %s1970_s12  ;;  %824 = vrot.lane.b32.xlu0 %v2015_v1, %s1970_s12 }
 0x175   :  { %v2447_v63 = vpop.permute.xlu1 %535  ;;  %v2449_v62 = vpop.permute.xlu0 %533 }
 0x177   :  { %830 = vrot.lane.b32.xlu1 %v2019_v2, %s1970_s12  ;;  %828 = vrot.lane.b32.xlu0 %v2013_v0, %s1970_s12 }
 0x179   :  { %v2453_v58 = vpop.permute.xlu1 %539  ;;  %v2455_v59 = vpop.permute.xlu0 %537 }
 0x17b   :  { %834 = vrot.lane.b32.xlu1 %v2025_v4, %s1970_s12  ;;  %832 = vrot.lane.b32.xlu0 %v2027_v5, %s1970_s12 }
 0x17d   :  { %v2459_v60 = vpop.permute.xlu1 %543  ;;  %v2461_v61 = vpop.permute.xlu0 %541 }
 0x17f   :  { %838 = vrot.lane.b32.xlu1 %v2031_v6, %s1970_s12  ;;  %836 = vrot.lane.b32.xlu0 %v2033_v7, %s1970_s12 }
 0x181   :  { %v2465_v57 = vpop.permute.xlu1 %547  ;;  %v2467_v56 = vpop.permute.xlu0 %545 }
 0x183   :  { %850 = vrot.lane.b32.xlu1 %v2021_v3, %s1971_s13  ;;  %848 = vrot.lane.b32.xlu0 %v2015_v1, %s1971_s13 }
 0x185   :  { %v2471_v55 = vpop.permute.xlu1 %559  ;;  %v2473_v54 = vpop.permute.xlu0 %557 }
 0x187   :  { %854 = vrot.lane.b32.xlu1 %v2019_v2, %s1971_s13  ;;  %852 = vrot.lane.b32.xlu0 %v2013_v0, %s1971_s13 }
 0x189   :  { %v2477_v53 = vpop.permute.xlu1 %563  ;;  %v2479_v52 = vpop.permute.xlu0 %561 }
 0x18b   :  { %858 = vrot.lane.b32.xlu1 %v2025_v4, %s1971_s13  ;;  %856 = vrot.lane.b32.xlu0 %v2027_v5, %s1971_s13 }
 0x18d   :  { %v2483_v51 = vpop.permute.xlu1 %567  ;;  %v2485_v50 = vpop.permute.xlu0 %565 }
 0x18f   :  { %862 = vrot.lane.b32.xlu1 %v2031_v6, %s1971_s13  ;;  %860 = vrot.lane.b32.xlu0 %v2033_v7, %s1971_s13 }
 0x191   :  { %v2489_v49 = vpop.permute.xlu1 %571  ;;  %v2491_v48 = vpop.permute.xlu0 %569 }
 0x193   :  { %874 = vrot.lane.b32.xlu1 %v2021_v3, %s1972_s14  ;;  %872 = vrot.lane.b32.xlu0 %v2015_v1, %s1972_s14 }
 0x195   :  { %v2495_v39 = vpop.permute.xlu1 %583  ;;  %v2497_v38 = vpop.permute.xlu0 %581 }
 0x197   :  { %878 = vrot.lane.b32.xlu1 %v2019_v2, %s1972_s14  ;;  %876 = vrot.lane.b32.xlu0 %v2013_v0, %s1972_s14 }
 0x199   :  { %v2501_v37 = vpop.permute.xlu1 %587  ;;  %v2503_v36 = vpop.permute.xlu0 %585 }
 0x19b   :  { %882 = vrot.lane.b32.xlu1 %v2025_v4, %s1972_s14  ;;  %880 = vrot.lane.b32.xlu0 %v2027_v5, %s1972_s14 }
 0x19d   :  { %v2507_v35 = vpop.permute.xlu1 %591  ;;  %v2509_v34 = vpop.permute.xlu0 %589 }
 0x19f   :  { %886 = vrot.lane.b32.xlu1 %v2031_v6, %s1972_s14  ;;  %884 = vrot.lane.b32.xlu0 %v2033_v7, %s1972_s14 }
 0x1a1   :  { %v2513_v33 = vpop.permute.xlu1 %595  ;;  %v2515_v32 = vpop.permute.xlu0 %593 }
 0x1a3   :  { %898 = vrot.lane.b32.xlu1 %v2021_v3, %s1973_s15  ;;  %896 = vrot.lane.b32.xlu0 %v2015_v1, %s1973_s15 }
 0x1a5   :  { %v2519_v15 = vpop.permute.xlu1 %607  ;;  %v2521_v14 = vpop.permute.xlu0 %605 }
 0x1a7   :  { %902 = vrot.lane.b32.xlu1 %v2019_v2, %s1973_s15  ;;  %900 = vrot.lane.b32.xlu0 %v2013_v0, %s1973_s15 }
 0x1a9   :  { %v2525_v13 = vpop.permute.xlu1 %611  ;;  %v2527_v12 = vpop.permute.xlu0 %609 }
 0x1aa   :  { %4354 = vst [vmem:[#allocation125_spill] sm:$0xff] %v2525_v13  ;;  %4355 = vst [vmem:[#allocation126_spill] sm:$0xff] %v2527_v12 }
 0x1ab   :  { %906 = vrot.lane.b32.xlu1 %v2025_v4, %s1973_s15  ;;  %904 = vrot.lane.b32.xlu0 %v2027_v5, %s1973_s15 }
 0x1ad   :  { %v2531_v8 = vpop.permute.xlu1 %615  ;;  %v2533_v10 = vpop.permute.xlu0 %613 }
 0x1ae   :  { %4356 = vst [vmem:[#allocation127_spill] sm:$0xff] %v2531_v8  ;;  %4357 = vst [vmem:[#allocation128_spill] sm:$0xff] %v2533_v10 }
 0x1af   :  { %910 = vrot.lane.b32.xlu1 %v2031_v6, %s1973_s15  ;;  %908 = vrot.lane.b32.xlu0 %v2033_v7, %s1973_s15 }
 0x1b1   :  { %v2537_v9 = vpop.permute.xlu1 %619  ;;  %v2539_v11 = vpop.permute.xlu0 %617 }
 0x1b2   :  { %4358 = vst [vmem:[#allocation129_spill] sm:$0xff] %v2537_v9  ;;  %4359 = vst [vmem:[#allocation130_spill] sm:$0xff] %v2539_v11 }
 0x1b3   :  { %922 = vrot.lane.b32.xlu1 %v2021_v3, %s1974_s16  ;;  %920 = vrot.lane.b32.xlu0 %v2015_v1, %s1974_s16 }
 0x1b5   :  { %v2543_v12 = vpop.permute.xlu1 %631  ;;  %v2545_v13 = vpop.permute.xlu0 %629 }
 0x1b6   :  { %4360 = vst [vmem:[#allocation131_spill] sm:$0xff] %v2543_v12  ;;  %4361 = vst [vmem:[#allocation132_spill] sm:$0xff] %v2545_v13 }
 0x1b7   :  { %926 = vrot.lane.b32.xlu1 %v2019_v2, %s1974_s16  ;;  %924 = vrot.lane.b32.xlu0 %v2013_v0, %s1974_s16 }
 0x1b9   :  { %v2549_v10 = vpop.permute.xlu1 %635  ;;  %v2551_v8 = vpop.permute.xlu0 %633 }
 0x1ba   :  { %4362 = vst [vmem:[#allocation133_spill] sm:$0xff] %v2549_v10  ;;  %4363 = vst [vmem:[#allocation134_spill] sm:$0xff] %v2551_v8 }
 0x1bb   :  { %930 = vrot.lane.b32.xlu1 %v2025_v4, %s1974_s16  ;;  %928 = vrot.lane.b32.xlu0 %v2027_v5, %s1974_s16 }
 0x1bd   :  { %v2555_v11 = vpop.permute.xlu1 %639  ;;  %v2557_v9 = vpop.permute.xlu0 %637 }
 0x1be   :  { %4364 = vst [vmem:[#allocation135_spill] sm:$0xff] %v2555_v11  ;;  %4365 = vst [vmem:[#allocation136_spill] sm:$0xff] %v2557_v9 }
 0x1bf   :  { %934 = vrot.lane.b32.xlu1 %v2031_v6, %s1974_s16  ;;  %932 = vrot.lane.b32.xlu0 %v2033_v7, %s1974_s16 }
 0x1c1   :  { %v2561_v13 = vpop.permute.xlu1 %643  ;;  %v2563_v12 = vpop.permute.xlu0 %641 }
 0x1c2   :  { %4366 = vst [vmem:[#allocation137_spill] sm:$0xff] %v2561_v13  ;;  %4367 = vst [vmem:[#allocation138_spill] sm:$0xff] %v2563_v12 }
 0x1c3   :  { %946 = vrot.lane.b32.xlu1 %v2021_v3, %s1975_s17  ;;  %944 = vrot.lane.b32.xlu0 %v2015_v1, %s1975_s17 }
 0x1c5   :  { %v2567_v8 = vpop.permute.xlu1 %655  ;;  %v2569_v10 = vpop.permute.xlu0 %653 }
 0x1c6   :  { %4368 = vst [vmem:[#allocation139_spill] sm:$0xff] %v2567_v8  ;;  %4369 = vst [vmem:[#allocation140_spill] sm:$0xff] %v2569_v10 }
 0x1c7   :  { %950 = vrot.lane.b32.xlu1 %v2019_v2, %s1975_s17  ;;  %948 = vrot.lane.b32.xlu0 %v2013_v0, %s1975_s17 }
 0x1c9   :  { %v2573_v9 = vpop.permute.xlu1 %659  ;;  %v2575_v11 = vpop.permute.xlu0 %657 }
 0x1ca   :  { %4370 = vst [vmem:[#allocation141_spill] sm:$0xff] %v2573_v9  ;;  %4371 = vst [vmem:[#allocation142_spill] sm:$0xff] %v2575_v11 }
 0x1cb   :  { %954 = vrot.lane.b32.xlu1 %v2025_v4, %s1975_s17  ;;  %952 = vrot.lane.b32.xlu0 %v2027_v5, %s1975_s17 }
 0x1cd   :  { %v2579_v12 = vpop.permute.xlu1 %663  ;;  %v2581_v13 = vpop.permute.xlu0 %661 }
 0x1ce   :  { %4372 = vst [vmem:[#allocation143_spill] sm:$0xff] %v2579_v12  ;;  %4373 = vst [vmem:[#allocation144_spill] sm:$0xff] %v2581_v13 }
 0x1cf   :  { %958 = vrot.lane.b32.xlu1 %v2031_v6, %s1975_s17  ;;  %956 = vrot.lane.b32.xlu0 %v2033_v7, %s1975_s17 }
 0x1d1   :  { %v2585_v10 = vpop.permute.xlu1 %667  ;;  %v2587_v8 = vpop.permute.xlu0 %665 }
 0x1d2   :  { %4374 = vst [vmem:[#allocation145_spill] sm:$0xff] %v2585_v10  ;;  %4375 = vst [vmem:[#allocation146_spill] sm:$0xff] %v2587_v8 }
 0x1d3   :  { %970 = vrot.lane.b32.xlu1 %v2021_v3, %s1976_s18  ;;  %968 = vrot.lane.b32.xlu0 %v2015_v1, %s1976_s18 }
 0x1d5   :  { %v2591_v11 = vpop.permute.xlu1 %802  ;;  %v2593_v9 = vpop.permute.xlu0 %800 }
 0x1d6   :  { %4376 = vst [vmem:[#allocation147_spill] sm:$0xff] %v2591_v11  ;;  %4377 = vst [vmem:[#allocation148_spill] sm:$0xff] %v2593_v9 }
 0x1d7   :  { %974 = vrot.lane.b32.xlu1 %v2019_v2, %s1976_s18  ;;  %972 = vrot.lane.b32.xlu0 %v2013_v0, %s1976_s18 }
 0x1d9   :  { %v2597_v13 = vpop.permute.xlu1 %806  ;;  %v2599_v12 = vpop.permute.xlu0 %804 }
 0x1da   :  { %4378 = vst [vmem:[#allocation149_spill] sm:$0xff] %v2597_v13  ;;  %4379 = vst [vmem:[#allocation150_spill] sm:$0xff] %v2599_v12 }
 0x1db   :  { %978 = vrot.lane.b32.xlu1 %v2025_v4, %s1976_s18  ;;  %976 = vrot.lane.b32.xlu0 %v2027_v5, %s1976_s18 }
 0x1dd   :  { %v2603_v8 = vpop.permute.xlu1 %810  ;;  %v2605_v10 = vpop.permute.xlu0 %808 }
 0x1de   :  { %4380 = vst [vmem:[#allocation151_spill] sm:$0xff] %v2603_v8  ;;  %4381 = vst [vmem:[#allocation152_spill] sm:$0xff] %v2605_v10 }
 0x1df   :  { %982 = vrot.lane.b32.xlu1 %v2031_v6, %s1976_s18  ;;  %980 = vrot.lane.b32.xlu0 %v2033_v7, %s1976_s18 }
 0x1e1   :  { %v2609_v9 = vpop.permute.xlu1 %814  ;;  %v2611_v11 = vpop.permute.xlu0 %812 }
 0x1e2   :  { %4382 = vst [vmem:[#allocation153_spill] sm:$0xff] %v2609_v9  ;;  %4383 = vst [vmem:[#allocation154_spill] sm:$0xff] %v2611_v11 }
 0x1e3   :  { %994 = vrot.lane.b32.xlu1 %v2021_v3, %s1977_s19  ;;  %992 = vrot.lane.b32.xlu0 %v2015_v1, %s1977_s19 }
 0x1e5   :  { %v2615_v12 = vpop.permute.xlu1 %826  ;;  %v2617_v13 = vpop.permute.xlu0 %824 }
 0x1e6   :  { %4384 = vst [vmem:[#allocation155_spill] sm:$0xff] %v2615_v12  ;;  %4385 = vst [vmem:[#allocation156_spill] sm:$0xff] %v2617_v13 }
 0x1e7   :  { %998 = vrot.lane.b32.xlu1 %v2019_v2, %s1977_s19  ;;  %996 = vrot.lane.b32.xlu0 %v2013_v0, %s1977_s19 }
 0x1e9   :  { %v2621_v10 = vpop.permute.xlu1 %830  ;;  %v2623_v8 = vpop.permute.xlu0 %828 }
 0x1ea   :  { %4386 = vst [vmem:[#allocation157_spill] sm:$0xff] %v2621_v10  ;;  %4387 = vst [vmem:[#allocation158_spill] sm:$0xff] %v2623_v8 }
 0x1eb   :  { %1002 = vrot.lane.b32.xlu1 %v2025_v4, %s1977_s19  ;;  %1000 = vrot.lane.b32.xlu0 %v2027_v5, %s1977_s19 }
 0x1ed   :  { %v2627_v11 = vpop.permute.xlu1 %834  ;;  %v2629_v9 = vpop.permute.xlu0 %832 }
 0x1ee   :  { %4388 = vst [vmem:[#allocation159_spill] sm:$0xff] %v2627_v11  ;;  %4389 = vst [vmem:[#allocation160_spill] sm:$0xff] %v2629_v9 }
 0x1ef   :  { %1006 = vrot.lane.b32.xlu1 %v2031_v6, %s1977_s19  ;;  %1004 = vrot.lane.b32.xlu0 %v2033_v7, %s1977_s19 }
 0x1f1   :  { %v2633_v13 = vpop.permute.xlu1 %838  ;;  %v2635_v12 = vpop.permute.xlu0 %836 }
 0x1f2   :  { %4390 = vst [vmem:[#allocation161_spill] sm:$0xff] %v2633_v13  ;;  %4391 = vst [vmem:[#allocation162_spill] sm:$0xff] %v2635_v12 }
 0x1f3   :  { %1018 = vrot.lane.b32.xlu1 %v2021_v3, %s1978_s20  ;;  %1016 = vrot.lane.b32.xlu0 %v2015_v1, %s1978_s20 }
 0x1f5   :  { %v2639_v8 = vpop.permute.xlu1 %850  ;;  %v2641_v10 = vpop.permute.xlu0 %848 }
 0x1f6   :  { %4392 = vst [vmem:[#allocation163_spill] sm:$0xff] %v2639_v8  ;;  %4393 = vst [vmem:[#allocation164_spill] sm:$0xff] %v2641_v10 }
 0x1f7   :  { %1022 = vrot.lane.b32.xlu1 %v2019_v2, %s1978_s20  ;;  %1020 = vrot.lane.b32.xlu0 %v2013_v0, %s1978_s20 }
 0x1f9   :  { %v2645_v9 = vpop.permute.xlu1 %854  ;;  %v2647_v11 = vpop.permute.xlu0 %852 }
 0x1fa   :  { %4394 = vst [vmem:[#allocation165_spill] sm:$0xff] %v2645_v9  ;;  %4395 = vst [vmem:[#allocation166_spill] sm:$0xff] %v2647_v11 }
 0x1fb   :  { %1026 = vrot.lane.b32.xlu1 %v2025_v4, %s1978_s20  ;;  %1024 = vrot.lane.b32.xlu0 %v2027_v5, %s1978_s20 }
 0x1fd   :  { %v2651_v12 = vpop.permute.xlu1 %858  ;;  %v2653_v13 = vpop.permute.xlu0 %856 }
 0x1fe   :  { %4396 = vst [vmem:[#allocation167_spill] sm:$0xff] %v2651_v12  ;;  %4397 = vst [vmem:[#allocation168_spill] sm:$0xff] %v2653_v13 }
 0x1ff   :  { %1030 = vrot.lane.b32.xlu1 %v2031_v6, %s1978_s20  ;;  %1028 = vrot.lane.b32.xlu0 %v2033_v7, %s1978_s20 }
 0x201   :  { %v2657_v10 = vpop.permute.xlu1 %862  ;;  %v2659_v8 = vpop.permute.xlu0 %860 }
 0x202   :  { %4398 = vst [vmem:[#allocation169_spill] sm:$0xff] %v2657_v10  ;;  %4399 = vst [vmem:[#allocation170_spill] sm:$0xff] %v2659_v8 }
 0x203   :  { %1165 = vrot.lane.b32.xlu1 %v2021_v3, %s1979_s0  ;;  %1163 = vrot.lane.b32.xlu0 %v2015_v1, %s1979_s0 }
 0x205   :  { %v2663_v11 = vpop.permute.xlu1 %874  ;;  %v2665_v9 = vpop.permute.xlu0 %872 }
 0x206   :  { %4400 = vst [vmem:[#allocation171_spill] sm:$0xff] %v2663_v11  ;;  %4401 = vst [vmem:[#allocation172_spill] sm:$0xff] %v2665_v9 }
 0x207   :  { %1169 = vrot.lane.b32.xlu1 %v2019_v2, %s1979_s0  ;;  %1167 = vrot.lane.b32.xlu0 %v2013_v0, %s1979_s0 }
 0x209   :  { %v2669_v13 = vpop.permute.xlu1 %878  ;;  %v2671_v12 = vpop.permute.xlu0 %876 }
 0x20a   :  { %4402 = vst [vmem:[#allocation173_spill] sm:$0xff] %v2669_v13  ;;  %4403 = vst [vmem:[#allocation174_spill] sm:$0xff] %v2671_v12 }
 0x20b   :  { %1173 = vrot.lane.b32.xlu1 %v2025_v4, %s1979_s0  ;;  %1171 = vrot.lane.b32.xlu0 %v2027_v5, %s1979_s0 }
 0x20d   :  { %v2675_v8 = vpop.permute.xlu1 %882  ;;  %v2677_v10 = vpop.permute.xlu0 %880 }
 0x20e   :  { %4404 = vst [vmem:[#allocation175_spill] sm:$0xff] %v2675_v8  ;;  %4405 = vst [vmem:[#allocation176_spill] sm:$0xff] %v2677_v10 }
 0x20f   :  { %1177 = vrot.lane.b32.xlu1 %v2031_v6, %s1979_s0  ;;  %1175 = vrot.lane.b32.xlu0 %v2033_v7, %s1979_s0 }
 0x211   :  { %v2681_v9 = vpop.permute.xlu1 %886  ;;  %v2683_v11 = vpop.permute.xlu0 %884 }
 0x212   :  { %4406 = vst [vmem:[#allocation177_spill] sm:$0xff] %v2681_v9  ;;  %4407 = vst [vmem:[#allocation178_spill] sm:$0xff] %v2683_v11 }
 0x213   :  { %1189 = vrot.lane.b32.xlu1 %v2021_v3, %s1980_s21  ;;  %1187 = vrot.lane.b32.xlu0 %v2015_v1, %s1980_s21 }
 0x215   :  { %v2687_v12 = vpop.permute.xlu1 %898  ;;  %v2689_v13 = vpop.permute.xlu0 %896 }
 0x216   :  { %4408 = vst [vmem:[#allocation179_spill] sm:$0xff] %v2687_v12  ;;  %4409 = vst [vmem:[#allocation180_spill] sm:$0xff] %v2689_v13 }
 0x217   :  { %1193 = vrot.lane.b32.xlu1 %v2019_v2, %s1980_s21  ;;  %1191 = vrot.lane.b32.xlu0 %v2013_v0, %s1980_s21  ;;  %v2710_v0 = vld [vmem:[#allocation2] sm:$0xff] }
 0x219   :  { %v2693_v10 = vpop.permute.xlu1 %902  ;;  %v2695_v8 = vpop.permute.xlu0 %900 }
 0x21a   :  { %4410 = vst [vmem:[#allocation181_spill] sm:$0xff] %v2693_v10  ;;  %4411 = vst [vmem:[#allocation182_spill] sm:$0xff] %v2695_v8  ;;  %v2747_v10 = vld [vmem:[#allocation2 + $0x8] sm:$0xff] }
 0x21b   :  { %1197 = vrot.lane.b32.xlu1 %v2025_v4, %s1980_s21  ;;  %1195 = vrot.lane.b32.xlu0 %v2027_v5, %s1980_s21 }
 0x21d   :  { %v2699_v11 = vpop.permute.xlu1 %906  ;;  %v2701_v9 = vpop.permute.xlu0 %904 }
 0x21e   :  { %4412 = vst [vmem:[#allocation183_spill] sm:$0xff] %v2699_v11  ;;  %4413 = vst [vmem:[#allocation184_spill] sm:$0xff] %v2701_v9  ;;  %v2717_v9 = vld [vmem:[#allocation2 + $0x18] sm:$0xff] }
 0x21f   :  { %1201 = vrot.lane.b32.xlu1 %v2031_v6, %s1980_s21  ;;  %1199 = vrot.lane.b32.xlu0 %v2033_v7, %s1980_s21  ;;  %v2720_v6 = vld [vmem:[#allocation2 + $0x10] sm:$0xff] }
 0x221   :  { %v2705_v1 = vpop.permute.xlu1 %910  ;;  %v2707_v2 = vpop.permute.xlu0 %908 }
 0x222   :  { %4414 = vst [vmem:[#allocation185_spill] sm:$0xff] %v2705_v1  ;;  %4415 = vst [vmem:[#allocation186_spill] sm:$0xff] %v2707_v2  ;;  %v2730_v1 = vld [vmem:[#allocation2 + $0x20] sm:$0xff] }
 0x223   :  { %1213 = vrot.lane.b32.xlu1 %v2021_v3, %s1981_s22  ;;  %1211 = vrot.lane.b32.xlu0 %v2710_v0, %s1981_s22  ;;  %v2727_v3 = vld [vmem:[#allocation2 + $0x28] sm:$0xff] }
 0x225   :  { %v2713_v4 = vpop.permute.xlu1 %922  ;;  %v2715_v5 = vpop.permute.xlu0 %920 }
 0x226   :  { %4416 = vst [vmem:[#allocation187_spill] sm:$0xff] %v2713_v4  ;;  %4417 = vst [vmem:[#allocation188_spill] sm:$0xff] %v2715_v5  ;;  %v2737_v5 = vld [vmem:[#allocation2 + $0x38] sm:$0xff]  ;;  %v2740_v4 = vld [vmem:[#allocation2 + $0x30] sm:$0xff] }
 0x227   :  { %1217 = vrot.lane.b32.xlu1 %v2717_v9, %s1981_s22  ;;  %1215 = vrot.lane.b32.xlu0 %v2720_v6, %s1981_s22 }
 0x229   :  { %v2723_v7 = vpop.permute.xlu1 %926  ;;  %v2725_v2 = vpop.permute.xlu0 %924 }
 0x22a   :  { %4418 = vst [vmem:[#allocation189_spill] sm:$0xff] %v2723_v7  ;;  %4419 = vst [vmem:[#allocation190_spill] sm:$0xff] %v2725_v2 }
 0x22b   :  { %1221 = vrot.lane.b32.xlu1 %v2727_v3, %s1981_s22  ;;  %1219 = vrot.lane.b32.xlu0 %v2730_v1, %s1981_s22 }
 0x22d   :  { %v2733_v11 = vpop.permute.xlu1 %930  ;;  %v2735_v8 = vpop.permute.xlu0 %928 }
 0x22e   :  { %4420 = vst [vmem:[#allocation191_spill] sm:$0xff] %v2733_v11  ;;  %4421 = vst [vmem:[#allocation192_spill] sm:$0xff] %v2735_v8 }
 0x22f   :  { %1225 = vrot.lane.b32.xlu1 %v2737_v5, %s1981_s22  ;;  %1223 = vrot.lane.b32.xlu0 %v2740_v4, %s1981_s22 }
 0x231   :  { %v2743_v2 = vpop.permute.xlu1 %934  ;;  %v2745_v7 = vpop.permute.xlu0 %932 }
 0x232   :  { %4422 = vst [vmem:[#allocation193_spill] sm:$0xff] %v2743_v2  ;;  %4423 = vst [vmem:[#allocation194_spill] sm:$0xff] %v2745_v7 }
 0x233   :  { %1237 = vrot.lane.b32.xlu1 %v2747_v10, %s1982_s23  ;;  %1235 = vrot.lane.b32.xlu0 %v2710_v0, %s1982_s23 }
 0x235   :  { %v2751_v8 = vpop.permute.xlu1 %946  ;;  %v2753_v11 = vpop.permute.xlu0 %944 }
 0x236   :  { %4424 = vst [vmem:[#allocation195_spill] sm:$0xff] %v2751_v8  ;;  %4425 = vst [vmem:[#allocation196_spill] sm:$0xff] %v2753_v11 }
 0x237   :  { %1241 = vrot.lane.b32.xlu1 %v2717_v9, %s1982_s23  ;;  %1239 = vrot.lane.b32.xlu0 %v2720_v6, %s1982_s23 }
 0x239   :  { %v2757_v13 = vpop.permute.xlu1 %950  ;;  %v2759_v2 = vpop.permute.xlu0 %948 }
 0x23a   :  { %4426 = vst [vmem:[#allocation197_spill] sm:$0xff] %v2757_v13  ;;  %4427 = vst [vmem:[#allocation198_spill] sm:$0xff] %v2759_v2 }
 0x23b   :  { %1245 = vrot.lane.b32.xlu1 %v2727_v3, %s1982_s23  ;;  %1243 = vrot.lane.b32.xlu0 %v2730_v1, %s1982_s23 }
 0x23d   :  { %v2763_v7 = vpop.permute.xlu1 %954  ;;  %v2765_v12 = vpop.permute.xlu0 %952 }
 0x23e   :  { %4428 = vst [vmem:[#allocation199_spill] sm:$0xff] %v2763_v7  ;;  %4429 = vst [vmem:[#allocation200_spill] sm:$0xff] %v2765_v12 }
 0x23f   :  { %1249 = vrot.lane.b32.xlu1 %v2737_v5, %s1982_s23  ;;  %1247 = vrot.lane.b32.xlu0 %v2740_v4, %s1982_s23 }
 0x241   :  { %v2769_v11 = vpop.permute.xlu1 %958  ;;  %v2771_v8 = vpop.permute.xlu0 %956 }
 0x242   :  { %4430 = vst [vmem:[#allocation201_spill] sm:$0xff] %v2769_v11  ;;  %4431 = vst [vmem:[#allocation202_spill] sm:$0xff] %v2771_v8 }
 0x243   :  { %1261 = vrot.lane.b32.xlu1 %v2747_v10, %s1983_s24  ;;  %1259 = vrot.lane.b32.xlu0 %v2710_v0, %s1983_s24 }
 0x245   :  { %v2775_v2 = vpop.permute.xlu1 %970  ;;  %v2777_v13 = vpop.permute.xlu0 %968 }
 0x246   :  { %4432 = vst [vmem:[#allocation203_spill] sm:$0xff] %v2775_v2  ;;  %4433 = vst [vmem:[#allocation204_spill] sm:$0xff] %v2777_v13 }
 0x247   :  { %1265 = vrot.lane.b32.xlu1 %v2717_v9, %s1983_s24  ;;  %1263 = vrot.lane.b32.xlu0 %v2720_v6, %s1983_s24 }
 0x249   :  { %v2781_v12 = vpop.permute.xlu1 %974  ;;  %v2783_v7 = vpop.permute.xlu0 %972 }
 0x24a   :  { %4434 = vst [vmem:[#allocation205_spill] sm:$0xff] %v2781_v12  ;;  %4435 = vst [vmem:[#allocation206_spill] sm:$0xff] %v2783_v7 }
 0x24b   :  { %1269 = vrot.lane.b32.xlu1 %v2727_v3, %s1983_s24  ;;  %1267 = vrot.lane.b32.xlu0 %v2730_v1, %s1983_s24 }
 0x24d   :  { %v2787_v8 = vpop.permute.xlu1 %978  ;;  %v2789_v11 = vpop.permute.xlu0 %976 }
 0x24e   :  { %4436 = vst [vmem:[#allocation207_spill] sm:$0xff] %v2787_v8  ;;  %4437 = vst [vmem:[#allocation208_spill] sm:$0xff] %v2789_v11 }
 0x24f   :  { %1273 = vrot.lane.b32.xlu1 %v2737_v5, %s1983_s24  ;;  %1271 = vrot.lane.b32.xlu0 %v2740_v4, %s1983_s24 }
 0x251   :  { %v2793_v13 = vpop.permute.xlu1 %982  ;;  %v2795_v2 = vpop.permute.xlu0 %980 }
 0x252   :  { %4438 = vst [vmem:[#allocation209_spill] sm:$0xff] %v2793_v13  ;;  %4439 = vst [vmem:[#allocation210_spill] sm:$0xff] %v2795_v2  ;;  %v678_v2 = vsel %vm398_vm0, %v2447_v63, %v2111_v16  ;;  %v682_v63 = vsel %vm398_vm0, %v2459_v60, %v2123_v20  ;;  %v681_v60 = vsel %vm398_vm0, %v2461_v61, %v2125_v21 }
 0x253   :  { %1285 = vrot.lane.b32.xlu1 %v2747_v10, %s1984_s25  ;;  %1283 = vrot.lane.b32.xlu0 %v2710_v0, %s1984_s25 }
 0x255   :  { %v2799_v7 = vpop.permute.xlu1 %994  ;;  %v2801_v12 = vpop.permute.xlu0 %992 }
 0x256   :  { %4440 = vst [vmem:[#allocation211_spill] sm:$0xff] %v2799_v7  ;;  %4441 = vst [vmem:[#allocation212_spill] sm:$0xff] %v2801_v12  ;;  %v679_v7 = vsel %vm398_vm0, %v2455_v59, %v2119_v19 }
 0x257   :  { %1289 = vrot.lane.b32.xlu1 %v2717_v9, %s1984_s25  ;;  %1287 = vrot.lane.b32.xlu0 %v2720_v6, %s1984_s25  ;;  %v688_v59 = vsel %vm685_vm1, %v679_v7, %v2143_v27 }
 0x258   :  { %v696_v21 = vsel %vm416_vm2, %v688_v59, %v2479_v52 }
 0x259   :  { %v2805_v11 = vpop.permute.xlu1 %998  ;;  %v2807_v8 = vpop.permute.xlu0 %996 }
 0x25a   :  { %4442 = vst [vmem:[#allocation213_spill] sm:$0xff] %v2805_v11  ;;  %4443 = vst [vmem:[#allocation214_spill] sm:$0xff] %v2807_v8  ;;  %v677_v11 = vsel %vm398_vm0, %v2449_v62, %v2113_v17  ;;  %v680_v8 = vsel %vm398_vm0, %v2453_v58, %v2117_v18  ;;  %v687_v62 = vsel %vm685_vm1, %v678_v2, %v2135_v24 }
 0x25b   :  { %1293 = vrot.lane.b32.xlu1 %v2727_v3, %s1984_s25  ;;  %1291 = vrot.lane.b32.xlu0 %v2730_v1, %s1984_s25  ;;  %v686_v17 = vsel %vm685_vm1, %v677_v11, %v2137_v25  ;;  %v689_v58 = vsel %vm685_vm1, %v680_v8, %v2141_v26  ;;  %v691_v2 = vsel %vm685_vm1, %v682_v63, %v2147_v28 }
 0x25c   :  { %v684_v11 = vsel %vm398_vm0, %v2465_v57, %v2129_v22  ;;  %v695_v8 = vsel %vm416_vm2, %v687_v62, %v2471_v55  ;;  %v694_v7 = vsel %vm416_vm2, %v686_v17, %v2473_v54  ;;  %v697_v61 = vsel %vm416_vm2, %v689_v58, %v2477_v53 }
 0x25d   :  { %v2814_v13 = vpop.permute.xlu1 %1002  ;;  %v2816_v12 = vpop.permute.xlu0 %1000  ;;  %v699_v18 = vsel %vm416_vm2, %v691_v2, %v2483_v51  ;;  %v683_v17 = vsel %vm398_vm0, %v2467_v56, %v2131_v23  ;;  %v690_v57 = vsel %vm685_vm1, %v681_v60, %v2149_v29  ;;  %v693_v63 = vsel %vm685_vm1, %v684_v11, %v2153_v30  ;;  %v4487_v23 = vld [vmem:[#allocation164_spill] sm:$0xff] }
 0x25e   :  { %v703_v62 = vsel %vm4230_vm3, %v695_v8, %v2135_v24  ;;  %v702_v58 = vsel %vm4230_vm3, %v694_v7, %v2137_v25  ;;  %v705_v22 = vsel %vm4230_vm3, %v697_v61, %v2141_v26  ;;  %v704_v56 = vsel %vm4230_vm3, %v696_v21, %v2143_v27  ;;  %v4485_v26 = vld [vmem:[#allocation153_spill] sm:$0xff]  ;;  %v4486_v25 = vld [vmem:[#allocation163_spill] sm:$0xff] }
 0x25f   :  { %1297 = vrot.lane.b32.xlu1 %v2737_v5, %s1984_s25  ;;  %1295 = vrot.lane.b32.xlu0 %v2740_v4, %s1984_s25  ;;  %v707_v60 = vsel %vm4230_vm3, %v699_v18, %v2147_v28  ;;  %v698_v11 = vsel %vm416_vm2, %v690_v57, %v2485_v50  ;;  %v692_v8 = vsel %vm685_vm1, %v683_v17, %v2155_v31 }
 0x260   :  { %v701_v7 = vsel %vm416_vm2, %v693_v63, %v2489_v49  ;;  %v711_v21 = vsel %vm434_vm4, %v703_v62, %v2471_v55  ;;  %v710_v18 = vsel %vm434_vm4, %v702_v58, %v2473_v54  ;;  %v700_v61 = vsel %vm416_vm2, %v692_v8, %v2491_v48 }
 0x261   :  { %v2843_v20 = vpop.permute.xlu1 %1006  ;;  %v2845_v19 = vpop.permute.xlu0 %1004  ;;  %v713_v17 = vsel %vm434_vm4, %v705_v22, %v2477_v53  ;;  %v712_v57 = vsel %vm434_vm4, %v704_v56, %v2479_v52  ;;  %v715_v63 = vsel %vm434_vm4, %v707_v60, %v2483_v51  ;;  %v706_v28 = vsel %vm4230_vm3, %v698_v11, %v2149_v29 }
 0x262   :  { %v709_v54 = vsel %vm4230_vm3, %v701_v7, %v2153_v30  ;;  %v708_v22 = vsel %vm4230_vm3, %v700_v61, %v2155_v31  ;;  %v719_v52 = vsel %vm443_vm5, %v711_v21, %v2183_v40  ;;  %v718_v51 = vsel %vm443_vm5, %v710_v18, %v2185_v41  ;;  %v4481_v41 = vld [vmem:[#allocation151_spill] sm:$0xff]  ;;  %v4482_v31 = vld [vmem:[#allocation160_spill] sm:$0xff] }
 0x263   :  { %1309 = vrot.lane.b32.xlu1 %v2747_v10, %s1985_s26  ;;  %1307 = vrot.lane.b32.xlu0 %v2710_v0, %s1985_s26  ;;  %v714_v53 = vsel %vm434_vm4, %v706_v28, %v2485_v50  ;;  %v721_v62 = vsel %vm443_vm5, %v713_v17, %v2189_v42  ;;  %v720_v58 = vsel %vm443_vm5, %v712_v57, %v2191_v43  ;;  %v4483_v30 = vld [vmem:[#allocation152_spill] sm:$0xff] }
 0x264   :  { %v723_v56 = vsel %vm443_vm5, %v715_v63, %v2195_v44  ;;  %v717_v60 = vsel %vm434_vm4, %v709_v54, %v2489_v49  ;;  %v728_v11 = vsel %vm726_vm6, %v719_v52, %v2495_v39  ;;  %v727_v8 = vsel %vm726_vm6, %v718_v51, %v2497_v38 }
 0x265   :  { %v2877_v59 = vpop.permute.xlu1 %1018  ;;  %v2879_v2 = vpop.permute.xlu0 %1016  ;;  %v730_v28 = vsel %vm726_vm6, %v721_v62, %v2501_v37  ;;  %v716_v21 = vsel %vm434_vm4, %v708_v22, %v2491_v48  ;;  %v729_v18 = vsel %vm726_vm6, %v720_v58, %v2503_v36  ;;  %v732_v49 = vsel %vm726_vm6, %v723_v56, %v2507_v35 }
 0x266   :  { %v722_v61 = vsel %vm443_vm5, %v714_v53, %v2197_v45  ;;  %v736_v17 = vsel %vm461_vm7, %v728_v11, %v2747_v10  ;;  %v735_v48 = vsel %vm461_vm7, %v727_v8, %v2710_v0  ;;  %v738_v57 = vsel %vm461_vm7, %v730_v28, %v2717_v9 }
 0x267   :  { %1313 = vrot.lane.b32.xlu1 %v2717_v9, %s1985_s26  ;;  %1311 = vrot.lane.b32.xlu0 %v2720_v6, %s1985_s26  ;;  %v725_v63 = vsel %vm443_vm5, %v717_v60, %v2201_v46  ;;  %v737_v54 = vsel %vm461_vm7, %v729_v18, %v2720_v6  ;;  %v740_v22 = vsel %vm461_vm7, %v732_v49, %v2727_v3 }
 0x268   :  { %v731_v52 = vsel %vm726_vm6, %v722_v61, %v2509_v34  ;;  %v724_v51 = vsel %vm443_vm5, %v716_v21, %v2203_v47  ;;  %v734_v58 = vsel %vm726_vm6, %v725_v63, %v2513_v33  ;;  %v744_v60 = vsel %vm470_vm8, %v736_v17, %v2495_v39  ;;  %v4464_v47 = vld [vmem:[#allocation129_spill] sm:$0xff] }
 0x269   :  { %v2911_v27 = vpop.permute.xlu1 %1022  ;;  %v2913_v55 = vpop.permute.xlu0 %1020  ;;  %v733_v56 = vsel %vm726_vm6, %v724_v51, %v2515_v32  ;;  %v743_v11 = vsel %vm470_vm8, %v735_v48, %v2497_v38  ;;  %v746_v8 = vsel %vm470_vm8, %v738_v57, %v2501_v37  ;;  %v745_v28 = vsel %vm470_vm8, %v737_v54, %v2503_v36 }
 0x26a   :  { %4444 = vst [vmem:[#allocation215_spill] sm:$0xff] %v2911_v27  ;;  %4445 = vst [vmem:[#allocation216_spill] sm:$0xff] %v2913_v55  ;;  %v748_v21 = vsel %vm470_vm8, %v740_v22, %v2507_v35  ;;  %v739_v39 = vsel %vm461_vm7, %v731_v52, %v2730_v1  ;;  %v742_v37 = vsel %vm461_vm7, %v734_v58, %v2737_v5  ;;  %v4450_v52 = vld [vmem:[#allocation125_spill] sm:$0xff]  ;;  %v4451_v58 = vld [vmem:[#allocation126_spill] sm:$0xff] }
 0x26b   :  { %1317 = vrot.lane.b32.xlu1 %v2727_v3, %s1985_s26  ;;  %1315 = vrot.lane.b32.xlu0 %v2730_v1, %s1985_s26  ;;  %v741_v38 = vsel %vm461_vm7, %v733_v56, %v2740_v4  ;;  %v752_v36 = vsel %vm479_vm9, %v744_v60, %v2747_v10  ;;  %v751_v35 = vsel %vm479_vm9, %v743_v11, %v2710_v0  ;;  %v4452_v60 = vld [vmem:[#allocation127_spill] sm:$0xff]  ;;  %v4494_v27 = vld [vmem:[#allocation169_spill] sm:$0xff] }
 0x26c   :  { %v754_v61 = vsel %vm479_vm9, %v746_v8, %v2717_v9  ;;  %v747_v17 = vsel %vm470_vm8, %v739_v39, %v2509_v34  ;;  %v753_v48 = vsel %vm479_vm9, %v745_v28, %v2720_v6  ;;  %v756_v57 = vsel %vm479_vm9, %v748_v21, %v2727_v3  ;;  %v4453_v8 = vld [vmem:[#allocation131_spill] sm:$0xff] }
 0x26d   :  { %v2943_v50 = vpop.permute.xlu1 %1026  ;;  %v2945_v7 = vpop.permute.xlu0 %1024  ;;  %v750_v63 = vsel %vm470_vm8, %v742_v37, %v2513_v33  ;;  %v749_v54 = vsel %vm470_vm8, %v741_v38, %v2515_v32  ;;  %v760_v34 = vsel %vm488_vm10, %v752_v36, %v2519_v15  ;;  %v759_v22 = vsel %vm488_vm10, %v751_v35, %v2521_v14  ;;  %v4454_v15 = vld [vmem:[#allocation132_spill] sm:$0xff]  ;;  %v4455_v14 = vld [vmem:[#allocation133_spill] sm:$0xff]  ;;  %v4456_v37 = vld [vmem:[#allocation134_spill] sm:$0xff] }
 0x26e   :  { %4446 = vst [vmem:[#allocation217_spill] sm:$0xff] %v2943_v50  ;;  %4447 = vst [vmem:[#allocation218_spill] sm:$0xff] %v2945_v7  ;;  %v762_v51 = vsel %vm488_vm10, %v754_v61, %v4450_v52  ;;  %v761_v56 = vsel %vm488_vm10, %v753_v48, %v4451_v58  ;;  %v764_v11 = vsel %vm488_vm10, %v756_v57, %v4452_v60  ;;  %v4457_v36 = vld [vmem:[#allocation135_spill] sm:$0xff]  ;;  %v4459_v57 = vld [vmem:[#allocation140_spill] sm:$0xff] }
 0x26f   :  { %1321 = vrot.lane.b32.xlu1 %v2737_v5, %s1985_s26  ;;  %1319 = vrot.lane.b32.xlu0 %v2740_v4, %s1985_s26  ;;  %v769_v33 = vsel %vm767_vm11, %v760_v34, %v4453_v8  ;;  %v768_v21 = vsel %vm767_vm11, %v759_v22, %v4454_v15  ;;  %v771_v39 = vsel %vm767_vm11, %v762_v51, %v4455_v14  ;;  %v4458_v61 = vld [vmem:[#allocation139_spill] sm:$0xff]  ;;  %v4460_v52 = vld [vmem:[#allocation141_spill] sm:$0xff]  ;;  %v4492_v7 = vld [vmem:[#allocation154_spill] sm:$0xff] }
 0x270   :  { %v770_v38 = vsel %vm767_vm11, %v761_v56, %v4456_v37  ;;  %v773_v35 = vsel %vm767_vm11, %v764_v11, %v4457_v36  ;;  %v777_v48 = vsel %vm506_vm12, %v769_v33, %v4458_v61  ;;  %v776_v34 = vsel %vm506_vm12, %v768_v21, %v4459_v57  ;;  %v4461_v56 = vld [vmem:[#allocation142_spill] sm:$0xff]  ;;  %v4462_v11 = vld [vmem:[#allocation143_spill] sm:$0xff]  ;;  %v4463_v21 = vld [vmem:[#allocation128_spill] sm:$0xff] }
 0x271   :  { %v2975_v53 = vpop.permute.xlu1 %1030  ;;  %v2977_v62 = vpop.permute.xlu0 %1028  ;;  %v779_v58 = vsel %vm506_vm12, %v771_v39, %v4460_v52  ;;  %v755_v22 = vsel %vm479_vm9, %v747_v17, %v2730_v1  ;;  %v758_v51 = vsel %vm479_vm9, %v750_v63, %v2737_v5  ;;  %v778_v60 = vsel %vm506_vm12, %v770_v38, %v4461_v56  ;;  %v4465_v63 = vld [vmem:[#allocation136_spill] sm:$0xff] }
 0x272   :  { %4448 = vst [vmem:[#allocation219_spill] sm:$0xff] %v2975_v53  ;;  %4449 = vst [vmem:[#allocation220_spill] sm:$0xff] %v2977_v62  ;;  %v781_v33 = vsel %vm506_vm12, %v773_v35, %v4462_v11  ;;  %v763_v39 = vsel %vm488_vm10, %v755_v22, %v4463_v21  ;;  %v766_v46 = vsel %vm488_vm10, %v758_v51, %v4464_v47  ;;  %v4466_v47 = vld [vmem:[#allocation144_spill] sm:$0xff]  ;;  %v4490_v53 = vld [vmem:[#allocation167_spill] sm:$0xff] }
 0x273   :  { %1333 = vrot.lane.b32.xlu1 %v2747_v10, %s1986_s27  ;;  %1331 = vrot.lane.b32.xlu0 %v2710_v0, %s1986_s27  ;;  %v757_v45 = vsel %vm479_vm9, %v749_v54, %v2740_v4  ;;  %v772_v38 = vsel %vm767_vm11, %v763_v39, %v4465_v63  ;;  %v785_v35 = vsel %vm515_vm13, %v777_v48, %v4453_v8  ;;  %v4467_v48 = vld [vmem:[#allocation130_spill] sm:$0xff]  ;;  %v4493_v50 = vld [vmem:[#allocation168_spill] sm:$0xff] }
 0x274   :  { %v784_v43 = vsel %vm515_vm13, %v776_v34, %v4454_v15  ;;  %v787_v22 = vsel %vm515_vm13, %v779_v58, %v4455_v14  ;;  %v780_v51 = vsel %vm506_vm12, %v772_v38, %v4466_v47  ;;  %v786_v54 = vsel %vm515_vm13, %v778_v60, %v4456_v37  ;;  %v4468_v34 = vld [vmem:[#allocation137_spill] sm:$0xff]  ;;  %v4469_v58 = vld [vmem:[#allocation138_spill] sm:$0xff] }
 0x275   :  { %v3003_v18 = vpop.permute.xlu1 %1165  ;;  %v3005_v49 = vpop.permute.xlu0 %1163  ;;  %v789_v8 = vsel %vm515_vm13, %v781_v33, %v4457_v36  ;;  %v765_v15 = vsel %vm488_vm10, %v757_v45, %v4467_v48  ;;  %v775_v14 = vsel %vm767_vm11, %v766_v46, %v4468_v34  ;;  %v3109_v37 = vsel %vm4233_vm15, %v785_v35, %v4458_v61  ;;  %v4470_v46 = vld [vmem:[#allocation145_spill] sm:$0xff]  ;;  %v4472_v35 = vld [vmem:[#allocation155_spill] sm:$0xff] }
 0x276   :  { %v774_v21 = vsel %vm767_vm11, %v765_v15, %v4469_v58  ;;  %v3113_v36 = vsel %vm4233_vm15, %v784_v43, %v4459_v57  ;;  %v3117_v45 = vsel %vm4233_vm15, %v787_v22, %v4460_v52  ;;  %v783_v60 = vsel %vm506_vm12, %v775_v14, %v4470_v46  ;;  %v4471_v43 = vld [vmem:[#allocation146_spill] sm:$0xff]  ;;  %v4473_v52 = vld [vmem:[#allocation147_spill] sm:$0xff]  ;;  %v4474_v15 = vld [vmem:[#allocation156_spill] sm:$0xff] }
 0x277   :  { %1337 = vrot.lane.b32.xlu1 %v2717_v9, %s1986_s27  ;;  %1335 = vrot.lane.b32.xlu0 %v2720_v6, %s1986_s27  ;;  %v3123_v33 = vsel %vm4233_vm15, %v786_v54, %v4461_v56  ;;  %v3127_v48 = vsel %vm4233_vm15, %v789_v8, %v4462_v11  ;;  %v788_v61 = vsel %vm515_vm13, %v780_v51, %v4465_v63  ;;  %v4475_v14 = vld [vmem:[#allocation148_spill] sm:$0xff]  ;;  %v4476_v56 = vld [vmem:[#allocation157_spill] sm:$0xff]  ;;  %v4478_v51 = vld [vmem:[#allocation158_spill] sm:$0xff] }
 0x278   :  { %v782_v57 = vsel %vm506_vm12, %v774_v21, %v4471_v43  ;;  %v1042_v22 = vsel %vm1040_vm14, %v4473_v52, %v4472_v35  ;;  %v1041_v42 = vsel %vm1040_vm14, %v4475_v14, %v4474_v15  ;;  %v4477_v11 = vld [vmem:[#allocation149_spill] sm:$0xff]  ;;  %v4479_v54 = vld [vmem:[#allocation150_spill] sm:$0xff]  ;;  %v4480_v21 = vld [vmem:[#allocation159_spill] sm:$0xff]  ;;  %v1045_v29 = vsel %vm1040_vm14, %v4483_v30, %v4482_v31 }
 0x279   :  { %v3039_v28 = vpop.permute.xlu1 %1169  ;;  %v3041_v32 = vpop.permute.xlu0 %1167  ;;  %v1044_v63 = vsel %vm1040_vm14, %v4477_v11, %v4476_v56  ;;  %v1043_v8 = vsel %vm1040_vm14, %v4479_v54, %v4478_v51  ;;  %v1046_v40 = vsel %vm1040_vm14, %v4481_v41, %v4480_v21  ;;  %v1050_v24 = vsel %vm685_vm1, %v1042_v22, %v4486_v25  ;;  %v4488_v11 = vld [vmem:[#allocation165_spill] sm:$0xff]  ;;  %v4489_v41 = vld [vmem:[#allocation166_spill] sm:$0xff] }
 0x27a   :  { %v1049_v16 = vsel %vm685_vm1, %v1041_v42, %v4487_v23  ;;  %v1052_v54 = vsel %vm685_vm1, %v1044_v63, %v4488_v11  ;;  %v1051_v62 = vsel %vm685_vm1, %v1043_v8, %v4489_v41  ;;  %v1054_v30 = vsel %vm685_vm1, %v1046_v40, %v4490_v53  ;;  %v4491_v42 = vld [vmem:[#allocation162_spill] sm:$0xff] }
 0x27b   :  { %1341 = vrot.lane.b32.xlu1 %v2727_v3, %s1986_s27  ;;  %1339 = vrot.lane.b32.xlu0 %v2730_v1, %s1986_s27  ;;  %v1047_v63 = vsel %vm1040_vm14, %v4492_v7, %v4491_v42  ;;  %v1053_v55 = vsel %vm685_vm1, %v1045_v29, %v4493_v50  ;;  %v4495_v40 = vld [vmem:[#allocation170_spill] sm:$0xff]  ;;  %v790_v29 = vsel %vm515_vm13, %v782_v57, %v4469_v58 }
 0x27d   :  { %v3075_v17 = vpop.permute.xlu1 %1173  ;;  %v3077_v44 = vpop.permute.xlu0 %1171 }
 0x27f   :  { %1345 = vrot.lane.b32.xlu1 %v2737_v5, %s1986_s27  ;;  %1343 = vrot.lane.b32.xlu0 %v2740_v4, %s1986_s27 }
 0x281   :  { %v3103_v39 = vpop.permute.xlu1 %1177  ;;  %v3105_v38 = vpop.permute.xlu0 %1175 }
 0x283   :  { %1357 = vrot.lane.b32.xlu1 %v2747_v10, %s1987_s28  ;;  %1355 = vrot.lane.b32.xlu0 %v2710_v0, %s1987_s28  ;;  %v4484_v10 = vld [vmem:[#allocation161_spill] sm:$0xff] }
 0x284   :  { %v1048_v0 = vsel %vm1040_vm14, %v4485_v26, %v4484_v10  ;;  %vm407_vm14 = vcmask 15360  }
 0x285   :  { %v1190_v14 = vpop.permute.xlu1 %1189  ;;  %v1188_v52 = vpop.permute.xlu0 %1187  ;;  %v1056_v8 = vsel %vm685_vm1, %v1048_v0, %v4494_v27  ;;  %v1062_v0 = vsel %vm416_vm2, %v1054_v30, %v4480_v21  ;;  %v3223_v30 = vsel %vm4233_vm15, %v788_v61, %v4466_v47 }
 0x286   :  { %v3170_v26 = vsel %vm398_vm0, %v3003_v18, %v1190_v14  ;;  %v3174_v22 = vsel %vm398_vm0, %v3005_v49, %v1188_v52  ;;  %v1055_v18 = vsel %vm685_vm1, %v1047_v63, %v4495_v40  ;;  %v1058_v49 = vsel %vm416_vm2, %v1050_v24, %v4472_v35 }
 0x287   :  { %1361 = vrot.lane.b32.xlu1 %v2717_v9, %s1987_s28  ;;  %1359 = vrot.lane.b32.xlu0 %v2720_v6, %s1987_s28  ;;  %v791_v52 = vsel %vm515_vm13, %v783_v60, %v4468_v34  ;;  %v1057_v14 = vsel %vm416_vm2, %v1049_v16, %v4474_v15  ;;  %v1060_v9 = vsel %vm416_vm2, %v1052_v54, %v4476_v56  ;;  %vm1081_vm1 = vcmask 162816  }
 0x288   :  { %v1059_v6 = vsel %vm416_vm2, %v1051_v62, %v4478_v51  ;;  %v1061_v34 = vsel %vm416_vm2, %v1053_v55, %v4482_v31  ;;  %v1064_v58 = vsel %vm416_vm2, %v1056_v8, %v4484_v10  ;;  %v1063_v62 = vsel %vm416_vm2, %v1055_v18, %v4491_v42  ;;  %v4496_v18 = vld [vmem:[#allocation171_spill] sm:$0xff] }
 0x289   :  { %v1194_v63 = vpop.permute.xlu1 %1193  ;;  %v1192_v24 = vpop.permute.xlu0 %1191  ;;  %v3227_v55 = vsel %vm4233_vm15, %v791_v52, %v4470_v46  ;;  %v1067_v47 = vsel %vm4230_vm3, %v1059_v6, %v4489_v41  ;;  %v1070_v46 = vsel %vm4230_vm3, %v1062_v0, %v4490_v53  ;;  %v1069_v61 = vsel %vm4230_vm3, %v1061_v34, %v4493_v50  ;;  %v4498_v6 = vld [vmem:[#allocation173_spill] sm:$0xff]  ;;  %v4501_v34 = vld [vmem:[#allocation180_spill] sm:$0xff] }
 0x28a   :  { %v3209_v16 = vsel %vm398_vm0, %v3039_v28, %v1194_v63  ;;  %v3213_v60 = vsel %vm398_vm0, %v3041_v32, %v1192_v24  ;;  %v1066_v28 = vsel %vm4230_vm3, %v1058_v49, %v4486_v25  ;;  %v1065_v32 = vsel %vm4230_vm3, %v1057_v14, %v4487_v23  ;;  %v4497_v14 = vld [vmem:[#allocation172_spill] sm:$0xff]  ;;  %v4499_v63 = vld [vmem:[#allocation179_spill] sm:$0xff] }
 0x28b   :  { %1365 = vrot.lane.b32.xlu1 %v2727_v3, %s1987_s28  ;;  %1363 = vrot.lane.b32.xlu0 %v2730_v1, %s1987_s28  ;;  %v1068_v3 = vsel %vm4230_vm3, %v1060_v9, %v4488_v11  ;;  %v3237_v1 = vsel %vm4233_vm15, %v790_v29, %v4471_v43  ;;  %v1072_v57 = vsel %vm4230_vm3, %v1064_v58, %v4494_v27 }
 0x28c   :  { %v1074_v49 = vsel %vm434_vm4, %v1066_v28, %v4496_v18  ;;  %v1071_v43 = vsel %vm4230_vm3, %v1063_v62, %v4495_v40  ;;  %v1073_v9 = vsel %vm434_vm4, %v1065_v32, %v4497_v14  ;;  %v1076_v0 = vsel %vm434_vm4, %v1068_v3, %v4498_v6  ;;  %v4502_v62 = vld [vmem:[#allocation181_spill] sm:$0xff]  ;;  %v4503_v32 = vld [vmem:[#allocation187_spill] sm:$0xff]  ;;  %v4505_v18 = vld [vmem:[#allocation176_spill] sm:$0xff] }
 0x28d   :  { %v1198_v54 = vpop.permute.xlu1 %1197  ;;  %v1196_v8 = vpop.permute.xlu0 %1195  ;;  %v1083_v24 = vsel %vm1081_vm1, %v1074_v49, %v4499_v63  ;;  %v1082_v58 = vsel %vm1081_vm1, %v1073_v9, %v4501_v34  ;;  %v1085_v28 = vsel %vm1081_vm1, %v1076_v0, %v4502_v62  ;;  %v4506_v49 = vld [vmem:[#allocation188_spill] sm:$0xff]  ;;  %v4507_v14 = vld [vmem:[#allocation189_spill] sm:$0xff]  ;;  %v4509_v40 = vld [vmem:[#allocation178_spill] sm:$0xff]  ;;  %vm1122_vm3 = vcmask 261120  }
 0x28e   :  { %v3253_v52 = vsel %vm398_vm0, %v3075_v17, %v1198_v54  ;;  %v3257_v29 = vsel %vm398_vm0, %v3077_v44, %v1196_v8  ;;  %v4500_v17 = vld [vmem:[#allocation174_spill] sm:$0xff]  ;;  %v1091_v3 = vsel %vm726_vm6, %v1083_v24, %v4503_v32  ;;  %v4504_v54 = vld [vmem:[#allocation175_spill] sm:$0xff]  ;;  %v1079_v24 = vsel %vm434_vm4, %v1071_v43, %v4509_v40 }
 0x28f   :  { %1369 = vrot.lane.b32.xlu1 %v2737_v5, %s1987_s28  ;;  %1367 = vrot.lane.b32.xlu0 %v2740_v4, %s1987_s28  ;;  %v1075_v44 = vsel %vm434_vm4, %v1067_v47, %v4500_v17  ;;  %v1078_v8 = vsel %vm434_vm4, %v1070_v46, %v4504_v54  ;;  %v1077_v5 = vsel %vm434_vm4, %v1069_v61, %v4505_v18  ;;  %v4508_v17 = vld [vmem:[#allocation177_spill] sm:$0xff] }
 0x290   :  { %v1090_v4 = vsel %vm726_vm6, %v1082_v58, %v4506_v49  ;;  %v1093_v47 = vsel %vm726_vm6, %v1085_v28, %v4507_v14  ;;  %v1080_v0 = vsel %vm434_vm4, %v1072_v57, %v4508_v17  ;;  %v4510_v58 = vld [vmem:[#allocation182_spill] sm:$0xff]  ;;  %v4511_v28 = vld [vmem:[#allocation183_spill] sm:$0xff]  ;;  %v1099_v57 = vsel %vm461_vm7, %v1091_v3, %v4499_v63  ;;  %v4514_v3 = vld [vmem:[#allocation185_spill] sm:$0xff] }
 0x291   :  { %v1202_v6 = vpop.permute.xlu1 %1201  ;;  %v1200_v9 = vpop.permute.xlu0 %1199  ;;  %v1084_v54 = vsel %vm1081_vm1, %v1075_v44, %v4510_v58  ;;  %v1087_v18 = vsel %vm1081_vm1, %v1078_v8, %v4511_v28  ;;  %v1098_v40 = vsel %vm461_vm7, %v1090_v4, %v4501_v34  ;;  %v1101_v43 = vsel %vm461_vm7, %v1093_v47, %v4502_v62  ;;  %v4513_v44 = vld [vmem:[#allocation190_spill] sm:$0xff]  ;;  %v4517_v17 = vld [vmem:[#allocation192_spill] sm:$0xff]  ;;  %v4518_v4 = vld [vmem:[#allocation193_spill] sm:$0xff] }
 0x292   :  { %v3291_v46 = vsel %vm398_vm0, %v3103_v39, %v1202_v6  ;;  %v3295_v61 = vsel %vm398_vm0, %v3105_v38, %v1200_v9  ;;  %v4512_v39 = vld [vmem:[#allocation184_spill] sm:$0xff]  ;;  %v1092_v63 = vsel %vm726_vm6, %v1084_v54, %v4513_v44  ;;  %v1089_v8 = vsel %vm1081_vm1, %v1080_v0, %v4514_v3  ;;  %v4515_v6 = vld [vmem:[#allocation186_spill] sm:$0xff]  ;;  %v4516_v9 = vld [vmem:[#allocation191_spill] sm:$0xff] }
 0x293   :  { %1481 = vrot.lane.b32.xlu1 %v3109_v37, %s1988_s29  ;;  %1479 = vrot.lane.b32.xlu0 %v3113_v36, %s1988_s29  ;;  %v1086_v38 = vsel %vm1081_vm1, %v1077_v5, %v4512_v39  ;;  %v1088_v37 = vsel %vm1081_vm1, %v1079_v24, %v4515_v6  ;;  %v1095_v36 = vsel %vm726_vm6, %v1087_v18, %v4516_v9  ;;  %vm452_vm1 = vcmask 113664  }
 0x294   :  { %v1094_v5 = vsel %vm726_vm6, %v1086_v38, %v4517_v17  ;;  %v1107_v62 = vsel %vm470_vm8, %v1099_v57, %v4503_v32  ;;  %v1097_v47 = vsel %vm726_vm6, %v1089_v8, %v4518_v4  ;;  %v1106_v54 = vsel %vm470_vm8, %v1098_v40, %v4506_v49  ;;  %v4520_v57 = vld [vmem:[#allocation196_spill] sm:$0xff]  ;;  %v4521_v38 = vld [vmem:[#allocation194_spill] sm:$0xff]  ;;  %v4522_v40 = vld [vmem:[#allocation203_spill] sm:$0xff] }
 0x295   :  { %v1214_v27 = vpop.permute.xlu1 %1213  ;;  %v1212_v34 = vpop.permute.xlu0 %1211  ;;  %v1109_v18 = vsel %vm470_vm8, %v1101_v43, %v4507_v14  ;;  %v1100_v32 = vsel %vm461_vm7, %v1092_v63, %v4510_v58  ;;  %v1114_v14 = vsel %vm479_vm9, %v1106_v54, %v4520_v57  ;;  %v1105_v58 = vsel %vm461_vm7, %v1097_v47, %v4514_v3  ;;  %v4523_v43 = vld [vmem:[#allocation204_spill] sm:$0xff]  ;;  %v4524_v8 = vld [vmem:[#allocation211_spill] sm:$0xff]  ;;  %v4530_v57 = vld [vmem:[#allocation213_spill] sm:$0xff] }
 0x296   :  { %v3329_v0 = vsel %vm407_vm14, %v3170_v26, %v1214_v27  ;;  %v3333_v24 = vsel %vm407_vm14, %v3174_v22, %v1212_v34  ;;  %v1103_v26 = vsel %vm461_vm7, %v1095_v36, %v4511_v28  ;;  %v1102_v27 = vsel %vm461_vm7, %v1094_v5, %v4512_v39  ;;  %v4519_v22 = vld [vmem:[#allocation195_spill] sm:$0xff]  ;;  %v4525_v5 = vld [vmem:[#allocation212_spill] sm:$0xff] }
 0x297   :  { %1485 = vrot.lane.b32.xlu1 %v3117_v45, %s1988_s29  ;;  %1483 = vrot.lane.b32.xlu0 %v3123_v33, %s1988_s29  ;;  %v1115_v49 = vsel %vm479_vm9, %v1107_v62, %v4519_v22  ;;  %v1096_v45 = vsel %vm726_vm6, %v1088_v37, %v4521_v38  ;;  %v1123_v28 = vsel %vm1122_vm3, %v1114_v14, %v4523_v43  ;;  %v4526_v22 = vld [vmem:[#allocation197_spill] sm:$0xff]  ;;  %v4531_v14 = vld [vmem:[#allocation214_spill] sm:$0xff]  ;;  %vm1395_vm6 = vcmask 23552  }
 0x298   :  { %v1124_v33 = vsel %vm1122_vm3, %v1115_v49, %v4522_v40  ;;  %v1131_v34 = vsel %vm767_vm11, %v1123_v28, %v4525_v5  ;;  %v1108_v62 = vsel %vm470_vm8, %v1100_v32, %v4513_v44  ;;  %v1111_v47 = vsel %vm470_vm8, %v1103_v26, %v4516_v9  ;;  %v4527_v32 = vld [vmem:[#allocation198_spill] sm:$0xff]  ;;  %v4528_v26 = vld [vmem:[#allocation205_spill] sm:$0xff]  ;;  %v4532_v28 = vld [vmem:[#allocation199_spill] sm:$0xff] }
 0x299   :  { %v1218_v63 = vpop.permute.xlu1 %1217  ;;  %v1216_v39 = vpop.permute.xlu0 %1215  ;;  %v1132_v36 = vsel %vm767_vm11, %v1124_v33, %v4524_v8  ;;  %v1110_v54 = vsel %vm470_vm8, %v1102_v27, %v4517_v17  ;;  %v1117_v44 = vsel %vm479_vm9, %v1109_v18, %v4526_v22  ;;  %v1116_v9 = vsel %vm479_vm9, %v1108_v62, %v4527_v32  ;;  %v4529_v27 = vld [vmem:[#allocation206_spill] sm:$0xff] }
 0x29a   :  { %v3367_v3 = vsel %vm407_vm14, %v3209_v16, %v1218_v63  ;;  %v3371_v37 = vsel %vm407_vm14, %v3213_v60, %v1216_v39  ;;  %v1113_v16 = vsel %vm470_vm8, %v1105_v58, %v4518_v4  ;;  %v1104_v60 = vsel %vm461_vm7, %v1096_v45, %v4515_v6  ;;  %v4533_v63 = vld [vmem:[#allocation200_spill] sm:$0xff] }
 0x29b   :  { %1489 = vrot.lane.b32.xlu1 %v3127_v48, %s1988_s29  ;;  %1487 = vrot.lane.b32.xlu0 %v3223_v30, %s1988_s29  ;;  %v1126_v17 = vsel %vm1122_vm3, %v1117_v44, %v4528_v26  ;;  %v1125_v48 = vsel %vm1122_vm3, %v1116_v9, %v4529_v27  ;;  %v1140_v30 = vsel %vm506_vm12, %v1132_v36, %v4522_v40  ;;  %v4534_v36 = vld [vmem:[#allocation207_spill] sm:$0xff]  ;;  %v4536_v9 = vld [vmem:[#allocation201_spill] sm:$0xff] }
 0x29c   :  { %v1139_v4 = vsel %vm506_vm12, %v1131_v34, %v4523_v43  ;;  %v1134_v18 = vsel %vm767_vm11, %v1126_v17, %v4530_v57  ;;  %v1133_v58 = vsel %vm767_vm11, %v1125_v48, %v4531_v14  ;;  %v1112_v40 = vsel %vm470_vm8, %v1104_v60, %v4521_v38  ;;  %v4535_v34 = vld [vmem:[#allocation208_spill] sm:$0xff]  ;;  %v4537_v17 = vld [vmem:[#allocation202_spill] sm:$0xff] }
 0x29d   :  { %v1222_v49 = vpop.permute.xlu1 %1221  ;;  %v1220_v6 = vpop.permute.xlu0 %1219  ;;  %v1119_v43 = vsel %vm479_vm9, %v1111_v47, %v4532_v28  ;;  %v1118_v39 = vsel %vm479_vm9, %v1110_v54, %v4533_v63  ;;  %v1148_v38 = vsel %vm515_vm13, %v1140_v30, %v4524_v8  ;;  %v1147_v62 = vsel %vm515_vm13, %v1139_v4, %v4525_v5  ;;  %v4539_v48 = vld [vmem:[#allocation210_spill] sm:$0xff]  ;;  %v4541_v28 = vld [vmem:[#allocation216_spill] sm:$0xff] }
 0x29e   :  { %v1392_v45 = vsel %vm407_vm14, %v3253_v52, %v1222_v49  ;;  %v1391_v33 = vsel %vm407_vm14, %v3257_v29, %v1220_v6  ;;  %v1128_v52 = vsel %vm1122_vm3, %v1119_v43, %v4534_v36  ;;  %v1127_v29 = vsel %vm1122_vm3, %v1118_v39, %v4535_v34 }
 0x29f   :  { %1493 = vrot.lane.b32.xlu1 %v3227_v55, %s1988_s29  ;;  %1491 = vrot.lane.b32.xlu0 %v3237_v1, %s1988_s29  ;;  %v1142_v47 = vsel %vm506_vm12, %v1134_v18, %v4528_v26  ;;  %v1141_v55 = vsel %vm506_vm12, %v1133_v58, %v4529_v27  ;;  %v1136_v1 = vsel %vm767_vm11, %v1128_v52, %v2814_v13 }
 0x2a0   :  { %v1135_v54 = vsel %vm767_vm11, %v1127_v29, %v2816_v12  ;;  %v1156_v8 = vsel %vm4233_vm15, %v1148_v38, %v2877_v59  ;;  %v1155_v5 = vsel %vm4233_vm15, %v1147_v62, %v2879_v2  ;;  %v1121_v26 = vsel %vm479_vm9, %v1113_v16, %v4536_v9  ;;  %v4538_v59 = vld [vmem:[#allocation209_spill] sm:$0xff]  ;;  %v4543_v62 = vld [vmem:[#allocation218_spill] sm:$0xff] }
 0x2a1   :  { %v1226_v60 = vpop.permute.xlu1 %1225  ;;  %v1224_v22 = vpop.permute.xlu0 %1223  ;;  %v1120_v27 = vsel %vm479_vm9, %v1112_v40, %v4537_v17  ;;  %v1130_v2 = vsel %vm1122_vm3, %v1121_v26, %v4538_v59  ;;  %v1149_v16 = vsel %vm515_vm13, %v1141_v55, %v4531_v14  ;;  %v1144_v30 = vsel %vm506_vm12, %v1136_v1, %v4534_v36  ;;  %v4540_v40 = vld [vmem:[#allocation215_spill] sm:$0xff] }
 0x2a2   :  { %v1394_v44 = vsel %vm407_vm14, %v3291_v46, %v1226_v60  ;;  %v1393_v32 = vsel %vm407_vm14, %v3295_v61, %v1224_v22  ;;  %v1129_v46 = vsel %vm1122_vm3, %v1120_v27, %v4539_v48  ;;  %v1150_v61 = vsel %vm515_vm13, %v1142_v47, %v4530_v57  ;;  %v4544_v22 = vld [vmem:[#allocation219_spill] sm:$0xff] }
 0x2a3   :  { %1513 = vrot.lane.b32.xlu1 %v1156_v8, %s1989_s30  ;;  %1511 = vrot.lane.b32.xlu0 %v1155_v5, %s1989_s30  ;;  %v1143_v4 = vsel %vm506_vm12, %v1135_v54, %v4535_v34  ;;  %v1138_v49 = vsel %vm767_vm11, %v1130_v2, %v2843_v20  ;;  %v1137_v6 = vsel %vm767_vm11, %v1129_v46, %v2845_v19  ;;  %v4545_v5 = vld [vmem:[#allocation220_spill] sm:$0xff]  ;;  %vm1404_vm3 = vcmask 31744  }
 0x2a4   :  { %v1158_v57 = vsel %vm4233_vm15, %v1150_v61, %v4540_v40  ;;  %v1157_v14 = vsel %vm4233_vm15, %v1149_v16, %v4541_v28  ;;  %v1152_v39 = vsel %vm515_vm13, %v1144_v30, %v2814_v13  ;;  %v1151_v36 = vsel %vm515_vm13, %v1143_v4, %v2816_v12 }
 0x2a5   :  { %v1238_v18 = vpop.permute.xlu1 %1237  ;;  %v1236_v58 = vpop.permute.xlu0 %1235  ;;  %v1146_v52 = vsel %vm506_vm12, %v1138_v49, %v4538_v59  ;;  %v1159_v47 = vsel %vm4233_vm15, %v1151_v36, %v4543_v62  ;;  %vm1437_vm11 = vcmask 121856  }
 0x2a6   :  { %v3469_v43 = vsel %vm1395_vm6, %v3329_v0, %v1238_v18  ;;  %v3473_v63 = vsel %vm1395_vm6, %v3333_v24, %v1236_v58  ;;  %v1145_v0 = vsel %vm506_vm12, %v1137_v6, %v4539_v48  ;;  %v4542_v24 = vld [vmem:[#allocation217_spill] sm:$0xff]  ;;  %v1154_v55 = vsel %vm515_vm13, %v1146_v52, %v2843_v20 }
 0x2a7   :  { %1517 = vrot.lane.b32.xlu1 %v1158_v57, %s1989_s30  ;;  %1515 = vrot.lane.b32.xlu0 %v1157_v14, %s1989_s30  ;;  %v1160_v38 = vsel %vm4233_vm15, %v1152_v39, %v4542_v24  ;;  %v1153_v1 = vsel %vm515_vm13, %v1145_v0, %v2845_v19  ;;  %v1162_v8 = vsel %vm4233_vm15, %v1154_v55, %v4544_v22 }
 0x2a9   :  { %v1242_v34 = vpop.permute.xlu1 %1241  ;;  %v1240_v29 = vpop.permute.xlu0 %1239 }
 0x2aa   :  { %v1399_v13 = vsel %vm1395_vm6, %v3367_v3, %v1242_v34  ;;  %v1398_v12 = vsel %vm1395_vm6, %v3371_v37, %v1240_v29  ;;  %v1161_v3 = vsel %vm4233_vm15, %v1153_v1, %v4545_v5 }
 0x2ab   :  { %1521 = vrot.lane.b32.xlu1 %v1160_v38, %s1989_s30  ;;  %1519 = vrot.lane.b32.xlu0 %v1159_v47, %s1989_s30 }
 0x2ad   :  { %v1246_v54 = vpop.permute.xlu1 %1245  ;;  %v1244_v60 = vpop.permute.xlu0 %1243 }
 0x2ae   :  { %v1401_v37 = vsel %vm1395_vm6, %v1392_v45, %v1246_v54  ;;  %v1400_v9 = vsel %vm1395_vm6, %v1391_v33, %v1244_v60 }
 0x2af   :  { %1525 = vrot.lane.b32.xlu1 %v1162_v8, %s1989_s30  ;;  %1523 = vrot.lane.b32.xlu0 %v1161_v3, %s1989_s30 }
 0x2b1   :  { %v1250_v20 = vpop.permute.xlu1 %1249  ;;  %v1248_v26 = vpop.permute.xlu0 %1247 }
 0x2b2   :  { %v3508_v19 = vsel %vm1395_vm6, %v1394_v44, %v1250_v20  ;;  %v3511_v17 = vsel %vm1395_vm6, %v1393_v32, %v1248_v26  ;;  %vm4232_vm6 = vcmask 130048  }
 0x2b5   :  { %v1262_v27 = vpop.permute.xlu1 %1261  ;;  %v1260_v59 = vpop.permute.xlu0 %1259 }
 0x2b6   :  { %v1406_v1 = vsel %vm1404_vm3, %v3469_v43, %v1262_v27  ;;  %v1405_v54 = vsel %vm1404_vm3, %v3473_v63, %v1260_v59 }
 0x2b9   :  { %v1266_v2 = vpop.permute.xlu1 %1265  ;;  %v1264_v48 = vpop.permute.xlu0 %1263 }
 0x2ba   :  { %v1408_v3 = vsel %vm1404_vm3, %v1399_v13, %v1266_v2  ;;  %v1407_v20 = vsel %vm1404_vm3, %v1398_v12, %v1264_v48  ;;  %v4546_v2 = vld [vmem:[#allocation147_spill] sm:$0xff]  ;;  %v4547_v48 = vld [vmem:[#allocation148_spill] sm:$0xff] }
 0x2bd   :  { %v1270_v46 = vpop.permute.xlu1 %1269  ;;  %v1268_v45 = vpop.permute.xlu0 %1267 }
 0x2be   :  { %v1410_v59 = vsel %vm1404_vm3, %v1401_v37, %v1270_v46 }
 0x2c1   :  { %v1274_v61 = vpop.permute.xlu1 %1273  ;;  %v3513_v33 = vpop.permute.xlu0 %1271 }
 0x2c5   :  { %v1286_v16 = vpop.permute.xlu1 %1285  ;;  %v1284_v30 = vpop.permute.xlu0 %1283 }
 0x2c6   :  { %v1414_v60 = vsel %vm434_vm4, %v1406_v1, %v1286_v16  ;;  %v1413_v22 = vsel %vm434_vm4, %v1405_v54, %v1284_v30  ;;  %v1409_v16 = vsel %vm1404_vm3, %v1400_v9, %v1268_v45 }
 0x2c9   :  { %v1290_v4 = vpop.permute.xlu1 %1289  ;;  %v1288_v49 = vpop.permute.xlu0 %1287 }
 0x2ca   :  { %v1415_v13 = vsel %vm434_vm4, %v1407_v20, %v1288_v49 }
 0x2cd   :  { %v1294_v6 = vpop.permute.xlu1 %1293  ;;  %v1292_v18 = vpop.permute.xlu0 %1291 }
 0x2d1   :  { %v3515_v44 = vpop.permute.xlu1 %1297  ;;  %v3517_v58 = vpop.permute.xlu0 %1295 }
 0x2d5   :  { %v1310_v32 = vpop.permute.xlu1 %1309  ;;  %v1308_v40 = vpop.permute.xlu0 %1307 }
 0x2d6   :  { %v1422_v8 = vsel %vm443_vm5, %v1414_v60, %v1310_v32  ;;  %v1421_v5 = vsel %vm443_vm5, %v1413_v22, %v1308_v40  ;;  %v1416_v40 = vsel %vm434_vm4, %v1408_v3, %v1290_v4 }
 0x2d9   :  { %v1314_v57 = vpop.permute.xlu1 %1313  ;;  %v1312_v28 = vpop.permute.xlu0 %1311 }
 0x2da   :  { %v1423_v37 = vsel %vm443_vm5, %v1415_v13, %v1312_v28  ;;  %v1412_v28 = vsel %vm1404_vm3, %v3508_v19, %v1274_v61 }
 0x2dd   :  { %v1318_v14 = vpop.permute.xlu1 %1317  ;;  %v1316_v39 = vpop.permute.xlu0 %1315 }
 0x2e1   :  { %v3519_v36 = vpop.permute.xlu1 %1321  ;;  %v3521_v52 = vpop.permute.xlu0 %1319 }
 0x2e5   :  { %v1334_v0 = vpop.permute.xlu1 %1333  ;;  %v1332_v34 = vpop.permute.xlu0 %1331 }
 0x2e6   :  { %v1430_v43 = vsel %vm452_vm1, %v1422_v8, %v1334_v0  ;;  %v1429_v26 = vsel %vm452_vm1, %v1421_v5, %v1332_v34  ;;  %v1424_v34 = vsel %vm443_vm5, %v1416_v40, %v1314_v57  ;;  %v4553_v40 = vld [vmem:[#allocation169_spill] sm:$0xff] }
 0x2e9   :  { %v1338_v29 = vpop.permute.xlu1 %1337  ;;  %v1336_v24 = vpop.permute.xlu0 %1335 }
 0x2ea   :  { %v1432_v45 = vsel %vm452_vm1, %v1424_v34, %v1338_v29  ;;  %v1431_v4 = vsel %vm452_vm1, %v1423_v37, %v1336_v24  ;;  %v1417_v29 = vsel %vm434_vm4, %v1409_v16, %v1292_v18  ;;  %v4555_v34 = vld [vmem:[#allocation13_spill] sm:$0xff] }
 0x2eb   :  { %v1425_v61 = vsel %vm443_vm5, %v1417_v29, %v1316_v39  ;;  %v1411_v39 = vsel %vm1404_vm3, %v3511_v17, %v3513_v33  ;;  %v4565_v29 = vld [vmem:[#allocation18_spill] sm:$0xff] }
 0x2ed   :  { %v1342_v38 = vpop.permute.xlu1 %1341  ;;  %v1340_v62 = vpop.permute.xlu0 %1339 }
 0x2ee   :  { %v1433_v18 = vsel %vm452_vm1, %v1425_v61, %v1340_v62  ;;  %v4550_v62 = vld [vmem:[#allocation151_spill] sm:$0xff]  ;;  %v4569_v61 = vld [vmem:[#allocation20_spill] sm:$0xff] }
 0x2f1   :  { %v3523_v47 = vpop.permute.xlu1 %1345  ;;  %v3525_v55 = vpop.permute.xlu0 %1343 }
 0x2f5   :  { %v1358_v63 = vpop.permute.xlu1 %1357  ;;  %v1356_v27 = vpop.permute.xlu0 %1355 }
 0x2f6   :  { %v1439_v30 = vsel %vm1437_vm11, %v1430_v43, %v1358_v63  ;;  %v1438_v32 = vsel %vm1437_vm11, %v1429_v26, %v1356_v27  ;;  %v4551_v26 = vld [vmem:[#allocation152_spill] sm:$0xff] }
 0x2f7   :  { %v1448_v12 = vsel %vm4232_vm6, %v1439_v30, %v4546_v2  ;;  %v1447_v0 = vsel %vm4232_vm6, %v1438_v32, %v4547_v48  ;;  %v4554_v2 = vld [vmem:[#allocation170_spill] sm:$0xff] }
 0x2f8   :  { %v1456_v9 = vsel %vm479_vm9, %v1448_v12, %v4472_v35  ;;  %v1455_v46 = vsel %vm479_vm9, %v1447_v0, %v4474_v15  ;;  %v1418_v15 = vsel %vm434_vm4, %v1410_v59, %v1294_v6 }
 0x2f9   :  { %v1362_v49 = vpop.permute.xlu1 %1361  ;;  %v1360_v1 = vpop.permute.xlu0 %1359  ;;  %v1464_v54 = vsel %vm488_vm10, %v1456_v9, %v4486_v25  ;;  %v1463_v57 = vsel %vm488_vm10, %v1455_v46, %v4487_v23  ;;  %v4548_v25 = vld [vmem:[#allocation149_spill] sm:$0xff]  ;;  %v4549_v23 = vld [vmem:[#allocation150_spill] sm:$0xff]  ;;  %v1426_v19 = vsel %vm443_vm5, %v1418_v15, %v1318_v14 }
 0x2fa   :  { %v1441_v35 = vsel %vm1437_vm11, %v1432_v45, %v1362_v49  ;;  %v1440_v60 = vsel %vm1437_vm11, %v1431_v4, %v1360_v1  ;;  %1545 = vrot.lane.b32.xlu1 %v1464_v54, %s1990_s2  ;;  %1543 = vrot.lane.b32.xlu0 %v1463_v57, %s1990_s2  ;;  %v1434_v6 = vsel %vm452_vm1, %v1426_v19, %v1342_v38  ;;  %v4557_v9 = vld [vmem:[#allocation14_spill] sm:$0xff]  ;;  %v4559_v4 = vld [vmem:[#allocation15_spill] sm:$0xff]  ;;  %v4561_v54 = vld [vmem:[#allocation16_spill] sm:$0xff] }
 0x2fb   :  { %v1450_v24 = vsel %vm4232_vm6, %v1441_v35, %v4548_v25  ;;  %v1449_v22 = vsel %vm4232_vm6, %v1440_v60, %v4549_v23  ;;  %v1420_v38 = vsel %vm434_vm4, %v1412_v28, %v3515_v44  ;;  %v4558_v46 = vld [vmem:[#allocation6_spill] sm:$0xff]  ;;  %v4560_v49 = vld [vmem:[#allocation7_spill] sm:$0xff]  ;;  %v4562_v57 = vld [vmem:[#allocation5_spill] sm:$0xff] }
 0x2fc   :  { %v1458_v8 = vsel %vm479_vm9, %v1450_v24, %v4476_v56  ;;  %v1457_v5 = vsel %vm479_vm9, %v1449_v22, %v4478_v51  ;;  %v1428_v33 = vsel %vm443_vm5, %v1420_v38, %v3519_v36  ;;  %v399_v45 = vsel %vm398_vm0, %v4558_v46, %v4557_v9  ;;  %v4563_v35 = vld [vmem:[#allocation17_spill] sm:$0xff]  ;;  %v4566_v25 = vld [vmem:[#allocation10_spill] sm:$0xff]  ;;  %v4567_v23 = vld [vmem:[#allocation19_spill] sm:$0xff] }
 0x2fd   :  { %v1366_v3 = vpop.permute.xlu1 %1365  ;;  %v1364_v20 = vpop.permute.xlu0 %1363  ;;  %v1466_v43 = vsel %vm488_vm10, %v1458_v8, %v4488_v11  ;;  %v1465_v14 = vsel %vm488_vm10, %v1457_v5, %v4489_v41  ;;  %v1419_v11 = vsel %vm434_vm4, %v1411_v39, %v3517_v58  ;;  %v1436_v58 = vsel %vm452_vm1, %v1428_v33, %v3523_v47  ;;  %v4564_v60 = vld [vmem:[#allocation9_spill] sm:$0xff]  ;;  %v4568_v22 = vld [vmem:[#allocation11_spill] sm:$0xff]  ;;  %v4570_v8 = vld [vmem:[#allocation12_spill] sm:$0xff] }
 0x2fe   :  { %v1443_v56 = vsel %vm1437_vm11, %v1434_v6, %v1366_v3  ;;  %v1442_v51 = vsel %vm1437_vm11, %v1433_v18, %v1364_v20  ;;  %1549 = vrot.lane.b32.xlu1 %v1466_v43, %s1990_s2  ;;  %1547 = vrot.lane.b32.xlu0 %v1465_v14, %s1990_s2  ;;  %v1427_v63 = vsel %vm443_vm5, %v1419_v11, %v3521_v52  ;;  %v4571_v6 = vld [vmem:[#allocation21_spill] sm:$0xff]  ;;  %v4572_v3 = vld [vmem:[#allocation22_spill] sm:$0xff]  ;;  %v4573_v14 = vld [vmem:[#allocation23_spill] sm:$0xff] }
 0x2ff   :  { %v1452_v41 = vsel %vm4232_vm6, %v1443_v56, %v4550_v62  ;;  %v1451_v17 = vsel %vm4232_vm6, %v1442_v51, %v4551_v26  ;;  %v1435_v59 = vsel %vm452_vm1, %v1427_v63, %v3525_v55  ;;  %v402_v1 = vsel %vm398_vm0, %v4560_v49, %v4559_v4  ;;  %v4574_v56 = vld [vmem:[#allocation24_spill] sm:$0xff]  ;;  %v4575_v38 = vld [vmem:[#allocation25_spill] sm:$0xff]  ;;  %v4576_v62 = vld [vmem:[#allocation26_spill] sm:$0xff] }
 0x300   :  { %v1460_v27 = vsel %vm479_vm9, %v1452_v41, %v4480_v21  ;;  %v1459_v44 = vsel %vm479_vm9, %v1451_v17, %v4482_v31  ;;  %v4552_v31 = vld [vmem:[#allocation153_spill] sm:$0xff]  ;;  %v401_v28 = vsel %vm398_vm0, %v4562_v57, %v4561_v54  ;;  %v404_v15 = vsel %vm398_vm0, %v4564_v60, %v4563_v35  ;;  %v4578_v63 = vld [vmem:[#allocation30_spill] sm:$0xff]  ;;  %v4593_v46 = vld [vmem:[#allocation40_spill] sm:$0xff] }
 0x301   :  { %v1370_v16 = vpop.permute.xlu1 %1369  ;;  %v1368_v30 = vpop.permute.xlu0 %1367  ;;  %v1468_v36 = vsel %vm488_vm10, %v1460_v27, %v4490_v53  ;;  %v1467_v52 = vsel %vm488_vm10, %v1459_v44, %v4493_v50  ;;  %v403_v24 = vsel %vm398_vm0, %v4566_v25, %v4565_v29  ;;  %v406_v19 = vsel %vm398_vm0, %v4568_v22, %v4567_v23  ;;  %v4577_v17 = vld [vmem:[#allocation29_spill] sm:$0xff]  ;;  %v4579_v44 = vld [vmem:[#allocation27_spill] sm:$0xff]  ;;  %v4601_v35 = vld [vmem:[#allocation44_spill] sm:$0xff] }
 0x302   :  { %v1445_v32 = vsel %vm1437_vm11, %v1436_v58, %v1370_v16  ;;  %v1444_v21 = vsel %vm1437_vm11, %v1435_v59, %v1368_v30  ;;  %1553 = vrot.lane.b32.xlu1 %v1468_v36, %s1990_s2  ;;  %1551 = vrot.lane.b32.xlu0 %v1467_v52, %s1990_s2  ;;  %v405_v5 = vsel %vm398_vm0, %v4570_v8, %v4569_v61  ;;  %v4580_v59 = vld [vmem:[#allocation28_spill] sm:$0xff]  ;;  %v4581_v30 = vld [vmem:[#allocation31_spill] sm:$0xff]  ;;  %v4595_v4 = vld [vmem:[#allocation41_spill] sm:$0xff] }
 0x303   :  { %v1454_v47 = vsel %vm4232_vm6, %v1445_v32, %v4552_v31  ;;  %v1453_v55 = vsel %vm4232_vm6, %v1444_v21, %v4492_v7  ;;  %v408_v20 = vsel %vm407_vm14, %v399_v45, %v4572_v3  ;;  %v411_v39 = vsel %vm407_vm14, %v402_v1, %v4573_v14  ;;  %v4582_v52 = vld [vmem:[#allocation32_spill] sm:$0xff]  ;;  %v4583_v21 = vld [vmem:[#allocation33_spill] sm:$0xff]  ;;  %v4597_v1 = vld [vmem:[#allocation42_spill] sm:$0xff] }
 0x304   :  { %v1462_v53 = vsel %vm479_vm9, %v1454_v47, %v4484_v10  ;;  %v1461_v50 = vsel %vm479_vm9, %v1453_v55, %v4491_v42  ;;  %v4556_v42 = vld [vmem:[#allocation8_spill] sm:$0xff]  ;;  %v410_v51 = vsel %vm407_vm14, %v401_v28, %v4574_v56  ;;  %v413_v11 = vsel %vm407_vm14, %v404_v15, %v4575_v38  ;;  %v4584_v47 = vld [vmem:[#allocation34_spill] sm:$0xff]  ;;  %v4599_v57 = vld [vmem:[#allocation43_spill] sm:$0xff] }
 0x305   :  { %v1470_v13 = vsel %vm488_vm10, %v1462_v53, %v4553_v40  ;;  %v1469_v12 = vsel %vm488_vm10, %v1461_v50, %v4554_v2  ;;  %v3634_v48 = vpop.permute.xlu1 %1481  ;;  %v3636_v0 = vpop.permute.xlu0 %1479  ;;  %v400_v37 = vsel %vm398_vm0, %v4556_v42, %v4555_v34  ;;  %v412_v41 = vsel %vm407_vm14, %v403_v24, %v4576_v62  ;;  %v4585_v53 = vld [vmem:[#allocation35_spill] sm:$0xff]  ;;  %v4586_v40 = vld [vmem:[#allocation36_spill] sm:$0xff]  ;;  %v4587_v2 = vld [vmem:[#allocation37_spill] sm:$0xff] }
 0x306   :  { %1557 = vrot.lane.b32.xlu1 %v1470_v13, %s1990_s2  ;;  %1555 = vrot.lane.b32.xlu0 %v1469_v12, %s1990_s2  ;;  %v409_v18 = vsel %vm407_vm14, %v400_v37, %v4571_v6  ;;  %v417_v27 = vsel %vm416_vm2, %v408_v20, %v4578_v63  ;;  %v415_v58 = vsel %vm407_vm14, %v406_v19, %v4579_v44  ;;  %vm4588_vm0 = vcmask 89088   ;;  %v4589_v34 = vld [vmem:[#allocation38_spill] sm:$0xff]  ;;  %v4591_v37 = vld [vmem:[#allocation39_spill] sm:$0xff]  ;;  %v4602_v15 = vld [vmem:[#allocation45_spill] sm:$0xff] }
 0x307   :  { %v418_v33 = vsel %vm416_vm2, %v409_v18, %v4577_v17  ;;  %v414_v16 = vsel %vm407_vm14, %v405_v5, %v4580_v59  ;;  %v420_v36 = vsel %vm416_vm2, %v411_v39, %v4581_v30  ;;  %v419_v32 = vsel %vm416_vm2, %v410_v51, %v4582_v52  ;;  %vm4590_vm14 = vmmov %vm4588_vm0  ;;  %v4603_v25 = vld [vmem:[#allocation46_spill] sm:$0xff]  ;;  %v4604_v22 = vld [vmem:[#allocation47_spill] sm:$0xff] }
 0x308   :  { %v422_v31 = vsel %vm416_vm2, %v413_v11, %v4583_v21  ;;  %v421_v55 = vsel %vm416_vm2, %v412_v41, %v4584_v47  ;;  %v424_v50 = vsel %vm416_vm2, %v415_v58, %v4585_v53  ;;  %v423_v13 = vsel %vm416_vm2, %v414_v16, %v4586_v40  ;;  %vm4592_vm3 = vmmov %vm4588_vm0  ;;  %v4605_v61 = vld [vmem:[#allocation48_spill] sm:$0xff]  ;;  %v4606_v5 = vld [vmem:[#allocation49_spill] sm:$0xff] }
 0x309   :  { %v3638_v7 = vpop.permute.xlu1 %1485  ;;  %v3640_v10 = vpop.permute.xlu0 %1483  ;;  %v427_v12 = vsel %vm4588_vm0, %v418_v33, %v4587_v2  ;;  %v426_v42 = vsel %vm4590_vm14, %v417_v27, %v4589_v34  ;;  %v429_v9 = vsel %vm4592_vm3, %v420_v36, %v4591_v37  ;;  %vm4594_vm11 = vmmov %vm4588_vm0  ;;  %v432_v60 = vsel %vm4588_vm0, %v423_v13, %v4601_v35  ;;  %v4607_v18 = vld [vmem:[#allocation50_spill] sm:$0xff]  ;;  %v4608_v14 = vld [vmem:[#allocation51_spill] sm:$0xff] }
 0x30a   :  { %v428_v45 = vsel %vm4594_vm11, %v419_v32, %v4593_v46  ;;  %vm4596_vm6 = vmmov %vm4588_vm0  ;;  %v436_v29 = vsel %vm434_vm4, %v427_v12, %v4602_v15  ;;  %v435_v24 = vsel %vm434_vm4, %v426_v42, %v4603_v25  ;;  %v438_v19 = vsel %vm434_vm4, %v429_v9, %v4604_v22  ;;  %v4609_v56 = vld [vmem:[#allocation52_spill] sm:$0xff]  ;;  %v4610_v38 = vld [vmem:[#allocation53_spill] sm:$0xff] }
 0x30b   :  { %v431_v49 = vsel %vm4596_vm6, %v422_v31, %v4595_v4  ;;  %vm4598_vm15 = vmmov %vm4588_vm0  ;;  %v437_v8 = vsel %vm434_vm4, %v428_v45, %v4605_v61  ;;  %v441_v51 = vsel %vm434_vm4, %v432_v60, %v4609_v56  ;;  %v445_v11 = vsel %vm443_vm5, %v436_v29, %v4610_v38  ;;  %v4611_v62 = vld [vmem:[#allocation54_spill] sm:$0xff]  ;;  %v4612_v17 = vld [vmem:[#allocation55_spill] sm:$0xff] }
 0x30c   :  { %v430_v54 = vsel %vm4598_vm15, %v421_v55, %v4597_v1  ;;  %vm4600_vm2 = vmmov %vm4588_vm0  ;;  %v440_v6 = vsel %vm434_vm4, %v431_v49, %v4606_v5  ;;  %v444_v41 = vsel %vm443_vm5, %v435_v24, %v4611_v62  ;;  %v447_v33 = vsel %vm443_vm5, %v438_v19, %v4612_v17  ;;  %v4613_v63 = vld [vmem:[#allocation56_spill] sm:$0xff]  ;;  %v4614_v44 = vld [vmem:[#allocation57_spill] sm:$0xff] }
 0x30d   :  { %v3670_v43 = vpop.permute.xlu1 %1489  ;;  %v3680_v26 = vpop.permute.xlu0 %1487  ;;  %v433_v28 = vsel %vm4600_vm2, %v424_v50, %v4599_v57  ;;  %v439_v3 = vsel %vm434_vm4, %v430_v54, %v4607_v18  ;;  %v446_v27 = vsel %vm443_vm5, %v437_v8, %v4613_v63  ;;  %v449_v58 = vsel %vm443_vm5, %v440_v6, %v4614_v44  ;;  %v4615_v59 = vld [vmem:[#allocation58_spill] sm:$0xff]  ;;  %v4616_v30 = vld [vmem:[#allocation59_spill] sm:$0xff]  ;;  %v4617_v52 = vld [vmem:[#allocation60_spill] sm:$0xff] }
 0x30e   :  { %v442_v39 = vsel %vm434_vm4, %v433_v28, %v4608_v14  ;;  %v448_v16 = vsel %vm443_vm5, %v439_v3, %v4615_v59  ;;  %vm497_vm15 = vcmask 211968   ;;  %v450_v32 = vsel %vm443_vm5, %v441_v51, %v4617_v52  ;;  %v4618_v21 = vld [vmem:[#allocation61_spill] sm:$0xff]  ;;  %v4619_v47 = vld [vmem:[#allocation62_spill] sm:$0xff]  ;;  %v4620_v53 = vld [vmem:[#allocation63_spill] sm:$0xff] }
 0x30f   :  { %v451_v36 = vsel %vm443_vm5, %v442_v39, %v4616_v30  ;;  %v454_v31 = vsel %vm452_vm1, %v445_v11, %v4618_v21  ;;  %v453_v55 = vsel %vm452_vm1, %v444_v41, %v4619_v47  ;;  %v456_v50 = vsel %vm452_vm1, %v447_v33, %v4620_v53  ;;  %v4621_v40 = vld [vmem:[#allocation64_spill] sm:$0xff]  ;;  %v4622_v2 = vld [vmem:[#allocation65_spill] sm:$0xff]  ;;  %v4623_v34 = vld [vmem:[#allocation66_spill] sm:$0xff] }
 0x310   :  { %v455_v13 = vsel %vm452_vm1, %v446_v27, %v4621_v40  ;;  %v458_v12 = vsel %vm452_vm1, %v449_v58, %v4622_v2  ;;  %v457_v42 = vsel %vm452_vm1, %v448_v16, %v4623_v34  ;;  %v4624_v37 = vld [vmem:[#allocation67_spill] sm:$0xff]  ;;  %v4625_v46 = vld [vmem:[#allocation68_spill] sm:$0xff]  ;;  %v4626_v4 = vld [vmem:[#allocation69_spill] sm:$0xff]  ;;  %vm4682_vm4 = vcmask 293888  }
 0x311   :  { %v3722_v23 = vpop.permute.xlu1 %1493  ;;  %v3732_v20 = vpop.permute.xlu0 %1491  ;;  %v460_v9 = vsel %vm452_vm1, %v451_v36, %v4624_v37  ;;  %v459_v45 = vsel %vm452_vm1, %v450_v32, %v4625_v46  ;;  %v463_v49 = vsel %vm461_vm7, %v454_v31, %v4626_v4  ;;  %v4627_v1 = vld [vmem:[#allocation70_spill] sm:$0xff]  ;;  %v4628_v28 = vld [vmem:[#allocation71_spill] sm:$0xff]  ;;  %v4629_v60 = vld [vmem:[#allocation72_spill] sm:$0xff]  ;;  %vm1576_vm6 = vcmask 605184  }
 0x312   :  { %v462_v54 = vsel %vm461_vm7, %v453_v55, %v4627_v1  ;;  %v465_v35 = vsel %vm461_vm7, %v456_v50, %v4628_v28  ;;  %v464_v15 = vsel %vm461_vm7, %v455_v13, %v4629_v60  ;;  %v4630_v29 = vld [vmem:[#allocation73_spill] sm:$0xff]  ;;  %v4631_v24 = vld [vmem:[#allocation74_spill] sm:$0xff]  ;;  %v4632_v61 = vld [vmem:[#allocation75_spill] sm:$0xff]  ;;  %vm1585_vm14 = vcmask 965632  }
 0x313   :  { %v467_v25 = vsel %vm461_vm7, %v458_v12, %v4630_v29  ;;  %v466_v22 = vsel %vm461_vm7, %v457_v42, %v4631_v24  ;;  %v469_v8 = vsel %vm461_vm7, %v460_v9, %v4632_v61  ;;  %v4633_v5 = vld [vmem:[#allocation76_spill] sm:$0xff]  ;;  %v4634_v18 = vld [vmem:[#allocation77_spill] sm:$0xff]  ;;  %v4635_v14 = vld [vmem:[#allocation78_spill] sm:$0xff]  ;;  %vm1762_vm3 = vcmask 1040384  }
 0x314   :  { %v468_v6 = vsel %vm461_vm7, %v459_v45, %v4633_v5  ;;  %v472_v3 = vsel %vm470_vm8, %v463_v49, %v4634_v18  ;;  %v471_v39 = vsel %vm470_vm8, %v462_v54, %v4635_v14  ;;  %v4636_v56 = vld [vmem:[#allocation79_spill] sm:$0xff]  ;;  %v4637_v38 = vld [vmem:[#allocation80_spill] sm:$0xff]  ;;  %v4638_v62 = vld [vmem:[#allocation81_spill] sm:$0xff]  ;;  %vm1779_vm11 = vcmask 1041408  }
 0x315   :  { %v3774_v57 = vpop.permute.xlu1 %1513  ;;  %v3784_v19 = vpop.permute.xlu0 %1511  ;;  %v474_v51 = vsel %vm470_vm8, %v465_v35, %v4636_v56  ;;  %v473_v11 = vsel %vm470_vm8, %v464_v15, %v4637_v38  ;;  %v476_v41 = vsel %vm470_vm8, %v467_v25, %v4638_v62  ;;  %v4639_v17 = vld [vmem:[#allocation82_spill] sm:$0xff]  ;;  %v4640_v63 = vld [vmem:[#allocation83_spill] sm:$0xff]  ;;  %v4641_v44 = vld [vmem:[#allocation84_spill] sm:$0xff]  ;;  %vm1812_vm2 = vcmask 1042432  }
 0x316   :  { %v475_v33 = vsel %vm470_vm8, %v466_v22, %v4639_v17  ;;  %v478_v27 = vsel %vm470_vm8, %v469_v8, %v4640_v63  ;;  %v477_v58 = vsel %vm470_vm8, %v468_v6, %v4641_v44  ;;  %v4642_v59 = vld [vmem:[#allocation85_spill] sm:$0xff]  ;;  %v4643_v30 = vld [vmem:[#allocation86_spill] sm:$0xff]  ;;  %v4644_v52 = vld [vmem:[#allocation87_spill] sm:$0xff]  ;;  %vm1567_vm8 = vcmask 302080  }
 0x317   :  { %v481_v16 = vsel %vm479_vm9, %v472_v3, %v4642_v59  ;;  %v480_v36 = vsel %vm479_vm9, %v471_v39, %v4643_v30  ;;  %v483_v32 = vsel %vm479_vm9, %v474_v51, %v4644_v52  ;;  %v4645_v21 = vld [vmem:[#allocation88_spill] sm:$0xff]  ;;  %v4646_v47 = vld [vmem:[#allocation89_spill] sm:$0xff]  ;;  %v4647_v53 = vld [vmem:[#allocation90_spill] sm:$0xff]  ;;  %vm1832_vm0 = vcmask 125952  }
 0x318   :  { %v482_v31 = vsel %vm479_vm9, %v473_v11, %v4645_v21  ;;  %v485_v55 = vsel %vm479_vm9, %v476_v41, %v4646_v47  ;;  %v484_v50 = vsel %vm479_vm9, %v475_v33, %v4647_v53  ;;  %v4648_v40 = vld [vmem:[#allocation91_spill] sm:$0xff]  ;;  %v4649_v2 = vld [vmem:[#allocation92_spill] sm:$0xff]  ;;  %v4650_v34 = vld [vmem:[#allocation93_spill] sm:$0xff] }
 0x319   :  { %v487_v13 = vsel %vm479_vm9, %v478_v27, %v4648_v40  ;;  %v486_v12 = vsel %vm479_vm9, %v477_v58, %v4649_v2  ;;  %v490_v42 = vsel %vm488_vm10, %v481_v16, %v4650_v34  ;;  %v4651_v37 = vld [vmem:[#allocation94_spill] sm:$0xff]  ;;  %v1518_v46 = vpop.permute.xlu1 %1517  ;;  %v4652_v45 = vld [vmem:[#allocation95_spill] sm:$0xff]  ;;  %v4653_v49 = vld [vmem:[#allocation96_spill] sm:$0xff]  ;;  %v1516_v15 = vpop.permute.xlu0 %1515 }
 0x31a   :  { %v489_v9 = vsel %vm488_vm10, %v480_v36, %v4651_v37  ;;  %v492_v4 = vsel %vm488_vm10, %v483_v32, %v4652_v45  ;;  %v491_v1 = vsel %vm488_vm10, %v482_v31, %v4653_v49  ;;  %v4654_v54 = vld [vmem:[#allocation97_spill] sm:$0xff]  ;;  %v4655_v35 = vld [vmem:[#allocation98_spill] sm:$0xff]  ;;  %v4656_v29 = vld [vmem:[#allocation99_spill] sm:$0xff] }
 0x31b   :  { %v494_v28 = vsel %vm488_vm10, %v485_v55, %v4654_v54  ;;  %v493_v60 = vsel %vm488_vm10, %v484_v50, %v4655_v35  ;;  %v496_v25 = vsel %vm488_vm10, %v487_v13, %v4656_v29  ;;  %v4657_v24 = vld [vmem:[#allocation100_spill] sm:$0xff]  ;;  %v4658_v61 = vld [vmem:[#allocation101_spill] sm:$0xff]  ;;  %v4659_v5 = vld [vmem:[#allocation102_spill] sm:$0xff] }
 0x31c   :  { %v495_v22 = vsel %vm488_vm10, %v486_v12, %v4657_v24  ;;  %v499_v8 = vsel %vm497_vm15, %v490_v42, %v4658_v61  ;;  %v498_v6 = vsel %vm497_vm15, %v489_v9, %v4659_v5  ;;  %v4660_v18 = vld [vmem:[#allocation103_spill] sm:$0xff]  ;;  %v4661_v14 = vld [vmem:[#allocation104_spill] sm:$0xff]  ;;  %v4662_v56 = vld [vmem:[#allocation105_spill] sm:$0xff] }
 0x31d   :  { %v501_v3 = vsel %vm497_vm15, %v492_v4, %v4660_v18  ;;  %v500_v39 = vsel %vm497_vm15, %v491_v1, %v4661_v14  ;;  %v503_v51 = vsel %vm497_vm15, %v494_v28, %v4662_v56  ;;  %v4663_v38 = vld [vmem:[#allocation106_spill] sm:$0xff]  ;;  %v4664_v62 = vld [vmem:[#allocation107_spill] sm:$0xff]  ;;  %v4665_v17 = vld [vmem:[#allocation108_spill] sm:$0xff]  ;;  %v1522_v34 = vpop.permute.xlu1 %1521  ;;  %v1520_v28 = vpop.permute.xlu0 %1519 }
 0x31e   :  { %v502_v11 = vsel %vm497_vm15, %v493_v60, %v4663_v38  ;;  %v505_v41 = vsel %vm497_vm15, %v496_v25, %v4664_v62  ;;  %v504_v33 = vsel %vm497_vm15, %v495_v22, %v4665_v17  ;;  %v4666_v63 = vld [vmem:[#allocation109_spill] sm:$0xff]  ;;  %v4667_v44 = vld [vmem:[#allocation110_spill] sm:$0xff]  ;;  %v4668_v59 = vld [vmem:[#allocation111_spill] sm:$0xff]  ;;  %vm4690_vm15 = vcmask 130048  }
 0x31f   :  { %v508_v27 = vsel %vm506_vm12, %v499_v8, %v4666_v63  ;;  %v507_v58 = vsel %vm506_vm12, %v498_v6, %v4667_v44  ;;  %v510_v16 = vsel %vm506_vm12, %v501_v3, %v4668_v59  ;;  %v4669_v30 = vld [vmem:[#allocation112_spill] sm:$0xff]  ;;  %v4670_v52 = vld [vmem:[#allocation113_spill] sm:$0xff]  ;;  %v4671_v21 = vld [vmem:[#allocation114_spill] sm:$0xff] }
 0x320   :  { %v509_v36 = vsel %vm506_vm12, %v500_v39, %v4669_v30  ;;  %v512_v32 = vsel %vm506_vm12, %v503_v51, %v4670_v52  ;;  %v511_v31 = vsel %vm506_vm12, %v502_v11, %v4671_v21  ;;  %v4672_v47 = vld [vmem:[#allocation115_spill] sm:$0xff]  ;;  %v4673_v53 = vld [vmem:[#allocation117_spill] sm:$0xff]  ;;  %v4674_v40 = vld [vmem:[#allocation118_spill] sm:$0xff] }
 0x321   :  { %v514_v55 = vsel %vm506_vm12, %v505_v41, %v4672_v47  ;;  %v517_v50 = vsel %vm515_vm13, %v508_v27, %v4673_v53  ;;  %v516_v13 = vsel %vm515_vm13, %v507_v58, %v4674_v40  ;;  %v4675_v2 = vld [vmem:[#allocation119_spill] sm:$0xff]  ;;  %v4676_v42 = vld [vmem:[#allocation116_spill] sm:$0xff]  ;;  %v4678_v4 = vld [vmem:[#allocation121_spill] sm:$0xff]  ;;  %v1526_v14 = vpop.permute.xlu1 %1525  ;;  %v1524_v11 = vpop.permute.xlu0 %1523 }
 0x322   :  { %v519_v12 = vsel %vm515_vm13, %v510_v16, %v4675_v2  ;;  %v513_v37 = vsel %vm506_vm12, %v504_v33, %v4676_v42  ;;  %v4677_v9 = vld [vmem:[#allocation120_spill] sm:$0xff]  ;;  %v521_v49 = vsel %vm515_vm13, %v512_v32, %v4678_v4  ;;  %v4679_v1 = vld [vmem:[#allocation122_spill] sm:$0xff]  ;;  %v4680_v35 = vld [vmem:[#allocation123_spill] sm:$0xff]  ;;  %v526_v24 = vsel %vm4682_vm4, %v517_v50, %v4666_v63 }
 0x323   :  { %v518_v45 = vsel %vm515_vm13, %v509_v36, %v4677_v9  ;;  %v520_v54 = vsel %vm515_vm13, %v511_v31, %v4679_v1  ;;  %v523_v60 = vsel %vm515_vm13, %v514_v55, %v4680_v35  ;;  %v4681_v29 = vld [vmem:[#allocation124_spill] sm:$0xff]  ;;  %vm4683_vm5 = vmmov %vm4682_vm4  ;;  %v1569_v39 = vsel %vm1567_vm8, %v526_v24, %v3634_v48 }
 0x324   :  { %v522_v25 = vsel %vm515_vm13, %v513_v37, %v4681_v29  ;;  %v525_v22 = vsel %vm4683_vm5, %v516_v13, %v4667_v44  ;;  %vm4684_vm7 = vmmov %vm4682_vm4 }
 0x325   :  { %v528_v61 = vsel %vm4684_vm7, %v519_v12, %v4668_v59  ;;  %vm4685_vm9 = vmmov %vm4682_vm4  ;;  %v1568_v56 = vsel %vm1567_vm8, %v525_v22, %v3636_v0  ;;  %v1578_v0 = vsel %vm1576_vm6, %v1569_v39, %v3774_v57 }
 0x326   :  { %v527_v8 = vsel %vm4685_vm9, %v518_v45, %v4669_v30  ;;  %vm4686_vm10 = vmmov %vm4682_vm4  ;;  %v1571_v51 = vsel %vm1567_vm8, %v528_v61, %v3638_v7  ;;  %v1577_v7 = vsel %vm1576_vm6, %v1568_v56, %v3784_v19 }
 0x327   :  { %v530_v5 = vsel %vm4686_vm10, %v521_v49, %v4670_v52  ;;  %vm4687_vm12 = vmmov %vm4682_vm4  ;;  %v1570_v38 = vsel %vm1567_vm8, %v527_v8, %v3640_v10  ;;  %v1580_v10 = vsel %vm1576_vm6, %v1571_v51, %v1518_v46 }
 0x328   :  { %v529_v6 = vsel %vm4687_vm12, %v520_v54, %v4671_v21  ;;  %vm4688_vm13 = vmmov %vm4682_vm4  ;;  %v1573_v62 = vsel %vm1567_vm8, %v530_v5, %v3670_v43  ;;  %v3924_v33 = vsel %vm1576_vm6, %v1570_v38, %v1516_v15 }
 0x329   :  { %v532_v18 = vsel %vm4688_vm13, %v523_v60, %v4672_v47  ;;  %vm4689_vm1 = vmmov %vm4682_vm4  ;;  %v1572_v41 = vsel %vm1567_vm8, %v529_v6, %v3680_v26  ;;  %v3927_v43 = vsel %vm1576_vm6, %v1573_v62, %v1522_v34 }
 0x32a   :  { %v531_v3 = vsel %vm4689_vm1, %v522_v25, %v4676_v42  ;;  %v1575_v17 = vsel %vm1567_vm8, %v532_v18, %v3722_v23  ;;  %v3930_v26 = vsel %vm1576_vm6, %v1572_v41, %v1520_v28  ;;  %vm4691_vm4 = vmmov %vm4690_vm15 }
 0x32b   :  { %v1574_v48 = vsel %vm1567_vm8, %v531_v3, %v3732_v20  ;;  %v3933_v23 = vsel %vm1576_vm6, %v1575_v17, %v1526_v14  ;;  %vm4692_vm5 = vmmov %vm4691_vm4 }
 0x32c   :  { %v3936_v20 = vsel %vm1576_vm6, %v1574_v48, %v1524_v11  ;;  %vm4693_vm7 = vmmov %vm4691_vm4 }
 0x32d   :  { %vm4694_vm8 = vmmov %vm4691_vm4 }
 0x32e   :  { %vm4695_vm9 = vmmov %vm4691_vm4 }
 0x32f   :  { %vm4696_vm10 = vmmov %vm4691_vm4 }
 0x330   :  { %vm4697_vm12 = vmmov %vm4691_vm4 }
 0x36c   :  { %v1546_v57 = vpop.permute.xlu1 %1545  ;;  %v1544_v15 = vpop.permute.xlu0 %1543 }
 0x36d   :  { %v1587_v19 = vsel %vm1585_vm14, %v1578_v0, %v1546_v57  ;;  %v1605_v63 = vrot.slane %v1546_v57, 1  ;;  %v1637_v46 = vrot.slane %v1546_v57, 7  ;;  %v1669_v27 = vrot.slane %v1546_v57, 6 }
 0x36e   :  { %v1604_v44 = vrot.slane %v1587_v19, 1  ;;  %v1636_v58 = vrot.slane %v1587_v19, 7  ;;  %v1668_v59 = vrot.slane %v1587_v19, 6  ;;  %v1700_v16 = vrot.slane %v1587_v19, 5 }
 0x36f   :  { %v1701_v30 = vrot.slane %v1546_v57, 5  ;;  %v1732_v36 = vrot.slane %v1587_v19, 3  ;;  %v1733_v52 = vrot.slane %v1546_v57, 3  ;;  %v1766_v32 = vsel %vm1762_vm3, %v1605_v63, %v1637_v46 }
 0x370   :  { %v1765_v21 = vsel %vm1762_vm3, %v1604_v44, %v1636_v58  ;;  %v1783_v31 = vsel %vm1779_vm11, %v1766_v32, %v1669_v27  ;;  %v1798_v47 = vsel %vm1779_vm11, %v1668_v59, %v1700_v16  ;;  %v1586_v55 = vsel %vm1585_vm14, %v1577_v7, %v1544_v15  ;;  %v1550_v49 = vpop.permute.xlu1 %1549  ;;  %v1548_v6 = vpop.permute.xlu0 %1547 }
 0x371   :  { %v1782_v53 = vsel %vm1779_vm11, %v1765_v21, %v1668_v59  ;;  %v1799_v50 = vsel %vm1779_vm11, %v1669_v27, %v1701_v30  ;;  %v1815_v40 = vsel %vm1812_vm2, %v1798_v47, %v1732_v36  ;;  %1835 = vst.msk [vmem:[%s4128_s1 + $0x28] sm:$0xff] %vm4690_vm15, %v1783_v31  ;;  %v1602_v13 = vrot.slane %v1586_v55, 1 }
 0x372   :  { %v1816_v2 = vsel %vm1812_vm2, %v1799_v50, %v1733_v52  ;;  %1834 = vst [vmem:[%s4128_s1 + $0x20] sm:$0xff] %v1782_v53  ;;  %1836 = vst [vmem:[%s4128_s1 + $0x30] sm:$0xf] %v1815_v40  ;;  %v1603_v12 = vrot.slane %v1544_v15, 1  ;;  %v1634_v34 = vrot.slane %v1586_v55, 7  ;;  %v1635_v42 = vrot.slane %v1544_v15, 7 }
 0x373   :  { %1837 = vst.msk [vmem:[%s4128_s1 + $0x38] sm:$0xf] %vm1832_vm0, %v1816_v2  ;;  %v1666_v37 = vrot.slane %v1586_v55, 6  ;;  %v1667_v9 = vrot.slane %v1544_v15, 6  ;;  %v1698_v45 = vrot.slane %v1586_v55, 5  ;;  %v1699_v4 = vrot.slane %v1544_v15, 5 }
 0x374   :  { %v1730_v1 = vrot.slane %v1586_v55, 3  ;;  %v1731_v54 = vrot.slane %v1544_v15, 3  ;;  %v1763_v28 = vsel %vm1762_vm3, %v1602_v13, %v1634_v34  ;;  %v1764_v35 = vsel %vm1762_vm3, %v1603_v12, %v1635_v42  ;;  %v1554_v27 = vpop.permute.xlu1 %1553  ;;  %v1552_v34 = vpop.permute.xlu0 %1551 }
 0x375   :  { %v1780_v60 = vsel %vm1779_vm11, %v1763_v28, %v1666_v37  ;;  %v1781_v29 = vsel %vm1779_vm11, %v1764_v35, %v1667_v9  ;;  %v1796_v25 = vsel %vm1779_vm11, %v1666_v37, %v1698_v45  ;;  %v1797_v24 = vsel %vm1779_vm11, %v1667_v9, %v1699_v4 }
 0x376   :  { %v1813_v22 = vsel %vm1812_vm2, %v1796_v25, %v1730_v1  ;;  %v1814_v61 = vsel %vm1812_vm2, %v1797_v24, %v1731_v54  ;;  %1829 = vst [vmem:[%s4128_s1] sm:$0xff] %v1780_v60  ;;  %1830 = vst.msk [vmem:[%s4128_s1 + $0x8] sm:$0xff] %vm4691_vm4, %v1781_v29  ;;  %v1589_v8 = vsel %vm1585_vm14, %v1580_v10, %v1550_v49  ;;  %v1609_v5 = vrot.slane %v1550_v49, 1 }
 0x377   :  { %1831 = vst [vmem:[%s4128_s1 + $0x10] sm:$0xf] %v1813_v22  ;;  %1833 = vst.msk [vmem:[%s4128_s1 + $0x18] sm:$0xf] %vm1832_vm0, %v1814_v61  ;;  %v1608_v18 = vrot.slane %v1589_v8, 1  ;;  %v1640_v3 = vrot.slane %v1589_v8, 7  ;;  %v1588_v48 = vsel %vm1585_vm14, %v3924_v33, %v1548_v6  ;;  %v1591_v31 = vsel %vm1585_vm14, %v3927_v43, %v1554_v27 }
 0x378   :  { %v1641_v14 = vrot.slane %v1550_v49, 7  ;;  %v1672_v39 = vrot.slane %v1589_v8, 6  ;;  %v1673_v56 = vrot.slane %v1550_v49, 6  ;;  %v1704_v51 = vrot.slane %v1589_v8, 5 }
 0x379   :  { %v1705_v38 = vrot.slane %v1550_v49, 5  ;;  %v1736_v11 = vrot.slane %v1589_v8, 3  ;;  %v1737_v62 = vrot.slane %v1550_v49, 3  ;;  %v1769_v41 = vsel %vm1762_vm3, %v1608_v18, %v1640_v3 }
 0x37a   :  { %v1770_v17 = vsel %vm1762_vm3, %v1609_v5, %v1641_v14  ;;  %v1786_v0 = vsel %vm1779_vm11, %v1769_v41, %v1672_v39  ;;  %v1802_v10 = vsel %vm1779_vm11, %v1672_v39, %v1704_v51  ;;  %v1606_v33 = vrot.slane %v1588_v48, 1 }
 0x37b   :  { %v1787_v7 = vsel %vm1779_vm11, %v1770_v17, %v1673_v56  ;;  %v1803_v57 = vsel %vm1779_vm11, %v1673_v56, %v1705_v38  ;;  %v1819_v19 = vsel %vm1812_vm2, %v1802_v10, %v1736_v11  ;;  %1842 = vst [vmem:[%s4128_s1 + $0x60] sm:$0xff] %v1786_v0  ;;  %v1607_v46 = vrot.slane %v1548_v6, 1  ;;  %v1558_v56 = vpop.permute.xlu1 %1557 }
 0x37c   :  { %v1820_v63 = vsel %vm1812_vm2, %v1803_v57, %v1737_v62  ;;  %1843 = vst.msk [vmem:[%s4128_s1 + $0x68] sm:$0xff] %vm4692_vm5, %v1787_v7  ;;  %1844 = vst [vmem:[%s4128_s1 + $0x70] sm:$0xf] %v1819_v19  ;;  %v1638_v15 = vrot.slane %v1588_v48, 7  ;;  %v1639_v44 = vrot.slane %v1548_v6, 7  ;;  %v1670_v58 = vrot.slane %v1588_v48, 6 }
 0x37d   :  { %1845 = vst.msk [vmem:[%s4128_s1 + $0x78] sm:$0xf] %vm1832_vm0, %v1820_v63  ;;  %v1671_v59 = vrot.slane %v1548_v6, 6  ;;  %v1702_v16 = vrot.slane %v1588_v48, 5  ;;  %v1703_v30 = vrot.slane %v1548_v6, 5  ;;  %v1734_v36 = vrot.slane %v1588_v48, 3  ;;  %v1556_v63 = vpop.permute.xlu0 %1555 }
 0x37e   :  { %v1735_v52 = vrot.slane %v1548_v6, 3  ;;  %v1767_v32 = vsel %vm1762_vm3, %v1606_v33, %v1638_v15  ;;  %v1768_v21 = vsel %vm1762_vm3, %v1607_v46, %v1639_v44  ;;  %v1613_v47 = vrot.slane %v1554_v27, 1 }
 0x37f   :  { %v1784_v55 = vsel %vm1779_vm11, %v1767_v32, %v1670_v58  ;;  %v1785_v53 = vsel %vm1779_vm11, %v1768_v21, %v1671_v59  ;;  %v1800_v50 = vsel %vm1779_vm11, %v1670_v58, %v1702_v16  ;;  %v1801_v40 = vsel %vm1779_vm11, %v1671_v59, %v1703_v30 }
 0x380   :  { %v1817_v13 = vsel %vm1812_vm2, %v1800_v50, %v1734_v36  ;;  %v1818_v2 = vsel %vm1812_vm2, %v1801_v40, %v1735_v52  ;;  %1838 = vst [vmem:[%s4128_s1 + $0x40] sm:$0xff] %v1784_v55  ;;  %1839 = vst.msk [vmem:[%s4128_s1 + $0x48] sm:$0xff] %vm4693_vm7, %v1785_v53  ;;  %v1612_v43 = vrot.slane %v1591_v31, 1  ;;  %v1644_v12 = vrot.slane %v1591_v31, 7 }
 0x381   :  { %1840 = vst [vmem:[%s4128_s1 + $0x50] sm:$0xf] %v1817_v13  ;;  %1841 = vst.msk [vmem:[%s4128_s1 + $0x58] sm:$0xf] %vm1832_vm0, %v1818_v2  ;;  %v1645_v42 = vrot.slane %v1554_v27, 7  ;;  %v1676_v37 = vrot.slane %v1591_v31, 6  ;;  %v1590_v29 = vsel %vm1585_vm14, %v3930_v26, %v1552_v34  ;;  %v1593_v57 = vsel %vm1585_vm14, %v3933_v23, %v1558_v56 }
 0x382   :  { %v1677_v9 = vrot.slane %v1554_v27, 6  ;;  %v1708_v45 = vrot.slane %v1591_v31, 5  ;;  %v1709_v4 = vrot.slane %v1554_v27, 5  ;;  %v1740_v49 = vrot.slane %v1591_v31, 3 }
 0x383   :  { %v1741_v1 = vrot.slane %v1554_v27, 3  ;;  %v1773_v54 = vsel %vm1762_vm3, %v1612_v43, %v1644_v12  ;;  %v1774_v28 = vsel %vm1762_vm3, %v1613_v47, %v1645_v42  ;;  %v1610_v61 = vrot.slane %v1590_v29, 1 }
 0x384   :  { %v1790_v35 = vsel %vm1779_vm11, %v1773_v54, %v1676_v37  ;;  %v1806_v60 = vsel %vm1779_vm11, %v1676_v37, %v1708_v45  ;;  %v1791_v25 = vsel %vm1779_vm11, %v1774_v28, %v1677_v9  ;;  %v1807_v24 = vsel %vm1779_vm11, %v1677_v9, %v1709_v4 }
 0x385   :  { %v1823_v22 = vsel %vm1812_vm2, %v1806_v60, %v1740_v49  ;;  %1850 = vst [vmem:[%s4128_s1 + $0xa0] sm:$0xff] %v1790_v35  ;;  %v1824_v8 = vsel %vm1812_vm2, %v1807_v24, %v1741_v1  ;;  %1851 = vst.msk [vmem:[%s4128_s1 + $0xa8] sm:$0xff] %vm4694_vm8, %v1791_v25  ;;  %v1611_v26 = vrot.slane %v1552_v34, 1  ;;  %v1642_v5 = vrot.slane %v1590_v29, 7 }
 0x386   :  { %1852 = vst [vmem:[%s4128_s1 + $0xb0] sm:$0xf] %v1823_v22  ;;  %v1643_v6 = vrot.slane %v1552_v34, 7  ;;  %1853 = vst.msk [vmem:[%s4128_s1 + $0xb8] sm:$0xf] %vm1832_vm0, %v1824_v8  ;;  %v1674_v18 = vrot.slane %v1590_v29, 6  ;;  %v1592_v52 = vsel %vm1585_vm14, %v3936_v20, %v1556_v63 }
 0x387   :  { %v1675_v3 = vrot.slane %v1552_v34, 6  ;;  %v1706_v14 = vrot.slane %v1590_v29, 5  ;;  %v1707_v39 = vrot.slane %v1552_v34, 5  ;;  %v1738_v51 = vrot.slane %v1590_v29, 3 }
 0x388   :  { %v1739_v38 = vrot.slane %v1552_v34, 3  ;;  %v1771_v11 = vsel %vm1762_vm3, %v1610_v61, %v1642_v5  ;;  %v1772_v62 = vsel %vm1762_vm3, %v1611_v26, %v1643_v6  ;;  %v1617_v19 = vrot.slane %v1558_v56, 1 }
 0x389   :  { %v1788_v41 = vsel %vm1779_vm11, %v1771_v11, %v1674_v18  ;;  %v1789_v17 = vsel %vm1779_vm11, %v1772_v62, %v1675_v3  ;;  %v1804_v48 = vsel %vm1779_vm11, %v1674_v18, %v1706_v14  ;;  %v1805_v0 = vsel %vm1779_vm11, %v1675_v3, %v1707_v39 }
 0x38a   :  { %v1821_v7 = vsel %vm1812_vm2, %v1804_v48, %v1738_v51  ;;  %v1822_v10 = vsel %vm1812_vm2, %v1805_v0, %v1739_v38  ;;  %1846 = vst [vmem:[%s4128_s1 + $0x80] sm:$0xff] %v1788_v41  ;;  %1847 = vst.msk [vmem:[%s4128_s1 + $0x88] sm:$0xff] %vm4695_vm9, %v1789_v17  ;;  %v1616_v33 = vrot.slane %v1593_v57, 1  ;;  %v1648_v46 = vrot.slane %v1593_v57, 7 }
 0x38b   :  { %1848 = vst [vmem:[%s4128_s1 + $0x90] sm:$0xf] %v1821_v7  ;;  %1849 = vst.msk [vmem:[%s4128_s1 + $0x98] sm:$0xf] %vm1832_vm0, %v1822_v10  ;;  %v1649_v27 = vrot.slane %v1558_v56, 7  ;;  %v1680_v15 = vrot.slane %v1593_v57, 6 }
 0x38c   :  { %v1681_v44 = vrot.slane %v1558_v56, 6  ;;  %v1712_v58 = vrot.slane %v1593_v57, 5  ;;  %v1713_v59 = vrot.slane %v1558_v56, 5  ;;  %v1744_v16 = vrot.slane %v1593_v57, 3 }
 0x38d   :  { %v1745_v23 = vrot.slane %v1558_v56, 3  ;;  %v1777_v30 = vsel %vm1762_vm3, %v1616_v33, %v1648_v46  ;;  %v1778_v36 = vsel %vm1762_vm3, %v1617_v19, %v1649_v27  ;;  %v1614_v20 = vrot.slane %v1592_v52, 1 }
 0x38e   :  { %v1794_v32 = vsel %vm1779_vm11, %v1777_v30, %v1680_v15  ;;  %v1795_v21 = vsel %vm1779_vm11, %v1778_v36, %v1681_v44  ;;  %v1810_v31 = vsel %vm1779_vm11, %v1680_v15, %v1712_v58  ;;  %v1811_v47 = vsel %vm1779_vm11, %v1681_v44, %v1713_v59 }
 0x38f   :  { %v1827_v55 = vsel %vm1812_vm2, %v1810_v31, %v1744_v16  ;;  %v1828_v53 = vsel %vm1812_vm2, %v1811_v47, %v1745_v23  ;;  %1858 = vst [vmem:[%s4128_s1 + $0xe0] sm:$0xff] %v1794_v32  ;;  %1859 = vst.msk [vmem:[%s4128_s1 + $0xe8] sm:$0xff] %vm4696_vm10, %v1795_v21  ;;  %v1615_v50 = vrot.slane %v1556_v63, 1  ;;  %v1646_v40 = vrot.slane %v1592_v52, 7 }
 0x390   :  { %1860 = vst [vmem:[%s4128_s1 + $0xf0] sm:$0xf] %v1827_v55  ;;  %1861 = vst.msk [vmem:[%s4128_s1 + $0xf8] sm:$0xf] %vm1832_vm0, %v1828_v53  ;;  %v1647_v13 = vrot.slane %v1556_v63, 7  ;;  %v1678_v2 = vrot.slane %v1592_v52, 6 }
 0x391   :  { %v1679_v43 = vrot.slane %v1556_v63, 6  ;;  %v1710_v12 = vrot.slane %v1592_v52, 5  ;;  %v1711_v34 = vrot.slane %v1556_v63, 5  ;;  %v1742_v42 = vrot.slane %v1592_v52, 3 }
 0x392   :  { %v1743_v37 = vrot.slane %v1556_v63, 3  ;;  %v1775_v9 = vsel %vm1762_vm3, %v1614_v20, %v1646_v40  ;;  %v1776_v45 = vsel %vm1762_vm3, %v1615_v50, %v1647_v13 }
 0x393   :  { %v1792_v4 = vsel %vm1779_vm11, %v1775_v9, %v1678_v2  ;;  %v1793_v49 = vsel %vm1779_vm11, %v1776_v45, %v1679_v43  ;;  %v1808_v1 = vsel %vm1779_vm11, %v1678_v2, %v1710_v12  ;;  %v1809_v54 = vsel %vm1779_vm11, %v1679_v43, %v1711_v34 }
 0x394   :  { %v1825_v28 = vsel %vm1812_vm2, %v1808_v1, %v1742_v42  ;;  %v1826_v35 = vsel %vm1812_vm2, %v1809_v54, %v1743_v37  ;;  %1854 = vst [vmem:[%s4128_s1 + $0xc0] sm:$0xff] %v1792_v4  ;;  %1855 = vst.msk [vmem:[%s4128_s1 + $0xc8] sm:$0xff] %vm4697_vm12, %v1793_v49 }
 0x395   :  { %1856 = vst [vmem:[%s4128_s1 + $0xd0] sm:$0xf] %v1825_v28  ;;  %1857 = vst.msk [vmem:[%s4128_s1 + $0xd8] sm:$0xf] %vm1832_vm0, %v1826_v35 }
 0x396   :  { %1866 = vsyncpa [#allocation3], 1 }

</bundles_post_ra>
